<compile_context>
chip_gen: v6e
topology: v6e:2x2x1
jax: 0.10.0
libtpu: 0.0.40
codegen_flags: <defaults>
</compile_context>

<pallas_src>
import functools
import math

import jax
import jax.numpy as jnp
from jax.experimental import pallas as pl
from jax.experimental.pallas import tpu as pltpu


# ---------------------------- in-kernel relayout helpers ----------------------------

def _dense_to_tokens(dense, tile_windows, d):
    """(seq_len, tile_windows*d) -> (tile_windows*seq_len, d). Static slices + concat."""
    return jnp.concatenate(
        [dense[:, w * d:(w + 1) * d] for w in range(tile_windows)], axis=0)


def _tokens_to_dense(tok, tile_windows, seq_len):
    """(tile_windows*seq_len, d) -> (seq_len, tile_windows*d). Static slices + concat."""
    return jnp.concatenate(
        [tok[w * seq_len:(w + 1) * seq_len, :] for w in range(tile_windows)], axis=1)


# --------------------------------- fused gMLP kernel ---------------------------------

def _gmlp_fused_kernel(x_ref, g1_ref, be1_ref,
                       w1u_ref, b1u_ref, w1v_ref, b1v_ref,
                       g2_ref, be2_ref, sw_ref, sb_ref,
                       w2_ref, b2_ref, o_ref,
                       *, tile_windows, seq_len, eps):
    d = w2_ref.shape[0]

    # lane-dense load, then relayout to token-major (rows, d) for per-token math
    x_dense = x_ref[...]                                      # (L, W*d) f32
    x = _dense_to_tokens(x_dense, tile_windows, d)            # (W*L, d) f32

    # ---- pre-norm LayerNorm over channels ----
    mu = jnp.mean(x, axis=-1, keepdims=True)
    var = jnp.mean(jnp.square(x - mu), axis=-1, keepdims=True)
    xn = (x - mu) * jax.lax.rsqrt(var + eps)
    xn = xn * g1_ref[...] + be1_ref[...]
    xn_bf = xn.astype(jnp.bfloat16)

    # ---- channel proj1 as two lane-0-aligned halves (+bias, +GELU) ----
    u = jnp.dot(xn_bf, w1u_ref[...], preferred_element_type=jnp.float32) + b1u_ref[...]
    v = jnp.dot(xn_bf, w1v_ref[...], preferred_element_type=jnp.float32) + b1v_ref[...]
    u = jax.nn.gelu(u, approximate=True)                      # tanh GELU -> EUP
    v = jax.nn.gelu(v, approximate=True)

    # ---- spatial gating unit: LN then Conv1d(seq_len, seq_len, 1) over tokens ----
    mu2 = jnp.mean(v, axis=-1, keepdims=True)
    var2 = jnp.mean(jnp.square(v - mu2), axis=-1, keepdims=True)
    vn = (v - mu2) * jax.lax.rsqrt(var2 + eps)
    vn = vn * g2_ref[...] + be2_ref[...]

    # pack every window of the tile into the lane dim and gate ALL of them with a
    # single MXU call: (L, L) @ (L, W*d); Conv1d bias is a (L, 1) column.
    v_dense = _tokens_to_dense(vn.astype(jnp.bfloat16), tile_windows, seq_len)
    vg_dense = jnp.dot(sw_ref[...], v_dense,
                       preferred_element_type=jnp.float32) + sb_ref[...]
    vg = _dense_to_tokens(vg_dense, tile_windows, d)          # back to (W*L, d)

    gated = u * vg

    # ---- channel proj2 (+bias); residual add + store in the lane-dense layout ----
    y = jnp.dot(gated.astype(jnp.bfloat16), w2_ref[...],
                preferred_element_type=jnp.float32) + b2_ref[...]
    y_dense = _tokens_to_dense(y, tile_windows, seq_len)
    o_ref[...] = (y_dense + x_dense).astype(o_ref.dtype)


# ------------------------------- tiling / grid choice --------------------------------

def _choose_tiling(n_win, seq_len, d, target_rows=512):
    """Pick (tile_windows, grid_n): bounded tiles, (8,128)-tileable, >=2 steps if possible."""
    g_sub = 8 // math.gcd(seq_len, 8)            # tile_windows*seq_len % 8 == 0
    g_lane = 128 // math.gcd(d, 128)             # tile_windows*d % 128 == 0 (dense I/O)
    g = (g_sub * g_lane) // math.gcd(g_sub, g_lane)
    n_win_cap = -(-n_win // g) * g               # n_win rounded up to granularity

    # bound tile rows so the ~dozen live (rows, d) f32 temporaries stay << v7x's
    # 32 MiB scoped VMEM (and vreg/spill pressure stays flat as n_win grows)
    target_rows = min(target_rows, max(g * seq_len, (6 << 20) // max(1, 48 * d)))
    tw = (target_rows // seq_len) // g * g
    tw = max(g, min(tw, n_win_cap))

    # prefer >= 2 grid steps when there is enough work (v7x second core + pipelining)
    if n_win_cap >= 2 * g and tw > n_win_cap // 2:
        half = n_win_cap // 2
        tw = max(g, -(-half // g) * g)

    grid_n = -(-n_win // tw)
    return tw, grid_n


# --------------------------------- pallas_call wrapper --------------------------------

@functools.partial(jax.jit, static_argnames=("seq_len", "tile_windows", "eps"))
def gmlp_block_pallas(tokens_dense, params, *, seq_len, tile_windows, eps=1e-5):
    """tokens_dense: (seq_len, n_windows_padded * d) f32, window-packed along lanes."""
    L, cols = tokens_dense.shape
    d = params['w2'].shape[0]
    lane_block = tile_windows * d
    grid_n = cols // lane_block

    w1, b1 = params['w1'], params['b1']
    w1_u, w1_v = w1[:, :d], w1[:, d:]                    # contiguous halves (trace time)
    b1_u, b1_v = b1[:d].reshape(1, d), b1[d:].reshape(1, d)

    def const(shape):                                    # weights resident across steps
        return pl.BlockSpec(shape, lambda i: (0, 0))

    return pl.pallas_call(
        functools.partial(_gmlp_fused_kernel, tile_windows=tile_windows,
                          seq_len=seq_len, eps=eps),
        out_shape=jax.ShapeDtypeStruct((L, cols), jnp.float32),
        grid_spec=pltpu.PrefetchScalarGridSpec(
            num_scalar_prefetch=0,
            grid=(grid_n,),
            in_specs=[
                pl.BlockSpec((L, lane_block), lambda i: (0, i)),   # tokens (lane-dense)
                const((1, d)), const((1, d)),                      # LN1 gamma / beta
                const((d, d)), const((1, d)),                      # proj1 "u" half
                const((d, d)), const((1, d)),                      # proj1 "v" half
                const((1, d)), const((1, d)),                      # SGU LN gamma / beta
                const((seq_len, seq_len)),                         # spatial weight
                const((seq_len, 1)),                               # spatial bias column
                const((d, d)), const((1, d)),                      # proj2 W / b
            ],
            out_specs=pl.BlockSpec((L, lane_block), lambda i: (0, i)),
        ),
        compiler_params=pltpu.CompilerParams(
            dimension_semantics=("parallel",)),
    )(tokens_dense,
      params['norm_g'].reshape(1, d), params['norm_b'].reshape(1, d),
      w1_u, b1_u, w1_v, b1_v,
      params['sgu_g'].reshape(1, d), params['sgu_b'].reshape(1, d),
      params['spatial_w'], params['spatial_b'].reshape(seq_len, 1),
      params['w2'], params['b2'].reshape(1, d))


# ------------------------------------ WMLP forward ------------------------------------

def wmlp_forward(x, params, w_size):
    """x: (b, c, h, w) NCHW float32 -> (b, c, h, w)."""
    b, c, h, w = x.shape
    hn, wn = h // w_size, w // w_size
    seq_len = w_size * w_size
    n_win = b * hn * wn

    tile_windows, grid_n = _choose_tiling(n_win, seq_len, c)
    n_win_pad = grid_n * tile_windows

    # window partition (same token/window ordering as the PyTorch view/permute chain),
    # packed window-major along the LANE axis: tokens_dense[l, win*c + ch]
    xw = x.reshape(b, c, hn, w_size, wn, w_size)
    xw = jnp.transpose(xw, (3, 5, 0, 2, 4, 1))          # (ws, ws, b, hn, wn, c)
    tokens_dense = xw.reshape(seq_len, n_win * c)
    if n_win_pad != n_win:
        tokens_dense = jnp.pad(tokens_dense, ((0, 0), (0, (n_win_pad - n_win) * c)))

    y = gmlp_block_pallas(tokens_dense, params, seq_len=seq_len,
                          tile_windows=tile_windows)

    if n_win_pad != n_win:
        y = y[:, :n_win * c]
    # window reverse (inverse of the partition above)
    y = y.reshape(w_size, w_size, b, hn, wn, c)
    y = jnp.transpose(y, (2, 5, 3, 0, 4, 1))            # (b, c, hn, ws, wn, ws)
    return y.reshape(b, c, h, w)


# -------------------------------- pure-JAX reference ----------------------------------

def _gmlp_reference(tokens3d, params, eps=1e-5):
    x = tokens3d                                        # (n_win, L, d) f32
    d = x.shape[-1]
    mu = jnp.mean(x, -1, keepdims=True)
    var = jnp.var(x, -1, keepdims=True)
    xn = (x - mu) / jnp.sqrt(var + eps) * params['norm_g'] + params['norm_b']
    h = xn @ params['w1'].astype(jnp.float32) + params['b1']
    h = jax.nn.gelu(h, approximate=True)
    u, v = h[..., :d], h[..., d:]
    mu2 = jnp.mean(v, -1, keepdims=True)
    var2 = jnp.var(v, -1, keepdims=True)
    vn = (v - mu2) / jnp.sqrt(var2 + eps) * params['sgu_g'] + params['sgu_b']
    sw = params['spatial_w'].astype(jnp.float32)
    vg = jnp.einsum('lm,wmd->wld', sw, vn) + params['spatial_b'][None, :, None]
    y = (u * vg) @ params['w2'].astype(jnp.float32) + params['b2']
    return y + x


def wmlp_reference(x, params, w_size):
    b, c, h, w = x.shape
    hn, wn = h // w_size, w // w_size
    seq_len = w_size * w_size
    xw = x.reshape(b, c, hn, w_size, wn, w_size)
    xw = jnp.transpose(xw, (0, 2, 4, 3, 5, 1)).reshape(-1, seq_len, c)
    y = _gmlp_reference(xw, params)
    y = y.reshape(b, hn, wn, w_size, w_size, c)
    return jnp.transpose(y, (0, 5, 1, 3, 2, 4)).reshape(b, c, h, w)


# ---------------------------------- parameter init ------------------------------------

def init_wmlp_params(key, d_model, w_size):
    seq_len = w_size * w_size
    k1, k2, k3 = jax.random.split(key, 3)
    return {
        'norm_g': jnp.ones((d_model,), jnp.float32),
        'norm_b': jnp.zeros((d_model,), jnp.float32),
        # pre-transposed (din, dout), bf16 MXU operands, f32 accumulation in-kernel
        'w1': (jax.random.normal(k1, (d_model, 2 * d_model), jnp.float32)
               * 0.02).astype(jnp.bfloat16),
        'b1': jnp.zeros((2 * d_model,), jnp.float32),
        'sgu_g': jnp.ones((d_model,), jnp.float32),
        'sgu_b': jnp.zeros((d_model,), jnp.float32),
        'spatial_w': (jax.random.normal(k2, (seq_len, seq_len), jnp.float32)
                      * 0.01).astype(jnp.bfloat16),
        'spatial_b': jnp.ones((seq_len,), jnp.float32),   # Conv1d bias init = 1
        'w2': (jax.random.normal(k3, (d_model, d_model), jnp.float32)
               * 0.02).astype(jnp.bfloat16),
        'b2': jnp.zeros((d_model,), jnp.float32),
    }


# --------------------------------------- main ------------------------------------------

if __name__ == "__main__":
    D_MODEL = 32
    W_SIZE = 4            # seq_len = 16 tokens per window
    B, H, W = 2, 16, 16   # 2 * 4 * 4 = 32 windows -> 2 grid steps of 16 windows each

    key = jax.random.PRNGKey(0)
    kx, kp = jax.random.split(key)
    x = jax.random.normal(kx, (B, D_MODEL, H, W), jnp.float32)
    params = init_wmlp_params(kp, D_MODEL, W_SIZE)

    y = wmlp_forward(x, params, W_SIZE)
    jax.block_until_ready(y)

    assert y.shape == (B, D_MODEL, H, W)
    y_ref = wmlp_reference(x, params, W_SIZE)
    max_err = float(jnp.max(jnp.abs(y - y_ref)))
    assert max_err < 2e-2, f"mismatch vs reference: {max_err}"

    print("KERNEL_OK")
</pallas_src>

<mosaic_0001>
module attributes {stable_mosaic.version = 11 : i64} {
  func.func @_gmlp_fused_kernel(%arg0: i32, %arg1: memref<16x512xf32, #tpu.memory_space<vmem>>, %arg2: memref<1x32xf32, #tpu.memory_space<vmem>>, %arg3: memref<1x32xf32, #tpu.memory_space<vmem>>, %arg4: memref<32x32xbf16, #tpu.memory_space<vmem>>, %arg5: memref<1x32xf32, #tpu.memory_space<vmem>>, %arg6: memref<32x32xbf16, #tpu.memory_space<vmem>>, %arg7: memref<1x32xf32, #tpu.memory_space<vmem>>, %arg8: memref<1x32xf32, #tpu.memory_space<vmem>>, %arg9: memref<1x32xf32, #tpu.memory_space<vmem>>, %arg10: memref<16x16xbf16, #tpu.memory_space<vmem>>, %arg11: memref<16x1xf32, #tpu.memory_space<vmem>>, %arg12: memref<32x32xbf16, #tpu.memory_space<vmem>>, %arg13: memref<1x32xf32, #tpu.memory_space<vmem>>, %arg14: memref<16x512xf32, #tpu.memory_space<vmem>>) attributes {dimension_semantics = [#tpu.dimension_semantics<parallel>], iteration_bounds = array<i64: 2>, scalar_prefetch = 0 : i64, scratch_operands = 0 : i64, tpu.core_type = #tpu.core_type<tc>, window_params = [{transform_indices = @transform_0, window_bounds = array<i64: 16, 512>}, {pipeline_mode = #tpu.pipeline_mode<synchronous>, transform_indices = @transform_1, window_bounds = array<i64: 1, 32>}, {pipeline_mode = #tpu.pipeline_mode<synchronous>, transform_indices = @transform_2, window_bounds = array<i64: 1, 32>}, {pipeline_mode = #tpu.pipeline_mode<synchronous>, transform_indices = @transform_3, window_bounds = array<i64: 32, 32>}, {pipeline_mode = #tpu.pipeline_mode<synchronous>, transform_indices = @transform_4, window_bounds = array<i64: 1, 32>}, {pipeline_mode = #tpu.pipeline_mode<synchronous>, transform_indices = @transform_5, window_bounds = array<i64: 32, 32>}, {pipeline_mode = #tpu.pipeline_mode<synchronous>, transform_indices = @transform_6, window_bounds = array<i64: 1, 32>}, {pipeline_mode = #tpu.pipeline_mode<synchronous>, transform_indices = @transform_7, window_bounds = array<i64: 1, 32>}, {pipeline_mode = #tpu.pipeline_mode<synchronous>, transform_indices = @transform_8, window_bounds = array<i64: 1, 32>}, {pipeline_mode = #tpu.pipeline_mode<synchronous>, transform_indices = @transform_9, window_bounds = array<i64: 16, 16>}, {pipeline_mode = #tpu.pipeline_mode<synchronous>, transform_indices = @transform_10, window_bounds = array<i64: 16, 1>}, {pipeline_mode = #tpu.pipeline_mode<synchronous>, transform_indices = @transform_11, window_bounds = array<i64: 32, 32>}, {pipeline_mode = #tpu.pipeline_mode<synchronous>, transform_indices = @transform_12, window_bounds = array<i64: 1, 32>}, {transform_indices = @transform_13, window_bounds = array<i64: 16, 512>}]} {
    %c0 = arith.constant 0 : index
    %c0_0 = arith.constant 0 : index
    %0 = vector.load %arg1[%c0, %c0_0] : memref<16x512xf32, #tpu.memory_space<vmem>>, vector<16x512xf32>
    %1 = vector.extract_strided_slice %0 {offsets = [0, 0], sizes = [16, 32], strides = [1, 1]} : vector<16x512xf32> to vector<16x32xf32>
    %2 = vector.extract_strided_slice %0 {offsets = [0, 32], sizes = [16, 32], strides = [1, 1]} : vector<16x512xf32> to vector<16x32xf32>
    %3 = vector.extract_strided_slice %0 {offsets = [0, 64], sizes = [16, 32], strides = [1, 1]} : vector<16x512xf32> to vector<16x32xf32>
    %4 = vector.extract_strided_slice %0 {offsets = [0, 96], sizes = [16, 32], strides = [1, 1]} : vector<16x512xf32> to vector<16x32xf32>
    %5 = vector.extract_strided_slice %0 {offsets = [0, 128], sizes = [16, 32], strides = [1, 1]} : vector<16x512xf32> to vector<16x32xf32>
    %6 = vector.extract_strided_slice %0 {offsets = [0, 160], sizes = [16, 32], strides = [1, 1]} : vector<16x512xf32> to vector<16x32xf32>
    %7 = vector.extract_strided_slice %0 {offsets = [0, 192], sizes = [16, 32], strides = [1, 1]} : vector<16x512xf32> to vector<16x32xf32>
    %8 = vector.extract_strided_slice %0 {offsets = [0, 224], sizes = [16, 32], strides = [1, 1]} : vector<16x512xf32> to vector<16x32xf32>
    %9 = vector.extract_strided_slice %0 {offsets = [0, 256], sizes = [16, 32], strides = [1, 1]} : vector<16x512xf32> to vector<16x32xf32>
    %10 = vector.extract_strided_slice %0 {offsets = [0, 288], sizes = [16, 32], strides = [1, 1]} : vector<16x512xf32> to vector<16x32xf32>
    %11 = vector.extract_strided_slice %0 {offsets = [0, 320], sizes = [16, 32], strides = [1, 1]} : vector<16x512xf32> to vector<16x32xf32>
    %12 = vector.extract_strided_slice %0 {offsets = [0, 352], sizes = [16, 32], strides = [1, 1]} : vector<16x512xf32> to vector<16x32xf32>
    %13 = vector.extract_strided_slice %0 {offsets = [0, 384], sizes = [16, 32], strides = [1, 1]} : vector<16x512xf32> to vector<16x32xf32>
    %14 = vector.extract_strided_slice %0 {offsets = [0, 416], sizes = [16, 32], strides = [1, 1]} : vector<16x512xf32> to vector<16x32xf32>
    %15 = vector.extract_strided_slice %0 {offsets = [0, 448], sizes = [16, 32], strides = [1, 1]} : vector<16x512xf32> to vector<16x32xf32>
    %16 = vector.extract_strided_slice %0 {offsets = [0, 480], sizes = [16, 32], strides = [1, 1]} : vector<16x512xf32> to vector<16x32xf32>
    %17 = tpu.concatenate %1, %2, %3, %4, %5, %6, %7, %8, %9, %10, %11, %12, %13, %14, %15, %16 in 0 : vector<16x32xf32>, vector<16x32xf32>, vector<16x32xf32>, vector<16x32xf32>, vector<16x32xf32>, vector<16x32xf32>, vector<16x32xf32>, vector<16x32xf32>, vector<16x32xf32>, vector<16x32xf32>, vector<16x32xf32>, vector<16x32xf32>, vector<16x32xf32>, vector<16x32xf32>, vector<16x32xf32>, vector<16x32xf32> -> vector<256x32xf32>
    %cst = arith.constant dense<0.000000e+00> : vector<256xf32>
    %18 = vector.multi_reduction <add>, %17, %cst [1] : vector<256x32xf32> to vector<256xf32>
    %19 = vector.shape_cast %18 : vector<256xf32> to vector<256x1xf32>
    %cst_1 = arith.constant 3.200000e+01 : f32
    %20 = vector.broadcast %cst_1 : f32 to vector<256x1xf32>
    %21 = arith.divf %19, %20 : vector<256x1xf32>
    %22 = vector.broadcast %21 : vector<256x1xf32> to vector<256x32xf32>
    %23 = arith.subf %17, %22 : vector<256x32xf32>
    %24 = arith.mulf %23, %23 : vector<256x32xf32>
    %cst_2 = arith.constant dense<0.000000e+00> : vector<256xf32>
    %25 = vector.multi_reduction <add>, %24, %cst_2 [1] : vector<256x32xf32> to vector<256xf32>
    %26 = vector.shape_cast %25 : vector<256xf32> to vector<256x1xf32>
    %cst_3 = arith.constant 3.200000e+01 : f32
    %27 = vector.broadcast %cst_3 : f32 to vector<256x1xf32>
    %28 = arith.divf %26, %27 : vector<256x1xf32>
    %29 = vector.broadcast %21 : vector<256x1xf32> to vector<256x32xf32>
    %30 = arith.subf %17, %29 : vector<256x32xf32>
    %cst_4 = arith.constant 9.99999974E-6 : f32
    %31 = vector.broadcast %cst_4 : f32 to vector<256x1xf32>
    %32 = arith.addf %28, %31 : vector<256x1xf32>
    %33 = math.rsqrt %32 : vector<256x1xf32>
    %34 = vector.broadcast %33 : vector<256x1xf32> to vector<256x32xf32>
    %35 = arith.mulf %30, %34 : vector<256x32xf32>
    %c0_5 = arith.constant 0 : index
    %c0_6 = arith.constant 0 : index
    %36 = vector.load %arg2[%c0_5, %c0_6] : memref<1x32xf32, #tpu.memory_space<vmem>>, vector<1x32xf32>
    %37 = vector.broadcast %36 : vector<1x32xf32> to vector<256x32xf32>
    %38 = arith.mulf %35, %37 : vector<256x32xf32>
    %c0_7 = arith.constant 0 : index
    %c0_8 = arith.constant 0 : index
    %39 = vector.load %arg3[%c0_7, %c0_8] : memref<1x32xf32, #tpu.memory_space<vmem>>, vector<1x32xf32>
    %40 = vector.broadcast %39 : vector<1x32xf32> to vector<256x32xf32>
    %41 = arith.addf %38, %40 : vector<256x32xf32>
    %42 = arith.truncf %41 : vector<256x32xf32> to vector<256x32xbf16>
    %c0_9 = arith.constant 0 : index
    %c0_10 = arith.constant 0 : index
    %43 = vector.load %arg4[%c0_9, %c0_10] : memref<32x32xbf16, #tpu.memory_space<vmem>>, vector<32x32xbf16>
    %cst_11 = arith.constant dense<0.000000e+00> : vector<256x32xf32>
    %44 = tpu.matmul %42, %43, %cst_11 {dimension_numbers = #tpu.dot_dimension_numbers<[1], [0], [0], [1], [0, 0, 1, 1], [], []>} : vector<256x32xbf16>, vector<32x32xbf16>, vector<256x32xf32> -> vector<256x32xf32>
    %c0_12 = arith.constant 0 : index
    %c0_13 = arith.constant 0 : index
    %45 = vector.load %arg5[%c0_12, %c0_13] : memref<1x32xf32, #tpu.memory_space<vmem>>, vector<1x32xf32>
    %46 = vector.broadcast %45 : vector<1x32xf32> to vector<256x32xf32>
    %47 = arith.addf %44, %46 : vector<256x32xf32>
    %c0_14 = arith.constant 0 : index
    %c0_15 = arith.constant 0 : index
    %48 = vector.load %arg6[%c0_14, %c0_15] : memref<32x32xbf16, #tpu.memory_space<vmem>>, vector<32x32xbf16>
    %cst_16 = arith.constant dense<0.000000e+00> : vector<256x32xf32>
    %49 = tpu.matmul %42, %48, %cst_16 {dimension_numbers = #tpu.dot_dimension_numbers<[1], [0], [0], [1], [0, 0, 1, 1], [], []>} : vector<256x32xbf16>, vector<32x32xbf16>, vector<256x32xf32> -> vector<256x32xf32>
    %c0_17 = arith.constant 0 : index
    %c0_18 = arith.constant 0 : index
    %50 = vector.load %arg7[%c0_17, %c0_18] : memref<1x32xf32, #tpu.memory_space<vmem>>, vector<1x32xf32>
    %51 = vector.broadcast %50 : vector<1x32xf32> to vector<256x32xf32>
    %52 = arith.addf %49, %51 : vector<256x32xf32>
    %53 = arith.mulf %47, %47 : vector<256x32xf32>
    %54 = arith.mulf %47, %53 : vector<256x32xf32>
    %cst_19 = arith.constant 4.471500e-02 : f32
    %55 = vector.broadcast %cst_19 : f32 to vector<256x32xf32>
    %56 = arith.mulf %55, %54 : vector<256x32xf32>
    %57 = arith.addf %47, %56 : vector<256x32xf32>
    %cst_20 = arith.constant 0.797884583 : f32
    %58 = vector.broadcast %cst_20 : f32 to vector<256x32xf32>
    %59 = arith.mulf %58, %57 : vector<256x32xf32>
    %60 = math.tanh %59 : vector<256x32xf32>
    %cst_21 = arith.constant 1.000000e+00 : f32
    %61 = vector.broadcast %cst_21 : f32 to vector<256x32xf32>
    %62 = arith.addf %61, %60 : vector<256x32xf32>
    %cst_22 = arith.constant 5.000000e-01 : f32
    %63 = vector.broadcast %cst_22 : f32 to vector<256x32xf32>
    %64 = arith.mulf %63, %62 : vector<256x32xf32>
    %65 = arith.mulf %47, %64 : vector<256x32xf32>
    %66 = arith.mulf %52, %52 : vector<256x32xf32>
    %67 = arith.mulf %52, %66 : vector<256x32xf32>
    %cst_23 = arith.constant 4.471500e-02 : f32
    %68 = vector.broadcast %cst_23 : f32 to vector<256x32xf32>
    %69 = arith.mulf %68, %67 : vector<256x32xf32>
    %70 = arith.addf %52, %69 : vector<256x32xf32>
    %cst_24 = arith.constant 0.797884583 : f32
    %71 = vector.broadcast %cst_24 : f32 to vector<256x32xf32>
    %72 = arith.mulf %71, %70 : vector<256x32xf32>
    %73 = math.tanh %72 : vector<256x32xf32>
    %cst_25 = arith.constant 1.000000e+00 : f32
    %74 = vector.broadcast %cst_25 : f32 to vector<256x32xf32>
    %75 = arith.addf %74, %73 : vector<256x32xf32>
    %cst_26 = arith.constant 5.000000e-01 : f32
    %76 = vector.broadcast %cst_26 : f32 to vector<256x32xf32>
    %77 = arith.mulf %76, %75 : vector<256x32xf32>
    %78 = arith.mulf %52, %77 : vector<256x32xf32>
    %cst_27 = arith.constant dense<0.000000e+00> : vector<256xf32>
    %79 = vector.multi_reduction <add>, %78, %cst_27 [1] : vector<256x32xf32> to vector<256xf32>
    %80 = vector.shape_cast %79 : vector<256xf32> to vector<256x1xf32>
    %cst_28 = arith.constant 3.200000e+01 : f32
    %81 = vector.broadcast %cst_28 : f32 to vector<256x1xf32>
    %82 = arith.divf %80, %81 : vector<256x1xf32>
    %83 = vector.broadcast %82 : vector<256x1xf32> to vector<256x32xf32>
    %84 = arith.subf %78, %83 : vector<256x32xf32>
    %85 = arith.mulf %84, %84 : vector<256x32xf32>
    %cst_29 = arith.constant dense<0.000000e+00> : vector<256xf32>
    %86 = vector.multi_reduction <add>, %85, %cst_29 [1] : vector<256x32xf32> to vector<256xf32>
    %87 = vector.shape_cast %86 : vector<256xf32> to vector<256x1xf32>
    %cst_30 = arith.constant 3.200000e+01 : f32
    %88 = vector.broadcast %cst_30 : f32 to vector<256x1xf32>
    %89 = arith.divf %87, %88 : vector<256x1xf32>
    %90 = vector.broadcast %82 : vector<256x1xf32> to vector<256x32xf32>
    %91 = arith.subf %78, %90 : vector<256x32xf32>
    %cst_31 = arith.constant 9.99999974E-6 : f32
    %92 = vector.broadcast %cst_31 : f32 to vector<256x1xf32>
    %93 = arith.addf %89, %92 : vector<256x1xf32>
    %94 = math.rsqrt %93 : vector<256x1xf32>
    %95 = vector.broadcast %94 : vector<256x1xf32> to vector<256x32xf32>
    %96 = arith.mulf %91, %95 : vector<256x32xf32>
    %c0_32 = arith.constant 0 : index
    %c0_33 = arith.constant 0 : index
    %97 = vector.load %arg8[%c0_32, %c0_33] : memref<1x32xf32, #tpu.memory_space<vmem>>, vector<1x32xf32>
    %98 = vector.broadcast %97 : vector<1x32xf32> to vector<256x32xf32>
    %99 = arith.mulf %96, %98 : vector<256x32xf32>
    %c0_34 = arith.constant 0 : index
    %c0_35 = arith.constant 0 : index
    %100 = vector.load %arg9[%c0_34, %c0_35] : memref<1x32xf32, #tpu.memory_space<vmem>>, vector<1x32xf32>
    %101 = vector.broadcast %100 : vector<1x32xf32> to vector<256x32xf32>
    %102 = arith.addf %99, %101 : vector<256x32xf32>
    %103 = arith.truncf %102 : vector<256x32xf32> to vector<256x32xbf16>
    %104 = vector.extract_strided_slice %103 {offsets = [0, 0], sizes = [16, 32], strides = [1, 1]} : vector<256x32xbf16> to vector<16x32xbf16>
    %105 = vector.extract_strided_slice %103 {offsets = [16, 0], sizes = [16, 32], strides = [1, 1]} : vector<256x32xbf16> to vector<16x32xbf16>
    %106 = vector.extract_strided_slice %103 {offsets = [32, 0], sizes = [16, 32], strides = [1, 1]} : vector<256x32xbf16> to vector<16x32xbf16>
    %107 = vector.extract_strided_slice %103 {offsets = [48, 0], sizes = [16, 32], strides = [1, 1]} : vector<256x32xbf16> to vector<16x32xbf16>
    %108 = vector.extract_strided_slice %103 {offsets = [64, 0], sizes = [16, 32], strides = [1, 1]} : vector<256x32xbf16> to vector<16x32xbf16>
    %109 = vector.extract_strided_slice %103 {offsets = [80, 0], sizes = [16, 32], strides = [1, 1]} : vector<256x32xbf16> to vector<16x32xbf16>
    %110 = vector.extract_strided_slice %103 {offsets = [96, 0], sizes = [16, 32], strides = [1, 1]} : vector<256x32xbf16> to vector<16x32xbf16>
    %111 = vector.extract_strided_slice %103 {offsets = [112, 0], sizes = [16, 32], strides = [1, 1]} : vector<256x32xbf16> to vector<16x32xbf16>
    %112 = vector.extract_strided_slice %103 {offsets = [128, 0], sizes = [16, 32], strides = [1, 1]} : vector<256x32xbf16> to vector<16x32xbf16>
    %113 = vector.extract_strided_slice %103 {offsets = [144, 0], sizes = [16, 32], strides = [1, 1]} : vector<256x32xbf16> to vector<16x32xbf16>
    %114 = vector.extract_strided_slice %103 {offsets = [160, 0], sizes = [16, 32], strides = [1, 1]} : vector<256x32xbf16> to vector<16x32xbf16>
    %115 = vector.extract_strided_slice %103 {offsets = [176, 0], sizes = [16, 32], strides = [1, 1]} : vector<256x32xbf16> to vector<16x32xbf16>
    %116 = vector.extract_strided_slice %103 {offsets = [192, 0], sizes = [16, 32], strides = [1, 1]} : vector<256x32xbf16> to vector<16x32xbf16>
    %117 = vector.extract_strided_slice %103 {offsets = [208, 0], sizes = [16, 32], strides = [1, 1]} : vector<256x32xbf16> to vector<16x32xbf16>
    %118 = vector.extract_strided_slice %103 {offsets = [224, 0], sizes = [16, 32], strides = [1, 1]} : vector<256x32xbf16> to vector<16x32xbf16>
    %119 = vector.extract_strided_slice %103 {offsets = [240, 0], sizes = [16, 32], strides = [1, 1]} : vector<256x32xbf16> to vector<16x32xbf16>
    %120 = tpu.concatenate %104, %105, %106, %107, %108, %109, %110, %111, %112, %113, %114, %115, %116, %117, %118, %119 in 1 : vector<16x32xbf16>, vector<16x32xbf16>, vector<16x32xbf16>, vector<16x32xbf16>, vector<16x32xbf16>, vector<16x32xbf16>, vector<16x32xbf16>, vector<16x32xbf16>, vector<16x32xbf16>, vector<16x32xbf16>, vector<16x32xbf16>, vector<16x32xbf16>, vector<16x32xbf16>, vector<16x32xbf16>, vector<16x32xbf16>, vector<16x32xbf16> -> vector<16x512xbf16>
    %c0_36 = arith.constant 0 : index
    %c0_37 = arith.constant 0 : index
    %121 = vector.load %arg10[%c0_36, %c0_37] : memref<16x16xbf16, #tpu.memory_space<vmem>>, vector<16x16xbf16>
    %cst_38 = arith.constant dense<0.000000e+00> : vector<16x512xf32>
    %122 = tpu.matmul %121, %120, %cst_38 {dimension_numbers = #tpu.dot_dimension_numbers<[1], [0], [0], [1], [0, 0, 1, 1], [], []>} : vector<16x16xbf16>, vector<16x512xbf16>, vector<16x512xf32> -> vector<16x512xf32>
    %c0_39 = arith.constant 0 : index
    %c0_40 = arith.constant 0 : index
    %123 = vector.load %arg11[%c0_39, %c0_40] : memref<16x1xf32, #tpu.memory_space<vmem>>, vector<16x1xf32>
    %124 = vector.broadcast %123 : vector<16x1xf32> to vector<16x512xf32>
    %125 = arith.addf %122, %124 : vector<16x512xf32>
    %126 = vector.extract_strided_slice %125 {offsets = [0, 0], sizes = [16, 32], strides = [1, 1]} : vector<16x512xf32> to vector<16x32xf32>
    %127 = vector.extract_strided_slice %125 {offsets = [0, 32], sizes = [16, 32], strides = [1, 1]} : vector<16x512xf32> to vector<16x32xf32>
    %128 = vector.extract_strided_slice %125 {offsets = [0, 64], sizes = [16, 32], strides = [1, 1]} : vector<16x512xf32> to vector<16x32xf32>
    %129 = vector.extract_strided_slice %125 {offsets = [0, 96], sizes = [16, 32], strides = [1, 1]} : vector<16x512xf32> to vector<16x32xf32>
    %130 = vector.extract_strided_slice %125 {offsets = [0, 128], sizes = [16, 32], strides = [1, 1]} : vector<16x512xf32> to vector<16x32xf32>
    %131 = vector.extract_strided_slice %125 {offsets = [0, 160], sizes = [16, 32], strides = [1, 1]} : vector<16x512xf32> to vector<16x32xf32>
    %132 = vector.extract_strided_slice %125 {offsets = [0, 192], sizes = [16, 32], strides = [1, 1]} : vector<16x512xf32> to vector<16x32xf32>
    %133 = vector.extract_strided_slice %125 {offsets = [0, 224], sizes = [16, 32], strides = [1, 1]} : vector<16x512xf32> to vector<16x32xf32>
    %134 = vector.extract_strided_slice %125 {offsets = [0, 256], sizes = [16, 32], strides = [1, 1]} : vector<16x512xf32> to vector<16x32xf32>
    %135 = vector.extract_strided_slice %125 {offsets = [0, 288], sizes = [16, 32], strides = [1, 1]} : vector<16x512xf32> to vector<16x32xf32>
    %136 = vector.extract_strided_slice %125 {offsets = [0, 320], sizes = [16, 32], strides = [1, 1]} : vector<16x512xf32> to vector<16x32xf32>
    %137 = vector.extract_strided_slice %125 {offsets = [0, 352], sizes = [16, 32], strides = [1, 1]} : vector<16x512xf32> to vector<16x32xf32>
    %138 = vector.extract_strided_slice %125 {offsets = [0, 384], sizes = [16, 32], strides = [1, 1]} : vector<16x512xf32> to vector<16x32xf32>
    %139 = vector.extract_strided_slice %125 {offsets = [0, 416], sizes = [16, 32], strides = [1, 1]} : vector<16x512xf32> to vector<16x32xf32>
    %140 = vector.extract_strided_slice %125 {offsets = [0, 448], sizes = [16, 32], strides = [1, 1]} : vector<16x512xf32> to vector<16x32xf32>
    %141 = vector.extract_strided_slice %125 {offsets = [0, 480], sizes = [16, 32], strides = [1, 1]} : vector<16x512xf32> to vector<16x32xf32>
    %142 = tpu.concatenate %126, %127, %128, %129, %130, %131, %132, %133, %134, %135, %136, %137, %138, %139, %140, %141 in 0 : vector<16x32xf32>, vector<16x32xf32>, vector<16x32xf32>, vector<16x32xf32>, vector<16x32xf32>, vector<16x32xf32>, vector<16x32xf32>, vector<16x32xf32>, vector<16x32xf32>, vector<16x32xf32>, vector<16x32xf32>, vector<16x32xf32>, vector<16x32xf32>, vector<16x32xf32>, vector<16x32xf32>, vector<16x32xf32> -> vector<256x32xf32>
    %143 = arith.mulf %65, %142 : vector<256x32xf32>
    %144 = arith.truncf %143 : vector<256x32xf32> to vector<256x32xbf16>
    %c0_41 = arith.constant 0 : index
    %c0_42 = arith.constant 0 : index
    %145 = vector.load %arg12[%c0_41, %c0_42] : memref<32x32xbf16, #tpu.memory_space<vmem>>, vector<32x32xbf16>
    %cst_43 = arith.constant dense<0.000000e+00> : vector<256x32xf32>
    %146 = tpu.matmul %144, %145, %cst_43 {dimension_numbers = #tpu.dot_dimension_numbers<[1], [0], [0], [1], [0, 0, 1, 1], [], []>} : vector<256x32xbf16>, vector<32x32xbf16>, vector<256x32xf32> -> vector<256x32xf32>
    %c0_44 = arith.constant 0 : index
    %c0_45 = arith.constant 0 : index
    %147 = vector.load %arg13[%c0_44, %c0_45] : memref<1x32xf32, #tpu.memory_space<vmem>>, vector<1x32xf32>
    %148 = vector.broadcast %147 : vector<1x32xf32> to vector<256x32xf32>
    %149 = arith.addf %146, %148 : vector<256x32xf32>
    %150 = vector.extract_strided_slice %149 {offsets = [0, 0], sizes = [16, 32], strides = [1, 1]} : vector<256x32xf32> to vector<16x32xf32>
    %151 = vector.extract_strided_slice %149 {offsets = [16, 0], sizes = [16, 32], strides = [1, 1]} : vector<256x32xf32> to vector<16x32xf32>
    %152 = vector.extract_strided_slice %149 {offsets = [32, 0], sizes = [16, 32], strides = [1, 1]} : vector<256x32xf32> to vector<16x32xf32>
    %153 = vector.extract_strided_slice %149 {offsets = [48, 0], sizes = [16, 32], strides = [1, 1]} : vector<256x32xf32> to vector<16x32xf32>
    %154 = vector.extract_strided_slice %149 {offsets = [64, 0], sizes = [16, 32], strides = [1, 1]} : vector<256x32xf32> to vector<16x32xf32>
    %155 = vector.extract_strided_slice %149 {offsets = [80, 0], sizes = [16, 32], strides = [1, 1]} : vector<256x32xf32> to vector<16x32xf32>
    %156 = vector.extract_strided_slice %149 {offsets = [96, 0], sizes = [16, 32], strides = [1, 1]} : vector<256x32xf32> to vector<16x32xf32>
    %157 = vector.extract_strided_slice %149 {offsets = [112, 0], sizes = [16, 32], strides = [1, 1]} : vector<256x32xf32> to vector<16x32xf32>
    %158 = vector.extract_strided_slice %149 {offsets = [128, 0], sizes = [16, 32], strides = [1, 1]} : vector<256x32xf32> to vector<16x32xf32>
    %159 = vector.extract_strided_slice %149 {offsets = [144, 0], sizes = [16, 32], strides = [1, 1]} : vector<256x32xf32> to vector<16x32xf32>
    %160 = vector.extract_strided_slice %149 {offsets = [160, 0], sizes = [16, 32], strides = [1, 1]} : vector<256x32xf32> to vector<16x32xf32>
    %161 = vector.extract_strided_slice %149 {offsets = [176, 0], sizes = [16, 32], strides = [1, 1]} : vector<256x32xf32> to vector<16x32xf32>
    %162 = vector.extract_strided_slice %149 {offsets = [192, 0], sizes = [16, 32], strides = [1, 1]} : vector<256x32xf32> to vector<16x32xf32>
    %163 = vector.extract_strided_slice %149 {offsets = [208, 0], sizes = [16, 32], strides = [1, 1]} : vector<256x32xf32> to vector<16x32xf32>
    %164 = vector.extract_strided_slice %149 {offsets = [224, 0], sizes = [16, 32], strides = [1, 1]} : vector<256x32xf32> to vector<16x32xf32>
    %165 = vector.extract_strided_slice %149 {offsets = [240, 0], sizes = [16, 32], strides = [1, 1]} : vector<256x32xf32> to vector<16x32xf32>
    %166 = tpu.concatenate %150, %151, %152, %153, %154, %155, %156, %157, %158, %159, %160, %161, %162, %163, %164, %165 in 1 : vector<16x32xf32>, vector<16x32xf32>, vector<16x32xf32>, vector<16x32xf32>, vector<16x32xf32>, vector<16x32xf32>, vector<16x32xf32>, vector<16x32xf32>, vector<16x32xf32>, vector<16x32xf32>, vector<16x32xf32>, vector<16x32xf32>, vector<16x32xf32>, vector<16x32xf32>, vector<16x32xf32>, vector<16x32xf32> -> vector<16x512xf32>
    %167 = arith.addf %166, %0 : vector<16x512xf32>
    %c0_46 = arith.constant 0 : index
    %c0_47 = arith.constant 0 : index
    %168 = vector.load %arg14[%c0_46, %c0_47] : memref<16x512xf32, #tpu.memory_space<vmem>>, vector<16x512xf32>
    tpu.vector_store %arg14[%c0_46, %c0_47], %167 {strides = array<i32>} : memref<16x512xf32, #tpu.memory_space<vmem>>, vector<16x512xf32>,
    return
  }
  func.func @transform_0(%arg0: i32) -> (i32, i32) {
    %c0_i32 = arith.constant 0 : i32
    %c0_i32_0 = arith.constant 0 : i32
    return %c0_i32, %arg0 : i32, i32
  }
  func.func @transform_1(%arg0: i32) -> (i32, i32) {
    %c0_i32 = arith.constant 0 : i32
    %c0_i32_0 = arith.constant 0 : i32
    %c0_i32_1 = arith.constant 0 : i32
    return %c0_i32, %c0_i32_0 : i32, i32
  }
  func.func @transform_2(%arg0: i32) -> (i32, i32) {
    %c0_i32 = arith.constant 0 : i32
    %c0_i32_0 = arith.constant 0 : i32
    %c0_i32_1 = arith.constant 0 : i32
    return %c0_i32, %c0_i32_0 : i32, i32
  }
  func.func @transform_3(%arg0: i32) -> (i32, i32) {
    %c0_i32 = arith.constant 0 : i32
    %c0_i32_0 = arith.constant 0 : i32
    %c0_i32_1 = arith.constant 0 : i32
    return %c0_i32, %c0_i32_0 : i32, i32
  }
  func.func @transform_4(%arg0: i32) -> (i32, i32) {
    %c0_i32 = arith.constant 0 : i32
    %c0_i32_0 = arith.constant 0 : i32
    %c0_i32_1 = arith.constant 0 : i32
    return %c0_i32, %c0_i32_0 : i32, i32
  }
  func.func @transform_5(%arg0: i32) -> (i32, i32) {
    %c0_i32 = arith.constant 0 : i32
    %c0_i32_0 = arith.constant 0 : i32
    %c0_i32_1 = arith.constant 0 : i32
    return %c0_i32, %c0_i32_0 : i32, i32
  }
  func.func @transform_6(%arg0: i32) -> (i32, i32) {
    %c0_i32 = arith.constant 0 : i32
    %c0_i32_0 = arith.constant 0 : i32
    %c0_i32_1 = arith.constant 0 : i32
    return %c0_i32, %c0_i32_0 : i32, i32
  }
  func.func @transform_7(%arg0: i32) -> (i32, i32) {
    %c0_i32 = arith.constant 0 : i32
    %c0_i32_0 = arith.constant 0 : i32
    %c0_i32_1 = arith.constant 0 : i32
    return %c0_i32, %c0_i32_0 : i32, i32
  }
  func.func @transform_8(%arg0: i32) -> (i32, i32) {
    %c0_i32 = arith.constant 0 : i32
    %c0_i32_0 = arith.constant 0 : i32
    %c0_i32_1 = arith.constant 0 : i32
    return %c0_i32, %c0_i32_0 : i32, i32
  }
  func.func @transform_9(%arg0: i32) -> (i32, i32) {
    %c0_i32 = arith.constant 0 : i32
    %c0_i32_0 = arith.constant 0 : i32
    %c0_i32_1 = arith.constant 0 : i32
    return %c0_i32, %c0_i32_0 : i32, i32
  }
  func.func @transform_10(%arg0: i32) -> (i32, i32) {
    %c0_i32 = arith.constant 0 : i32
    %c0_i32_0 = arith.constant 0 : i32
    %c0_i32_1 = arith.constant 0 : i32
    return %c0_i32, %c0_i32_0 : i32, i32
  }
  func.func @transform_11(%arg0: i32) -> (i32, i32) {
    %c0_i32 = arith.constant 0 : i32
    %c0_i32_0 = arith.constant 0 : i32
    %c0_i32_1 = arith.constant 0 : i32
    return %c0_i32, %c0_i32_0 : i32, i32
  }
  func.func @transform_12(%arg0: i32) -> (i32, i32) {
    %c0_i32 = arith.constant 0 : i32
    %c0_i32_0 = arith.constant 0 : i32
    %c0_i32_1 = arith.constant 0 : i32
    return %c0_i32, %c0_i32_0 : i32, i32
  }
  func.func @transform_13(%arg0: i32) -> (i32, i32) {
    %c0_i32 = arith.constant 0 : i32
    %c0_i32_0 = arith.constant 0 : i32
    return %c0_i32, %arg0 : i32, i32
  }
}

</mosaic_0001>

<bundles_post_ra>
// kernel: gmlp_block_pallas.1
= control target key start
LH: loop header
LB: loop body
LE: loop exit
PB: predicated region body
PF: predicated region fallthrough
CT: control target
= control target key end

     0   :  { %s6116_s0 = inlined_call_operand.hbm [shape: f32[16,1024], index: 0, kind: input, shape index: {}]   ;;  %s6117_s1 = inlined_call_operand.vmem [shape: f32[1,32], index: 1, kind: input, shape index: {}]   ;;  %s6118_s2 = inlined_call_operand.vmem [shape: f32[1,32], index: 2, kind: input, shape index: {}]   ;;  %s6119_s3 = inlined_call_operand.vmem [shape: bf16[32,32], index: 3, kind: input, shape index: {}]   ;;  %s6120_s4 = inlined_call_operand.vmem [shape: f32[1,32], index: 4, kind: input, shape index: {}]   ;;  %s6121_s5 = inlined_call_operand.vmem [shape: bf16[32,32], index: 5, kind: input, shape index: {}]   ;;  %s6122_s6 = inlined_call_operand.vmem [shape: f32[1,32], index: 6, kind: input, shape index: {}]   ;;  %s6123_s7 = inlined_call_operand.vmem [shape: f32[1,32], index: 7, kind: input, shape index: {}]   ;;  %s6124_s8 = inlined_call_operand.vmem [shape: f32[1,32], index: 8, kind: input, shape index: {}]   ;;  %s6125_s9 = inlined_call_operand.vmem [shape: bf16[16,16], index: 9, kind: input, shape index: {}]   ;;  %s6126_s10 = inlined_call_operand.vmem [shape: f32[16,1], index: 10, kind: input, shape index: {}]   ;;  %s6127_s11 = inlined_call_operand.vmem [shape: bf16[32,32], index: 11, kind: input, shape index: {}]   ;;  %s6128_s12 = inlined_call_operand.vmem [shape: f32[1,32], index: 12, kind: input, shape index: {}]   ;;  %s6129_s13 = inlined_call_operand.hbm [shape: f32[16,1024], index: 13, kind: output, shape index: {}]  }
   0x1   :  { %6138 = sst [smem:[#allocation29_spill]] %s6129_s13 }
   0x2   :  { %18 = vsyncpa [#allocation3], 0 }
   0x3   :  { %20 = vsyncpa [#allocation3 + $0x1], 0 }
   0x4   :  { %21 = vsyncpa [#allocation4], 0 }
   0x5   :  { %23 = vsyncpa [#allocation4 + $0x1], 0  ;;  %s4075_s25 = smov 0   ;;  %s4077_s26 = smov 0  }
   0x6   :  { %s4079_s27 = smov 0   ;;  %s4081_s28 = smov 0  }
   0x7 LB: > { %6139 = sst [smem:[#allocation8_spill]] %s3980_s25  ;;  %s4096_s29 = sadd.s32 4294967295, %s3992_s28   ;;  %s3992_s28 = sphi %s4081_s28, %s6192_s28   ;;  %s3988_s27 = sphi %s4079_s27, %s6194_s27   ;;  %s3984_s26 = sphi %s4077_s26, %s6196_s26   ;;  %s3980_s25 = sphi %s4075_s25, %s6195_s25  }
   0x8   : > { %6140 = sst [smem:[#allocation9_spill]] %s3988_s27  ;;  %s3326_s30 = sadd.s32 4294967294, %s3992_s28  }
   0x9   : > { %s4100_s14 = sadd.s32 1, %s3992_s28   ;;  %s36_s15 = sadd.s32 1, %s3988_s27 }
   0xa   : > { %6141 = sst [smem:[#allocation10_spill]] %s4100_s14  ;;  %s33_s16 = ssub.s32 %s3992_s28, %s4100_s14 }
   0xb   : > { %p43_p0 = scmp.ne.s32.totalorder %s3988_s27, %s3984_s26  ;;  %p34_p1 = scmp.eq.s32.totalorder %s33_s16, 0 }
   0xc   : > { %p44_p2 = scmp.eq.s32.totalorder %s3992_s28, 0  ;;  %p49_p3 = scmp.ne.s32.totalorder %s3984_s26, %s3980_s25 }
   0xd   : > { %p50_p4 = scmp.eq.s32.totalorder %s4096_s29, 0  ;;  %p325_p7 = scmp.eq.s32.totalorder %s4096_s29, 1 }
   0xe   : > { %s4112_s17 = scalar_select %p34_p1, %s3988_s27, %s36_s15  }
   0xf   : > { %p4114_p5 = por %p44_p2, %p43_p0  ;;  %p4118_p6 = por %p50_p4, %p49_p3 }
  0x10   : > { %6142 = sst [smem:[#allocation11_spill]] %s4112_s17  ;;  %p331_p8 = scmp.eq.s32.totalorder %s3326_s30, 1 }
  0x11   : > { %s6144_s19 = scalar_select %p4118_p6, 1, 0 }
  0x12   : > { %p3584_p10 = scmp.lt.s32.totalorder %s3992_s28, 2  ;;  %p4125_p11 = por %p325_p7, %p43_p0 }
  0x13   : > { %p4129_p12 = por %p331_p8, %p49_p3  ;;  %s387_s22 = sand.u32 1, %s3988_s27  }
  0x14   : > { %s6145_s20 = scalar_select %p4125_p11, 1, 0 }
  0x15   : > { %s6146_s21 = scalar_select %p4129_p12, 1, 0 }
  0x16   : > { %s3404_s23 = sshll.u32 %s3992_s28, 9  ;;  %s3329_s24 = sshll.u32 %s387_s22, 6 }
  0x17   : > { %6147 = sst [smem:[#allocation12_spill]] %s6146_s21  ;;  %s4138_s17 = scalar_lea.hbm %s6116_s0, %s3404_s23 }
  0x18   : > { %s391_s30 = scalar_lea.vmem [#allocation2], %s3329_s24  ;;  %p4142_p13 = pnand %p3584_p10, %p4114_p5 }
  0x19   : > { %s398_s14 = sshll.u32 %s391_s30, 4  ;;  %s4149_s27 = scalar_lea.sflag [#allocation3], %s387_s22  ;;  %s4146_s14 = int_to_ptr.vmem [resolvable:$true] %s398_s14 }
  0x1a   : > { %s3900_s21 = scalar_lea.hbm %s4138_s17, 1024  ;;  %p3902_p2 = pneg %p4142_p13 }
  0x1b   : > { %p3901_p1 = scmp.ne.s32.totalorder %s4138_s17, %s3900_s21  ;;  %s3905_s18 = scalar_lea.hbm %s6116_s0, 2048 }
  0x1c   : > { %p3906_p5 = scmp.lt.s32.totalorder %s4138_s17, %s6116_s0  ;;  %p3907_p7 = scmp.lt.s32.totalorder %s3905_s18, %s3900_s21 }
  0x1d   : > { %p3903_p3 = pnand %p3902_p2, %p3901_p1 }
  0x1e   : > { %p3908_p8 = por %p3907_p7, %p3906_p5 }
  0x1f   : > { %p3904_p4 = pneg %p3903_p3 }
  0x21   : > { %p3909_p10 = pnand %p3908_p8, %p3904_p4 }
  0x23   : > { %3912 = shalt.err (!%p3909_p10)
}
  0x24   : > { %s3913_s22 = scalar_lea.vmem %s4146_s14, 1024  ;;  %s3994_s30 = smov [#allocation2]  }
  0x25   : > { %p3914_p9 = scmp.ne.s32.totalorder %s4146_s14, %s3913_s22  ;;  %s3918_s13 = sshll.u32 %s3994_s30, 4  ;;  %s3919_s13 = int_to_ptr.vmem [resolvable:$false] %s3918_s13 }
  0x26   : > { %s3920_s23 = scalar_lea.vmem %s3919_s13, 2048  ;;  %p3921_p3 = scmp.lt.s32.totalorder %s4146_s14, %s3919_s13 }
  0x27   : > { %p3916_p0 = pnand %p3914_p9, %p3902_p2  ;;  %p3922_p12 = scmp.lt.s32.totalorder %s3920_s23, %s3913_s22 }
  0x29   : > { %p3917_p1 = pneg %p3916_p0  ;;  %p3923_p11 = por %p3922_p12, %p3921_p3 }
  0x2b   : > { %p3924_p6 = pnand %p3923_p11, %p3917_p1 }
  0x2d   : > { %3927 = shalt.err (!%p3924_p6)
}
  0x2e   : > { %s3995_s21 = smov 1024   ;;  %s3996_s24 = smov 512  }
  0x2f   : > { %s3997_s18 = smov 32   ;;  %p406_p9 = scmp.lt.s32.totalorder %s3992_s28, 3 }
  0x30   : > { %3579 = dma.hbm_to_vmem [thread:$0]  (!%p4142_p13), %s4138_s17, 1024, %s4146_s14, %s4149_s27, %s3995_s21, %s3996_s24, %s3997_s18  }
  0x31   : > { %p6149_p0 = scmp.ge.s32.totalorder %s3992_s28, 1 }
  0x33   : > { %p407_p2 = pnand %p6149_p0, %p406_p9 }
  0x35   : > { %410 = sbr.rel (%p407_p2) target bundleno = 1972 (0x7b4), region = 72 }
  0x3a   : > { %s4174_s13 = sand.u32 1, %s3984_s26   ;;  %p6150_p6 = scmp.ne.s32.totalorder %s6144_s19, 0 }
  0x3b   : > { %s3333_s15 = sshll.u32 %s4174_s13, 6  ;;  %s413_s16 = scalar_lea.sflag [#allocation3], %s4174_s13 }
  0x3c   : > { %s4180_s22 = scalar_lea.vmem [#allocation2], %s3333_s15 }
  0x3d   : > { %3971 = dma.done.wait (%p6150_p6), %s413_s16, 1024  }
  0x3e   : > { %3973 = vsyncadd (%p6150_p6), %s413_s16, 4294966272  ;;  %v4187_v0 = vld [vmem:[%s4180_s22 + $0x10] sm:$0xff]  ;;  %s3998_s25 = smov 64   ;;  %s3999_s27 = smov 96   ;;  %v4205_v2 = vld [vmem:[%s4180_s22 + $0x38] sm:$0xff]  ;;  %vm550_vm0 = vcmask 261120  }
  0x3f   : > { %518 = vrot.lane.b32.xlu1 %v4187_v0, %s3998_s25  ;;  %512 = vrot.lane.b32.xlu0 %v4187_v0, %s3999_s27  ;;  %v4194_v1 = vld [vmem:[%s4180_s22 + $0x30] sm:$0xff]  ;;  %s4000_s14 = smov 32   ;;  %v4208_v3 = vld [vmem:[%s4180_s22 + $0x18] sm:$0xff]  ;;  %v599_v8 = vsel %vm550_vm0, %v4187_v0, 0.0  ;;  %v626_v26 = vsel %vm550_vm0, %v4205_v2, 0.0  ;;  %vm2606_vm1 = vcmask 785408  }
  0x40   : > { %v4223_v4 = vld [vmem:[%s4180_s22 + $0x20] sm:$0xff]  ;;  %v4241_v6 = vld [vmem:[%s4180_s22 + $0x28] sm:$0xff]  ;;  %v602_v9 = vsel %vm550_vm0, %v4194_v1, 0.0  ;;  %v623_v21 = vsel %vm550_vm0, %v4208_v3, 0.0  ;;  %vm2603_vm2 = vcmask 523264   ;;  %vm2653_vm3 = vcmask 130048  }
  0x41   : > { %v4226_v5 = vld [vmem:[%s4180_s22] sm:$0xff]  ;;  %v4244_v7 = vld [vmem:[%s4180_s22 + $0x8] sm:$0xff]  ;;  %v554_v40 = vsel %vm550_vm0, %v4223_v4, 0.0  ;;  %v578_v54 = vsel %vm550_vm0, %v4241_v6, 0.0  ;;  %s6186_s30 = sld [smem:[#allocation29_spill]]  ;;  %p6187_p12 = scmp.ne.s32.totalorder %s6145_s20, 0 }
  0x42   : > { %v551_v37 = vsel %vm550_vm0, %v4226_v5, 0.0  ;;  %v575_v51 = vsel %vm550_vm0, %v4244_v7, 0.0  ;;  %s4002_s24 = smov [#allocation5]  }
  0x43   : > { %520 = vrot.lane.b32.xlu1 %v4194_v1, %s3998_s25  ;;  %514 = vrot.lane.b32.xlu0 %v4194_v1, %s3999_s27  ;;  %s3932_s18 = sshll.u32 %s4002_s24, 4  ;;  %s3933_s18 = int_to_ptr.vmem [resolvable:$false] %s3932_s18 }
  0x44   : > { %s3934_s16 = scalar_lea.vmem %s3933_s18, 2048 }
  0x47   : > { %526 = vrot.lane.b32.xlu1 %v4194_v1, %s4000_s14  ;;  %524 = vrot.lane.b32.xlu0 %v4187_v0, %s4000_s14 }
  0x4b   : > { %534 = vrot.lane.b32.xlu1 %v4205_v2, %s3999_s27  ;;  %532 = vrot.lane.b32.xlu0 %v4208_v3, %s3999_s27 }
  0x4f   : > { %540 = vrot.lane.b32.xlu1 %v4205_v2, %s3998_s25  ;;  %538 = vrot.lane.b32.xlu0 %v4208_v3, %s3998_s25 }
  0x53   : > { %546 = vrot.lane.b32.xlu1 %v4205_v2, %s4000_s14  ;;  %544 = vrot.lane.b32.xlu0 %v4208_v3, %s4000_s14 }
  0x57   : > { %474 = vrot.lane.b32.xlu1 %v4223_v4, %s3999_s27  ;;  %472 = vrot.lane.b32.xlu0 %v4226_v5, %s3999_s27 }
  0x5b   : > { %480 = vrot.lane.b32.xlu1 %v4223_v4, %s3998_s25  ;;  %478 = vrot.lane.b32.xlu0 %v4226_v5, %s3998_s25 }
  0x5f   : > { %486 = vrot.lane.b32.xlu1 %v4223_v4, %s4000_s14  ;;  %484 = vrot.lane.b32.xlu0 %v4226_v5, %s4000_s14 }
  0x63   : > { %494 = vrot.lane.b32.xlu1 %v4241_v6, %s3999_s27  ;;  %492 = vrot.lane.b32.xlu0 %v4244_v7, %s3999_s27 }
  0x67   : > { %500 = vrot.lane.b32.xlu1 %v4241_v6, %s3998_s25  ;;  %498 = vrot.lane.b32.xlu0 %v4244_v7, %s3998_s25 }
  0x6b   : > { %506 = vrot.lane.b32.xlu1 %v4241_v6, %s4000_s14  ;;  %504 = vrot.lane.b32.xlu0 %v4244_v7, %s4000_s14 }
  0x8a   : > { %600 = vadd.xlane.f32.xlu0 %v599_v8 }
  0x8f   : > { %603 = vadd.xlane.f32.xlu1 %v602_v9 }
  0xb1   : > { %v4262_v10 = vpop.permute.xlu1 %518  ;;  %v4264_v11 = vpop.permute.xlu0 %512 }
  0xb2   : > { %v611_v12 = vsel %vm550_vm0, %v4262_v10, 0.0  ;;  %v605_v13 = vsel %vm550_vm0, %v4264_v11, 0.0 }
  0xb3   : > { %612 = vadd.xlane.f32.xlu1 %v611_v12  ;;  %606 = vadd.xlane.f32.xlu0 %v605_v13 }
  0xb5   : > { %v4270_v14 = vpop.permute.xlu0 %514  ;;  %v4272_v15 = vpop.permute.xlu1 %520 }
  0xb6   : > { %v608_v16 = vsel %vm550_vm0, %v4270_v14, 0.0  ;;  %v614_v17 = vsel %vm550_vm0, %v4272_v15, 0.0 }
  0xb7   : > { %609 = vadd.xlane.f32.xlu0 %v608_v16 }
  0xb9   : > { %v4278_v18 = vpop.permute.xlu0 %524  ;;  %v4280_v19 = vpop.permute.xlu1 %526 }
  0xba   : > { %v617_v20 = vsel %vm550_vm0, %v4278_v18, 0.0  ;;  %v620_v22 = vsel %vm550_vm0, %v4280_v19, 0.0 }
  0xbb   : > { %618 = vadd.xlane.f32.xlu1 %v617_v20  ;;  %615 = vadd.xlane.f32.xlu0 %v614_v17 }
  0xbd   : > { %v4288_v23 = vpop.permute.xlu0 %532  ;;  %v4290_v24 = vpop.permute.xlu1 %534 }
  0xbe   : > { %v629_v25 = vsel %vm550_vm0, %v4288_v23, 0.0  ;;  %v632_v30 = vsel %vm550_vm0, %v4290_v24, 0.0 }
  0xbf   : > { %624 = vadd.xlane.f32.xlu1 %v623_v21  ;;  %621 = vadd.xlane.f32.xlu0 %v620_v22 }
  0xc1   : > { %v4296_v27 = vpop.permute.xlu0 %538  ;;  %v4298_v28 = vpop.permute.xlu1 %540 }
  0xc2   : > { %v635_v29 = vsel %vm550_vm0, %v4296_v27, 0.0  ;;  %v638_v33 = vsel %vm550_vm0, %v4298_v28, 0.0 }
  0xc3   : > { %630 = vadd.xlane.f32.xlu1 %v629_v25  ;;  %627 = vadd.xlane.f32.xlu0 %v626_v26 }
  0xc5   : > { %v4304_v31 = vpop.permute.xlu0 %544  ;;  %v4310_v34 = vpop.permute.xlu1 %546 }
  0xc6   : > { %v641_v32 = vsel %vm550_vm0, %v4304_v31, 0.0  ;;  %v644_v36 = vsel %vm550_vm0, %v4310_v34, 0.0 }
  0xc7   : > { %636 = vadd.xlane.f32.xlu1 %v635_v29  ;;  %633 = vadd.xlane.f32.xlu0 %v632_v30 }
  0xc9   : > { %v4312_v35 = vpop.permute.xlu0 %472  ;;  %v4318_v38 = vpop.permute.xlu1 %474 }
  0xca   : > { %v557_v41 = vsel %vm550_vm0, %v4312_v35, 0.0  ;;  %v560_v43 = vsel %vm550_vm0, %v4318_v38, 0.0 }
  0xcb   : > { %642 = vadd.xlane.f32.xlu1 %v641_v32  ;;  %639 = vadd.xlane.f32.xlu0 %v638_v33 }
  0xcd   : > { %v4320_v39 = vpop.permute.xlu0 %478  ;;  %v4326_v42 = vpop.permute.xlu1 %480 }
  0xce   : > { %v563_v44 = vsel %vm550_vm0, %v4320_v39, 0.0  ;;  %v566_v46 = vsel %vm550_vm0, %v4326_v42, 0.0 }
  0xcf   : > { %645 = vadd.xlane.f32.xlu0 %v644_v36  ;;  %552 = vadd.xlane.f32.xlu1 %v551_v37 }
  0xd1   : > { %v4332_v45 = vpop.permute.xlu0 %484  ;;  %v4338_v48 = vpop.permute.xlu1 %486 }
  0xd2   : > { %v569_v47 = vsel %vm550_vm0, %v4332_v45, 0.0  ;;  %v572_v50 = vsel %vm550_vm0, %v4338_v48, 0.0 }
  0xd3   : > { %555 = vadd.xlane.f32.xlu0 %v554_v40  ;;  %558 = vadd.xlane.f32.xlu1 %v557_v41 }
  0xd5   : > { %v4340_v49 = vpop.permute.xlu0 %492  ;;  %v4346_v52 = vpop.permute.xlu1 %494 }
  0xd6   : > { %v581_v55 = vsel %vm550_vm0, %v4340_v49, 0.0  ;;  %v584_v57 = vsel %vm550_vm0, %v4346_v52, 0.0 }
  0xd7   : > { %561 = vadd.xlane.f32.xlu0 %v560_v43  ;;  %564 = vadd.xlane.f32.xlu1 %v563_v44 }
  0xd9   : > { %v4348_v53 = vpop.permute.xlu0 %498  ;;  %v4354_v56 = vpop.permute.xlu1 %500 }
  0xda   : > { %v587_v58 = vsel %vm550_vm0, %v4348_v53, 0.0  ;;  %v590_v60 = vsel %vm550_vm0, %v4354_v56, 0.0 }
  0xdb   : > { %567 = vadd.xlane.f32.xlu0 %v566_v46  ;;  %570 = vadd.xlane.f32.xlu1 %v569_v47 }
  0xdd   : > { %v4360_v59 = vpop.permute.xlu0 %504  ;;  %v4366_v62 = vpop.permute.xlu1 %506 }
  0xde   : > { %v593_v61 = vsel %vm550_vm0, %v4360_v59, 0.0  ;;  %v596_v63 = vsel %vm550_vm0, %v4366_v62, 0.0 }
  0xdf   : > { %573 = vadd.xlane.f32.xlu0 %v572_v50  ;;  %576 = vadd.xlane.f32.xlu1 %v575_v51 }
  0xe3   : > { %579 = vadd.xlane.f32.xlu0 %v578_v54  ;;  %582 = vadd.xlane.f32.xlu1 %v581_v55 }
  0xe7   : > { %585 = vadd.xlane.f32.xlu0 %v584_v57  ;;  %588 = vadd.xlane.f32.xlu1 %v587_v58 }
  0xeb   : > { %591 = vadd.xlane.f32.xlu0 %v590_v60  ;;  %594 = vadd.xlane.f32.xlu1 %v593_v61 }
  0xef   : > { %597 = vadd.xlane.f32.xlu0 %v596_v63 }
 0x113   : > { %v601_v8 = vpop.xlane.xlu0 %600 }
 0x114   : > { %v664_v9 = vmul.f32 0.03125, %v601_v8 }
 0x116   : > { %v4371_v12 = vsub.f32 %v4187_v0, %v664_v9 }
 0x118   : > { %v604_v13 = vpop.xlane.xlu1 %603  ;;  %v728_v16 = vmul.f32 %v4371_v12, %v4371_v12 }
 0x119   : > { %v665_v17 = vmul.f32 0.03125, %v604_v13 }
 0x11a   : > { %v792_v20 = vsel %vm550_vm0, %v728_v16, 0.0 }
 0x11b   : > { %v4377_v21 = vsub.f32 %v4194_v1, %v665_v17  ;;  %793 = vadd.xlane.f32.xlu1 %v792_v20 }
 0x11d   : > { %v729_v22 = vmul.f32 %v4377_v21, %v4377_v21 }
 0x11f   : > { %v795_v25 = vsel %vm550_vm0, %v729_v22, 0.0 }
 0x120   : > { %796 = vadd.xlane.f32.xlu0 %v795_v25 }
 0x13c   : > { %v613_v26 = vpop.xlane.xlu1 %612  ;;  %v607_v0 = vpop.xlane.xlu0 %606 }
 0x13d   : > { %v668_v29 = vmul.f32 0.03125, %v613_v26  ;;  %v666_v30 = vmul.f32 0.03125, %v607_v0 }
 0x13f   : > { %v4383_v32 = vsub.f32 %v4262_v10, %v668_v29  ;;  %v4386_v33 = vsub.f32 %v4264_v11, %v666_v30 }
 0x140   : > { %v610_v36 = vpop.xlane.xlu0 %609 }
 0x141   : > { %v667_v1 = vmul.f32 0.03125, %v610_v36  ;;  %v730_v37 = vmul.f32 %v4386_v33, %v4386_v33  ;;  %v732_v43 = vmul.f32 %v4383_v32, %v4383_v32 }
 0x143   : > { %v4391_v40 = vsub.f32 %v4270_v14, %v667_v1  ;;  %v798_v41 = vsel %vm550_vm0, %v730_v37, 0.0  ;;  %v804_v54 = vsel %vm550_vm0, %v732_v43, 0.0 }
 0x144   : > { %v619_v44 = vpop.xlane.xlu1 %618  ;;  %v616_v46 = vpop.xlane.xlu0 %615  ;;  %799 = vadd.xlane.f32.xlu1 %v798_v41 }
 0x145   : > { %v670_v10 = vmul.f32 0.03125, %v619_v44  ;;  %v669_v47 = vmul.f32 0.03125, %v616_v46  ;;  %v731_v11 = vmul.f32 %v4391_v40, %v4391_v40 }
 0x147   : > { %v4399_v50 = vsub.f32 %v4278_v18, %v670_v10  ;;  %v4402_v51 = vsub.f32 %v4272_v15, %v669_v47  ;;  %v801_v14 = vsel %vm550_vm0, %v731_v11, 0.0 }
 0x148   : > { %v625_v55 = vpop.xlane.xlu1 %624  ;;  %802 = vadd.xlane.f32.xlu0 %v801_v14  ;;  %v622_v57 = vpop.xlane.xlu0 %621  ;;  %805 = vadd.xlane.f32.xlu1 %v804_v54 }
 0x149   : > { %v672_v58 = vmul.f32 0.03125, %v625_v55  ;;  %v671_v60 = vmul.f32 0.03125, %v622_v57  ;;  %v733_v61 = vmul.f32 %v4402_v51, %v4402_v51  ;;  %v734_v18 = vmul.f32 %v4399_v50, %v4399_v50 }
 0x14b   : > { %v4411_v63 = vsub.f32 %v4208_v3, %v672_v58  ;;  %v4414_v15 = vsub.f32 %v4280_v19, %v671_v60  ;;  %v807_v8 = vsel %vm550_vm0, %v733_v61, 0.0  ;;  %v810_v9 = vsel %vm550_vm0, %v734_v18, 0.0 }
 0x14c   : > { %v631_v13 = vpop.xlane.xlu1 %630  ;;  %808 = vadd.xlane.f32.xlu0 %v807_v8  ;;  %v628_v16 = vpop.xlane.xlu0 %627  ;;  %811 = vadd.xlane.f32.xlu1 %v810_v9 }
 0x14d   : > { %v674_v17 = vmul.f32 0.03125, %v631_v13  ;;  %v673_v20 = vmul.f32 0.03125, %v628_v16  ;;  %v735_v22 = vmul.f32 %v4414_v15, %v4414_v15  ;;  %v736_v3 = vmul.f32 %v4411_v63, %v4411_v63 }
 0x14f   : > { %v4423_v25 = vsub.f32 %v4288_v23, %v674_v17  ;;  %v4426_v19 = vsub.f32 %v4205_v2, %v673_v20  ;;  %v813_v26 = vsel %vm550_vm0, %v735_v22, 0.0  ;;  %v816_v0 = vsel %vm550_vm0, %v736_v3, 0.0 }
 0x150   : > { %v637_v29 = vpop.xlane.xlu1 %636  ;;  %814 = vadd.xlane.f32.xlu0 %v813_v26  ;;  %v634_v30 = vpop.xlane.xlu0 %633  ;;  %817 = vadd.xlane.f32.xlu1 %v816_v0 }
 0x151   : > { %v676_v36 = vmul.f32 0.03125, %v637_v29  ;;  %v675_v1 = vmul.f32 0.03125, %v634_v30  ;;  %v737_v37 = vmul.f32 %v4426_v19, %v4426_v19  ;;  %v738_v23 = vmul.f32 %v4423_v25, %v4423_v25 }
 0x153   : > { %v4435_v41 = vsub.f32 %v4296_v27, %v676_v36  ;;  %v4438_v2 = vsub.f32 %v4290_v24, %v675_v1  ;;  %v819_v43 = vsel %vm550_vm0, %v737_v37, 0.0  ;;  %v822_v44 = vsel %vm550_vm0, %v738_v23, 0.0 }
 0x154   : > { %v643_v46 = vpop.xlane.xlu1 %642  ;;  %820 = vadd.xlane.f32.xlu0 %v819_v43  ;;  %v640_v10 = vpop.xlane.xlu0 %639  ;;  %823 = vadd.xlane.f32.xlu1 %v822_v44 }
 0x155   : > { %v678_v47 = vmul.f32 0.03125, %v643_v46  ;;  %v677_v11 = vmul.f32 0.03125, %v640_v10  ;;  %v739_v14 = vmul.f32 %v4438_v2, %v4438_v2  ;;  %v740_v27 = vmul.f32 %v4435_v41, %v4435_v41 }
 0x157   : > { %v4447_v54 = vsub.f32 %v4304_v31, %v678_v47  ;;  %v4450_v24 = vsub.f32 %v4298_v28, %v677_v11  ;;  %v825_v55 = vsel %vm550_vm0, %v739_v14, 0.0  ;;  %v828_v57 = vsel %vm550_vm0, %v740_v27, 0.0  ;;  %v3629_v47 = vld [vmem:[%s6119_s3 + $0x8] sm:$0xff]  }
 0x158   : > { %826 = vadd.xlane.f32.xlu0 %v825_v55  ;;  %v646_v58 = vpop.xlane.xlu0 %645  ;;  %829 = vadd.xlane.f32.xlu1 %v828_v57  ;;  %v553_v60 = vpop.xlane.xlu1 %552 }
 0x159   : > { %v679_v61 = vmul.f32 0.03125, %v646_v58  ;;  %v648_v18 = vmul.f32 0.03125, %v553_v60  ;;  %v741_v8 = vmul.f32 %v4450_v24, %v4450_v24  ;;  %v742_v31 = vmul.f32 %v4447_v54, %v4447_v54  ;;  %3568 = vmatprep.subr.bf16.mxu1 %v3629_v47  ;;  %3460 = vmatprep.subr.bf16.mxu0 %v3629_v47 }
 0x15a   : > { %3570 = vmatpush3.bf16.msra.mxu1 %v3629_v47  ;;  %3461 = vmatpush3.bf16.msra.mxu0 %v3629_v47 }
 0x15b   : > { %v4459_v9 = vsub.f32 %v4310_v34, %v679_v61  ;;  %v4462_v28 = vsub.f32 %v4226_v5, %v648_v18  ;;  %v831_v13 = vsel %vm550_vm0, %v741_v8, 0.0  ;;  %v834_v16 = vsel %vm550_vm0, %v742_v31, 0.0  ;;  %v3630_v18 = vld [vmem:[%s6119_s3] sm:$0xff]  }
 0x15c   : > { %832 = vadd.xlane.f32.xlu0 %v831_v13  ;;  %v556_v17 = vpop.xlane.xlu0 %555  ;;  %835 = vadd.xlane.f32.xlu1 %v834_v16  ;;  %v559_v20 = vpop.xlane.xlu1 %558 }
 0x15d   : > { %v649_v22 = vmul.f32 0.03125, %v556_v17  ;;  %v650_v3 = vmul.f32 0.03125, %v559_v20  ;;  %v743_v26 = vmul.f32 %v4459_v9, %v4459_v9  ;;  %v712_v34 = vmul.f32 %v4462_v28, %v4462_v28  ;;  %3569 = vmatprep.subr.bf16.mxu1 %v3630_v18  ;;  %3462 = vmatprep.subr.bf16.mxu0 %v3630_v18 }
 0x15e   : > { %3571 = vmatpush3.bf16.msra.mxu1 %v3630_v18  ;;  %3463 = vmatpush3.bf16.msra.mxu0 %v3630_v18 }
 0x15f   : > { %v4471_v0 = vsub.f32 %v4223_v4, %v649_v22  ;;  %v4474_v5 = vsub.f32 %v4312_v35, %v650_v3  ;;  %v837_v29 = vsel %vm550_vm0, %v743_v26, 0.0  ;;  %v744_v30 = vsel %vm550_vm0, %v712_v34, 0.0 }
 0x160   : > { %838 = vadd.xlane.f32.xlu0 %v837_v29  ;;  %v562_v36 = vpop.xlane.xlu0 %561  ;;  %745 = vadd.xlane.f32.xlu1 %v744_v30  ;;  %v565_v1 = vpop.xlane.xlu1 %564 }
 0x161   : > { %v651_v37 = vmul.f32 0.03125, %v562_v36  ;;  %v652_v23 = vmul.f32 0.03125, %v565_v1  ;;  %v713_v43 = vmul.f32 %v4471_v0, %v4471_v0  ;;  %v714_v4 = vmul.f32 %v4474_v5, %v4474_v5 }
 0x163   : > { %v4483_v44 = vsub.f32 %v4318_v38, %v651_v37  ;;  %v4486_v35 = vsub.f32 %v4320_v39, %v652_v23  ;;  %v747_v46 = vsel %vm550_vm0, %v713_v43, 0.0  ;;  %v750_v10 = vsel %vm550_vm0, %v714_v4, 0.0 }
 0x164   : > { %748 = vadd.xlane.f32.xlu0 %v747_v46  ;;  %v568_v11 = vpop.xlane.xlu0 %567  ;;  %751 = vadd.xlane.f32.xlu1 %v750_v10  ;;  %v571_v14 = vpop.xlane.xlu1 %570 }
 0x165   : > { %v653_v27 = vmul.f32 0.03125, %v568_v11  ;;  %v654_v55 = vmul.f32 0.03125, %v571_v14  ;;  %v715_v38 = vmul.f32 %v4483_v44, %v4483_v44  ;;  %v716_v39 = vmul.f32 %v4486_v35, %v4486_v35 }
 0x167   : > { %v4498_v57 = vsub.f32 %v4326_v42, %v653_v27  ;;  %v4501_v58 = vsub.f32 %v4332_v45, %v654_v55  ;;  %v753_v60 = vsel %vm550_vm0, %v715_v38, 0.0  ;;  %v756_v61 = vsel %vm550_vm0, %v716_v39, 0.0 }
 0x168   : > { %754 = vadd.xlane.f32.xlu0 %v753_v60  ;;  %v574_v8 = vpop.xlane.xlu0 %573  ;;  %757 = vadd.xlane.f32.xlu1 %v756_v61  ;;  %v577_v31 = vpop.xlane.xlu1 %576 }
 0x169   : > { %v655_v13 = vmul.f32 0.03125, %v574_v8  ;;  %v656_v16 = vmul.f32 0.03125, %v577_v31  ;;  %v717_v42 = vmul.f32 %v4498_v57, %v4498_v57  ;;  %v718_v45 = vmul.f32 %v4501_v58, %v4501_v58 }
 0x16b   : > { %v4513_v17 = vsub.f32 %v4338_v48, %v655_v13  ;;  %v4516_v20 = vsub.f32 %v4244_v7, %v656_v16  ;;  %v759_v22 = vsel %vm550_vm0, %v717_v42, 0.0  ;;  %v762_v3 = vsel %vm550_vm0, %v718_v45, 0.0 }
 0x16c   : > { %760 = vadd.xlane.f32.xlu0 %v759_v22  ;;  %v580_v26 = vpop.xlane.xlu0 %579  ;;  %763 = vadd.xlane.f32.xlu1 %v762_v3  ;;  %v583_v34 = vpop.xlane.xlu1 %582 }
 0x16d   : > { %v657_v29 = vmul.f32 0.03125, %v580_v26  ;;  %v658_v30 = vmul.f32 0.03125, %v583_v34  ;;  %v719_v36 = vmul.f32 %v4513_v17, %v4513_v17  ;;  %v720_v48 = vmul.f32 %v4516_v20, %v4516_v20  ;;  %v4571_v34 = vld [vmem:[%s6121_s5 + $0x8] sm:$0xff]  }
 0x16e   : > { %3496 = vmatprep.subr.bf16.mxu1 %v4571_v34 }
 0x16f   : > { %v4525_v1 = vsub.f32 %v4241_v6, %v657_v29  ;;  %v4528_v7 = vsub.f32 %v4340_v49, %v658_v30  ;;  %v765_v37 = vsel %vm550_vm0, %v719_v36, 0.0  ;;  %v768_v23 = vsel %vm550_vm0, %v720_v48, 0.0 }
 0x170   : > { %766 = vadd.xlane.f32.xlu0 %v765_v37  ;;  %v586_v43 = vpop.xlane.xlu0 %585  ;;  %769 = vadd.xlane.f32.xlu1 %v768_v23  ;;  %v589_v4 = vpop.xlane.xlu1 %588 }
 0x171   : > { %v659_v46 = vmul.f32 0.03125, %v586_v43  ;;  %v660_v10 = vmul.f32 0.03125, %v589_v4  ;;  %v721_v47 = vmul.f32 %v4525_v1, %v4525_v1  ;;  %v722_v6 = vmul.f32 %v4528_v7, %v4528_v7  ;;  %v4578_v4 = vld [vmem:[%s6117_s1] ss:$0 sm:$0xff] }
 0x173   : > { %v4537_v11 = vsub.f32 %v4346_v52, %v659_v46  ;;  %v4540_v49 = vsub.f32 %v4348_v53, %v660_v10  ;;  %v771_v14 = vsel %vm550_vm0, %v721_v47, 0.0  ;;  %v774_v27 = vsel %vm550_vm0, %v722_v6, 0.0  ;;  %v4585_v6 = vld [vmem:[%s6118_s2] ss:$0 sm:$0xff] }
 0x174   : > { %772 = vadd.xlane.f32.xlu0 %v771_v14  ;;  %v592_v55 = vpop.xlane.xlu0 %591  ;;  %775 = vadd.xlane.f32.xlu1 %v774_v27  ;;  %v595_v38 = vpop.xlane.xlu1 %594 }
 0x175   : > { %v661_v39 = vmul.f32 0.03125, %v592_v55  ;;  %v662_v60 = vmul.f32 0.03125, %v595_v38  ;;  %v723_v61 = vmul.f32 %v4537_v11, %v4537_v11  ;;  %v724_v52 = vmul.f32 %v4540_v49, %v4540_v49 }
 0x177   : > { %v4549_v18 = vsub.f32 %v4354_v56, %v661_v39  ;;  %v4552_v53 = vsub.f32 %v4360_v59, %v662_v60  ;;  %v777_v8 = vsel %vm550_vm0, %v723_v61, 0.0  ;;  %v780_v31 = vsel %vm550_vm0, %v724_v52, 0.0 }
 0x178   : > { %778 = vadd.xlane.f32.xlu0 %v777_v8  ;;  %v598_v13 = vpop.xlane.xlu0 %597  ;;  %781 = vadd.xlane.f32.xlu1 %v780_v31 }
 0x179   : > { %v663_v16 = vmul.f32 0.03125, %v598_v13  ;;  %v725_v42 = vmul.f32 %v4549_v18, %v4549_v18  ;;  %v726_v45 = vmul.f32 %v4552_v53, %v4552_v53 }
 0x17b   : > { %v4561_v56 = vsub.f32 %v4366_v62, %v663_v16  ;;  %v783_v59 = vsel %vm550_vm0, %v725_v42, 0.0  ;;  %v786_v22 = vsel %vm550_vm0, %v726_v45, 0.0 }
 0x17c   : > { %784 = vadd.xlane.f32.xlu0 %v783_v59  ;;  %787 = vadd.xlane.f32.xlu1 %v786_v22 }
 0x17d   : > { %v727_v3 = vmul.f32 %v4561_v56, %v4561_v56 }
 0x17f   : > { %v789_v26 = vsel %vm550_vm0, %v727_v3, 0.0 }
 0x180   : > { %790 = vadd.xlane.f32.xlu0 %v789_v26 }
 0x1a4   : > { %v794_v62 = vpop.xlane.xlu1 %793 }
 0x1a5   : > { %v856_v29 = vmul.f32 0.03125, %v794_v62 }
 0x1a7   : > { %v888_v30 = vadd.f32 1e-05, %v856_v29 }
 0x1a9   : > { %3636 = vrsqrt.f32 %v888_v30  ;;  %v797_v36 = vpop.xlane.xlu0 %796 }
 0x1aa   : > { %v857_v48 = vmul.f32 0.03125, %v797_v36 }
 0x1ac   : > { %v889_v37 = vadd.f32 1e-05, %v857_v48 }
 0x1ae   : > { %3638 = vrsqrt.f32 %v889_v37 }
 0x1b6   : > { %v3637_v23 = vpop.eup %3636 }
 0x1b7   : > { %v952_v43 = vmul.f32 %v3637_v23, %v4371_v12 }
 0x1b9   : > { %v991_v47 = vmul.f32 %v4578_v4, %v952_v43 }
 0x1bb   : > { %v3639_v46 = vpop.eup %3638  ;;  %v1030_v27 = vadd.f32 %v4585_v6, %v991_v47 }
 0x1bc   : > { %v953_v10 = vmul.f32 %v3639_v46, %v4377_v21 }
 0x1be   : > { %v992_v14 = vmul.f32 %v4578_v4, %v953_v10 }
 0x1c0   : > { %v1031_v12 = vadd.f32 %v4585_v6, %v992_v14 }
 0x1c2   : > { %v4590_v55 = vpack.c.bf16 %v1031_v12, %v1030_v27 }
 0x1c4   : > { %3480 = vmatprep.mubr.msk.bf16.mxu1 %vm550_vm0, %v4590_v55 }
 0x1cd   : > { %v800_v38 = vpop.xlane.xlu1 %799 }
 0x1ce   : > { %v858_v21 = vmul.f32 0.03125, %v800_v38 }
 0x1d0   : > { %v890_v39 = vadd.f32 1e-05, %v858_v21 }
 0x1d1   : > { %v803_v60 = vpop.xlane.xlu0 %802  ;;  %v806_v61 = vpop.xlane.xlu1 %805 }
 0x1d2   : > { %3640 = vrsqrt.f32 %v890_v39  ;;  %v859_v52 = vmul.f32 0.03125, %v803_v60  ;;  %v860_v8 = vmul.f32 0.03125, %v806_v61 }
 0x1d4   : > { %v891_v31 = vadd.f32 1e-05, %v859_v52  ;;  %v892_v13 = vadd.f32 1e-05, %v860_v8 }
 0x1d5   : > { %v809_v16 = vpop.xlane.xlu0 %808  ;;  %v812_v42 = vpop.xlane.xlu1 %811 }
 0x1d6   : > { %3642 = vrsqrt.f32 %v891_v31  ;;  %v861_v45 = vmul.f32 0.03125, %v809_v16  ;;  %v862_v59 = vmul.f32 0.03125, %v812_v42 }
 0x1d7   : > { %3644 = vrsqrt.f32 %v892_v13 }
 0x1d8   : > { %v893_v22 = vadd.f32 1e-05, %v861_v45  ;;  %v894_v3 = vadd.f32 1e-05, %v862_v59 }
 0x1d9   : > { %v815_v26 = vpop.xlane.xlu0 %814  ;;  %v818_v62 = vpop.xlane.xlu1 %817 }
 0x1da   : > { %3646 = vrsqrt.f32 %v893_v22  ;;  %v863_v29 = vmul.f32 0.03125, %v815_v26  ;;  %v864_v30 = vmul.f32 0.03125, %v818_v62 }
 0x1db   : > { %3648 = vrsqrt.f32 %v894_v3 }
 0x1dc   : > { %v895_v36 = vadd.f32 1e-05, %v863_v29  ;;  %v896_v48 = vadd.f32 1e-05, %v864_v30 }
 0x1dd   : > { %v821_v37 = vpop.xlane.xlu0 %820  ;;  %v824_v23 = vpop.xlane.xlu1 %823 }
 0x1de   : > { %3650 = vrsqrt.f32 %v895_v36  ;;  %v865_v43 = vmul.f32 0.03125, %v821_v37  ;;  %v866_v46 = vmul.f32 0.03125, %v824_v23 }
 0x1df   : > { %v3641_v10 = vpop.eup %3640  ;;  %3652 = vrsqrt.f32 %v896_v48 }
 0x1e0   : > { %v897_v47 = vadd.f32 1e-05, %v865_v43  ;;  %v898_v14 = vadd.f32 1e-05, %v866_v46  ;;  %v954_v27 = vmul.f32 %v3641_v10, %v4386_v33 }
 0x1e1   : > { %v827_v12 = vpop.xlane.xlu0 %826  ;;  %v830_v38 = vpop.xlane.xlu1 %829 }
 0x1e2   : > { %3654 = vrsqrt.f32 %v897_v47  ;;  %v867_v21 = vmul.f32 0.03125, %v827_v12  ;;  %v868_v39 = vmul.f32 0.03125, %v830_v38  ;;  %v993_v61 = vmul.f32 %v4578_v4, %v954_v27  ;;  %v3632_v47 = vld [vmem:[%s6121_s5] sm:$0xff]  }
 0x1e3   : > { %v3643_v60 = vpop.eup %3642  ;;  %3656 = vrsqrt.f32 %v898_v14 }
 0x1e4   : > { %v3645_v52 = vpop.eup %3644  ;;  %v899_v8 = vadd.f32 1e-05, %v867_v21  ;;  %v900_v31 = vadd.f32 1e-05, %v868_v39  ;;  %v955_v13 = vmul.f32 %v3643_v60, %v4391_v40  ;;  %v1032_v26 = vadd.f32 %v4585_v6, %v993_v61 }
 0x1e5   : > { %v833_v16 = vpop.xlane.xlu0 %832  ;;  %v836_v42 = vpop.xlane.xlu1 %835  ;;  %v956_v45 = vmul.f32 %v3645_v52, %v4383_v32 }
 0x1e6   : > { %3658 = vrsqrt.f32 %v899_v8  ;;  %v869_v33 = vmul.f32 0.03125, %v833_v16  ;;  %v870_v59 = vmul.f32 0.03125, %v836_v42  ;;  %v994_v22 = vmul.f32 %v4578_v4, %v955_v13 }
 0x1e7   : > { %v3647_v3 = vpop.eup %3646  ;;  %3660 = vrsqrt.f32 %v900_v31  ;;  %v995_v32 = vmul.f32 %v4578_v4, %v956_v45 }
 0x1e8   : > { %v3649_v62 = vpop.eup %3648  ;;  %v901_v29 = vadd.f32 1e-05, %v869_v33  ;;  %v902_v30 = vadd.f32 1e-05, %v870_v59  ;;  %v1033_v36 = vadd.f32 %v4585_v6, %v994_v22  ;;  %v957_v40 = vmul.f32 %v3647_v3, %v4402_v51 }
 0x1e9   : > { %v839_v48 = vpop.xlane.xlu0 %838  ;;  %v746_v37 = vpop.xlane.xlu1 %745  ;;  %v958_v23 = vmul.f32 %v3649_v62, %v4399_v50  ;;  %v1034_v61 = vadd.f32 %v4585_v6, %v995_v32 }
 0x1ea   : > { %3662 = vrsqrt.f32 %v901_v29  ;;  %v871_v43 = vmul.f32 0.03125, %v839_v48  ;;  %v840_v46 = vmul.f32 0.03125, %v746_v37  ;;  %v4604_v10 = vpack.c.bf16 %v1033_v36, %v1032_v26 }
 0x1eb   : > { %v3651_v14 = vpop.eup %3650  ;;  %3664 = vrsqrt.f32 %v902_v30  ;;  %v996_v27 = vmul.f32 %v4578_v4, %v957_v40  ;;  %v997_v51 = vmul.f32 %v4578_v4, %v958_v23 }
 0x1ec   : > { %v3653_v12 = vpop.eup %3652  ;;  %v903_v38 = vadd.f32 1e-05, %v871_v43  ;;  %v872_v21 = vadd.f32 1e-05, %v840_v46  ;;  %3481 = vmatmul.mubr.msk.bf16.vlgmr.msra.gmra.mxu1 %vm550_vm0, %v4604_v10  ;;  %v959_v50 = vmul.f32 %v3651_v14, %v4414_v15 }
 0x1ed   : > { %v749_v39 = vpop.xlane.xlu0 %748  ;;  %v752_v60 = vpop.xlane.xlu1 %751  ;;  %v1035_v52 = vadd.f32 %v4585_v6, %v996_v27  ;;  %v960_v8 = vmul.f32 %v3653_v12, %v4411_v63  ;;  %3497 = vmatpush3.bf16.msra.mxu1 %v4571_v34  ;;  %v1036_v15 = vadd.f32 %v4585_v6, %v997_v51 }
 0x1ee   : > { %3666 = vrsqrt.f32 %v903_v38  ;;  %v841_v31 = vmul.f32 0.03125, %v749_v39  ;;  %v842_v13 = vmul.f32 0.03125, %v752_v60  ;;  %v998_v16 = vmul.f32 %v4578_v4, %v959_v50  ;;  %3498 = vmatprep.subr.bf16.mxu1 %v3632_v47 }
 0x1ef   : > { %v3655_v42 = vpop.eup %3654  ;;  %3668 = vrsqrt.f32 %v872_v21  ;;  %v4619_v45 = vpack.c.bf16 %v1035_v52, %v1034_v61  ;;  %v999_v62 = vmul.f32 %v4578_v4, %v960_v8 }
 0x1f0   : > { %v3657_v33 = vpop.eup %3656  ;;  %v873_v59 = vadd.f32 1e-05, %v841_v31  ;;  %v874_v22 = vadd.f32 1e-05, %v842_v13  ;;  %v1037_v3 = vadd.f32 %v4585_v6, %v998_v16  ;;  %v961_v63 = vmul.f32 %v3655_v42, %v4426_v19 }
 0x1f1   : > { %3484 = vmatprep.mubr.msk.bf16.mxu1 %vm550_vm0, %v4619_v45  ;;  %v755_v34 = vpop.xlane.xlu0 %754  ;;  %v758_v26 = vpop.xlane.xlu1 %757  ;;  %v962_v29 = vmul.f32 %v3657_v33, %v4423_v25  ;;  %3499 = vmatpush3.bf16.msra.mxu1 %v3632_v47  ;;  %v1038_v14 = vadd.f32 %v4585_v6, %v999_v62 }
 0x1f2   : > { %3670 = vrsqrt.f32 %v873_v59  ;;  %v843_v30 = vmul.f32 0.03125, %v755_v34  ;;  %v844_v36 = vmul.f32 0.03125, %v758_v26  ;;  %v4628_v40 = vpack.c.bf16 %v1037_v3, %v1036_v15 }
 0x1f3   : > { %v3659_v48 = vpop.eup %3658  ;;  %3672 = vrsqrt.f32 %v874_v22  ;;  %v1000_v37 = vmul.f32 %v4578_v4, %v961_v63  ;;  %v1001_v19 = vmul.f32 %v4578_v4, %v962_v29 }
 0x1f4   : > { %v3661_v32 = vpop.eup %3660  ;;  %v875_v23 = vadd.f32 1e-05, %v843_v30  ;;  %v876_v43 = vadd.f32 1e-05, %v844_v36  ;;  %3485 = vmatmul.mubr.msk.bf16.gmra.mxu1 %vm550_vm0, %v4628_v40  ;;  %v963_v25 = vmul.f32 %v3659_v48, %v4438_v2 }
 0x1f5   : > { %v761_v46 = vpop.xlane.xlu0 %760  ;;  %v764_v47 = vpop.xlane.xlu1 %763  ;;  %v1039_v27 = vadd.f32 %v4585_v6, %v1000_v37  ;;  %v964_v51 = vmul.f32 %v3661_v32, %v4435_v41  ;;  %v1040_v60 = vadd.f32 %v4585_v6, %v1001_v19 }
 0x1f6   : > { %3674 = vrsqrt.f32 %v875_v23  ;;  %v845_v12 = vmul.f32 0.03125, %v761_v46  ;;  %v846_v38 = vmul.f32 0.03125, %v764_v47  ;;  %v1002_v21 = vmul.f32 %v4578_v4, %v963_v25 }
 0x1f7   : > { %v3663_v50 = vpop.eup %3662  ;;  %3676 = vrsqrt.f32 %v876_v43  ;;  %v4639_v39 = vpack.c.bf16 %v1039_v27, %v1038_v14  ;;  %v1003_v16 = vmul.f32 %v4578_v4, %v964_v51 }
 0x1f8   : > { %v3665_v2 = vpop.eup %3664  ;;  %v877_v61 = vadd.f32 1e-05, %v845_v12  ;;  %v878_v52 = vadd.f32 1e-05, %v846_v38  ;;  %v1041_v8 = vadd.f32 %v4585_v6, %v1002_v21  ;;  %v965_v31 = vmul.f32 %v3663_v50, %v4450_v24 }
 0x1f9   : > { %3488 = vmatprep.mubr.msk.bf16.mxu1 %vm550_vm0, %v4639_v39  ;;  %v767_v41 = vpop.xlane.xlu0 %766  ;;  %v770_v13 = vpop.xlane.xlu1 %769  ;;  %v966_v42 = vmul.f32 %v3665_v2, %v4447_v54  ;;  %v1042_v30 = vadd.f32 %v4585_v6, %v1003_v16 }
 0x1fa   : > { %3678 = vrsqrt.f32 %v877_v61  ;;  %v847_v15 = vmul.f32 0.03125, %v767_v41  ;;  %v848_v33 = vmul.f32 0.03125, %v770_v13  ;;  %v4648_v59 = vpack.c.bf16 %v1041_v8, %v1040_v60 }
 0x1fb   : > { %v3667_v22 = vpop.eup %3666  ;;  %3680 = vrsqrt.f32 %v878_v52  ;;  %v1004_v3 = vmul.f32 %v4578_v4, %v965_v31  ;;  %v1005_v24 = vmul.f32 %v4578_v4, %v966_v42 }
 0x1fc   : > { %v3669_v63 = vpop.eup %3668  ;;  %v879_v34 = vadd.f32 1e-05, %v847_v15  ;;  %v880_v26 = vadd.f32 1e-05, %v848_v33  ;;  %3489 = vmatmul.mubr.msk.bf16.gmra.mxu1 %vm550_vm0, %v4648_v59  ;;  %v967_v62 = vmul.f32 %v3667_v22, %v4459_v9 }
 0x1fd   : > { %v773_v54 = vpop.xlane.xlu0 %772  ;;  %v776_v29 = vpop.xlane.xlu1 %775  ;;  %v1043_v36 = vadd.f32 %v4585_v6, %v1004_v3  ;;  %v936_v48 = vmul.f32 %v3669_v63, %v4462_v28  ;;  %v1044_v25 = vadd.f32 %v4585_v6, %v1005_v24 }
 0x1fe   : > { %3682 = vrsqrt.f32 %v879_v34  ;;  %v849_v37 = vmul.f32 0.03125, %v773_v54  ;;  %v850_v19 = vmul.f32 0.03125, %v776_v29  ;;  %v1006_v32 = vmul.f32 %v4578_v4, %v967_v62 }
 0x1ff   : > { %v3671_v23 = vpop.eup %3670  ;;  %3684 = vrsqrt.f32 %v880_v26  ;;  %v4659_v43 = vpack.c.bf16 %v1043_v36, %v1042_v30  ;;  %v975_v12 = vmul.f32 %v4578_v4, %v936_v48 }
 0x200   : > { %v3673_v9 = vpop.eup %3672  ;;  %v881_v46 = vadd.f32 1e-05, %v849_v37  ;;  %v882_v47 = vadd.f32 1e-05, %v850_v19  ;;  %v1045_v14 = vadd.f32 %v4585_v6, %v1006_v32  ;;  %v937_v27 = vmul.f32 %v3671_v23, %v4471_v0 }
 0x201   : > { %3492 = vmatprep.mubr.msk.bf16.mxu1 %vm550_vm0, %v4659_v43  ;;  %v779_v28 = vpop.xlane.xlu0 %778  ;;  %v782_v51 = vpop.xlane.xlu1 %781  ;;  %v938_v38 = vmul.f32 %v3673_v9, %v4474_v5  ;;  %v1014_v16 = vadd.f32 %v4585_v6, %v975_v12 }
 0x202   : > { %3686 = vrsqrt.f32 %v881_v46  ;;  %v851_v21 = vmul.f32 0.03125, %v779_v28  ;;  %v852_v50 = vmul.f32 0.03125, %v782_v51  ;;  %v4668_v60 = vpack.c.bf16 %v1045_v14, %v1044_v25 }
 0x203   : > { %v3675_v2 = vpop.eup %3674  ;;  %3688 = vrsqrt.f32 %v882_v47  ;;  %v976_v61 = vmul.f32 %v4578_v4, %v937_v27  ;;  %v977_v0 = vmul.f32 %v4578_v4, %v938_v38 }
 0x204   : > { %v3677_v52 = vpop.eup %3676  ;;  %v883_v8 = vadd.f32 1e-05, %v851_v21  ;;  %v884_v31 = vadd.f32 1e-05, %v852_v50  ;;  %3493 = vmatmul.mubr.msk.bf16.gmra.mxu1 %vm550_vm0, %v4668_v60  ;;  %v939_v41 = vmul.f32 %v3675_v2, %v4483_v44 }
 0x205   : > { %v785_v5 = vpop.xlane.xlu0 %784  ;;  %v788_v13 = vpop.xlane.xlu1 %787  ;;  %v1015_v42 = vadd.f32 %v4585_v6, %v976_v61  ;;  %v940_v15 = vmul.f32 %v3677_v52, %v4486_v35  ;;  %v1016_v34 = vadd.f32 %v4585_v6, %v977_v0 }
 0x206   : > { %3690 = vrsqrt.f32 %v883_v8  ;;  %v853_v33 = vmul.f32 0.03125, %v785_v5  ;;  %v854_v22 = vmul.f32 0.03125, %v788_v13  ;;  %v978_v3 = vmul.f32 %v4578_v4, %v939_v41 }
 0x207   : > { %v3679_v24 = vpop.eup %3678  ;;  %3692 = vrsqrt.f32 %v884_v31  ;;  %v1046_v63 = vpack.c.bf16 %v1015_v42, %v1014_v16  ;;  %v979_v44 = vmul.f32 %v4578_v4, %v940_v15 }
 0x208   : > { %v3681_v26 = vpop.eup %3680  ;;  %v885_v62 = vadd.f32 1e-05, %v853_v33  ;;  %v886_v54 = vadd.f32 1e-05, %v854_v22  ;;  %v1017_v29 = vadd.f32 %v4585_v6, %v978_v3  ;;  %v941_v30 = vmul.f32 %v3679_v24, %v4498_v57 }
 0x209   : > { %3464 = vmatprep.mubr.msk.bf16.mxu0 %vm550_vm0, %v1046_v63  ;;  %3500 = vmatprep.mubr.msk.bf16.mxu1 %vm550_vm0, %v1046_v63  ;;  %v791_v35 = vpop.xlane.xlu0 %790  ;;  %v942_v36 = vmul.f32 %v3681_v26, %v4501_v58  ;;  %v1018_v23 = vadd.f32 %v4585_v6, %v979_v44 }
 0x20a   : > { %3694 = vrsqrt.f32 %v885_v62  ;;  %v855_v48 = vmul.f32 0.03125, %v791_v35  ;;  %v1047_v37 = vpack.c.bf16 %v1017_v29, %v1016_v34  ;;  %v980_v19 = vmul.f32 %v4578_v4, %v941_v30 }
 0x20b   : > { %v3683_v32 = vpop.eup %3682  ;;  %3696 = vrsqrt.f32 %v886_v54  ;;  %v981_v58 = vmul.f32 %v4578_v4, %v942_v36 }
 0x20c   : > { %v3685_v25 = vpop.eup %3684  ;;  %v887_v9 = vadd.f32 1e-05, %v855_v48  ;;  %3465 = vmatmul.mubr.msk.bf16.vlgmr.msra.gmra.mxu0 %vm550_vm0, %v1047_v37  ;;  %3501 = vmatmul.mubr.msk.bf16.vlgmr.msra.gmra.mxu1 %vm550_vm0, %v1047_v37  ;;  %v1019_v57 = vadd.f32 %v4585_v6, %v980_v19  ;;  %v943_v46 = vmul.f32 %v3683_v32, %v4513_v17 }
 0x20d   : > { %v944_v47 = vmul.f32 %v3685_v25, %v4516_v20  ;;  %v1020_v38 = vadd.f32 %v4585_v6, %v981_v58 }
 0x20e   : > { %3698 = vrsqrt.f32 %v887_v9  ;;  %v1048_v14 = vpack.c.bf16 %v1019_v57, %v1018_v23  ;;  %v982_v27 = vmul.f32 %v4578_v4, %v943_v46 }
 0x20f   : > { %v3687_v28 = vpop.eup %3686  ;;  %v983_v51 = vmul.f32 %v4578_v4, %v944_v47 }
 0x210   : > { %v3689_v12 = vpop.eup %3688  ;;  %3468 = vmatprep.mubr.msk.bf16.mxu0 %vm550_vm0, %v1048_v14  ;;  %3504 = vmatprep.mubr.msk.bf16.mxu1 %vm550_vm0, %v1048_v14  ;;  %v1021_v17 = vadd.f32 %v4585_v6, %v982_v27  ;;  %v945_v21 = vmul.f32 %v3687_v28, %v4525_v1 }
 0x211   : > { %v946_v20 = vmul.f32 %v3689_v12, %v4528_v7  ;;  %v1022_v0 = vadd.f32 %v4585_v6, %v983_v51 }
 0x212   : > { %v1049_v50 = vpack.c.bf16 %v1021_v17, %v1020_v38  ;;  %v984_v2 = vmul.f32 %v4578_v4, %v945_v21  ;;  %v4791_v38 = vld [vmem:[%s6122_s6] ss:$0 sm:$0xff] }
 0x213   : > { %v3691_v61 = vpop.eup %3690  ;;  %v985_v41 = vmul.f32 %v4578_v4, %v946_v20 }
 0x214   : > { %v3693_v52 = vpop.eup %3692  ;;  %3469 = vmatmul.mubr.msk.bf16.gmra.mxu0 %vm550_vm0, %v1049_v50  ;;  %3505 = vmatmul.mubr.msk.bf16.gmra.mxu1 %vm550_vm0, %v1049_v50  ;;  %v1023_v8 = vadd.f32 %v4585_v6, %v984_v2  ;;  %v947_v31 = vmul.f32 %v3691_v61, %v4537_v11 }
 0x215   : > { %v948_v1 = vmul.f32 %v3693_v52, %v4540_v49  ;;  %v1024_v15 = vadd.f32 %v4585_v6, %v985_v41 }
 0x216   : > { %v1050_v7 = vpack.c.bf16 %v1023_v8, %v1022_v0  ;;  %v986_v5 = vmul.f32 %v4578_v4, %v947_v31 }
 0x217   : > { %v3695_v13 = vpop.eup %3694  ;;  %v987_v16 = vmul.f32 %v4578_v4, %v948_v1 }
 0x218   : > { %v3697_v42 = vpop.eup %3696  ;;  %3472 = vmatprep.mubr.msk.bf16.mxu0 %vm550_vm0, %v1050_v7  ;;  %3508 = vmatprep.mubr.msk.bf16.mxu1 %vm550_vm0, %v1050_v7  ;;  %v1025_v33 = vadd.f32 %v4585_v6, %v986_v5  ;;  %v949_v11 = vmul.f32 %v3695_v13, %v4549_v18 }
 0x219   : > { %v950_v22 = vmul.f32 %v3697_v42, %v4552_v53  ;;  %v1026_v63 = vadd.f32 %v4585_v6, %v987_v16 }
 0x21a   : > { %v1051_v49 = vpack.c.bf16 %v1025_v33, %v1024_v15  ;;  %v988_v3 = vmul.f32 %v4578_v4, %v949_v11 }
 0x21b   : > { %v3699_v24 = vpop.eup %3698  ;;  %v989_v26 = vmul.f32 %v4578_v4, %v950_v22 }
 0x21c   : > { %3473 = vmatmul.mubr.msk.bf16.gmra.mxu0 %vm550_vm0, %v1051_v49  ;;  %3509 = vmatmul.mubr.msk.bf16.gmra.mxu1 %vm550_vm0, %v1051_v49  ;;  %v1027_v34 = vadd.f32 %v4585_v6, %v988_v3  ;;  %v951_v44 = vmul.f32 %v3699_v24, %v4561_v56 }
 0x21d   : > { %v1028_v53 = vadd.f32 %v4585_v6, %v989_v26 }
 0x21e   : > { %v1052_v62 = vpack.c.bf16 %v1027_v34, %v1026_v63  ;;  %v990_v18 = vmul.f32 %v4578_v4, %v951_v44 }
 0x220   : > { %3476 = vmatprep.mubr.msk.bf16.mxu0 %vm550_vm0, %v1052_v62  ;;  %3512 = vmatprep.mubr.msk.bf16.mxu1 %vm550_vm0, %v1052_v62  ;;  %v1029_v54 = vadd.f32 %v4585_v6, %v990_v18 }
 0x222   : > { %v1053_v29 = vpack.c.bf16 %v1029_v54, %v1028_v53 }
 0x224   : > { %3477 = vmatmul.mubr.msk.bf16.gmra.mxu0 %vm550_vm0, %v1053_v29  ;;  %3513 = vmatmul.mubr.msk.bf16.gmra.mxu1 %vm550_vm0, %v1053_v29 }
 0x225   : > { %3516 = vmatprep.mubr.msk.bf16.mxu1 %vm550_vm0, %v4590_v55 }
 0x22c   : > { %3517 = vmatmul.mubr.msk.bf16.gmra.mxu1 %vm550_vm0, %v4604_v10 }
 0x22d   : > { %3520 = vmatprep.mubr.msk.bf16.mxu1 %vm550_vm0, %v4619_v45 }
 0x234   : > { %3521 = vmatmul.mubr.msk.bf16.gmra.mxu1 %vm550_vm0, %v4628_v40 }
 0x235   : > { %3524 = vmatprep.mubr.msk.bf16.mxu1 %vm550_vm0, %v4639_v39 }
 0x23c   : > { %3525 = vmatmul.mubr.msk.bf16.gmra.mxu1 %vm550_vm0, %v4648_v59 }
 0x23d   : > { %3528 = vmatprep.mubr.msk.bf16.mxu1 %vm550_vm0, %v4659_v43 }
 0x244   : > { %3529 = vmatmul.mubr.msk.bf16.gmra.mxu1 %vm550_vm0, %v4668_v60 }
 0x2ac   : > { %v4748_v56 = vpop.f32.mrf.mxu1 }
 0x2ad   : > { %6151 = vst [vmem:[#allocation13_spill] sm:$0xff] %v4748_v56 }
 0x2ae   : > { %v4750_v4 = vpop.f32.mrf.mxu1 }
 0x2af   : > { %6152 = vst [vmem:[#allocation14_spill] sm:$0xff] %v4750_v4 }
 0x2b0   : > { %v4752_v6 = vpop.f32.mrf.mxu1 }
 0x2b1   : > { %6153 = vst [vmem:[#allocation15_spill] sm:$0xff] %v4752_v6 }
 0x2b2   : > { %v4754_v55 = vpop.f32.mrf.mxu1 }
 0x2b3   : > { %6154 = vst [vmem:[#allocation16_spill] sm:$0xff] %v4754_v55 }
 0x2b4   : > { %v4756_v10 = vpop.f32.mrf.mxu1 }
 0x2b5   : > { %6155 = vst [vmem:[#allocation17_spill] sm:$0xff] %v4756_v10 }
 0x2b6   : > { %v4758_v45 = vpop.f32.mrf.mxu1 }
 0x2b7   : > { %6156 = vst [vmem:[#allocation18_spill] sm:$0xff] %v4758_v45 }
 0x2b8   : > { %v4760_v40 = vpop.f32.mrf.mxu1 }
 0x2b9   : > { %6157 = vst [vmem:[#allocation19_spill] sm:$0xff] %v4760_v40 }
 0x2ba   : > { %v4762_v39 = vpop.f32.mrf.mxu1 }
 0x2bb   : > { %6158 = vst [vmem:[#allocation20_spill] sm:$0xff] %v4762_v39 }
 0x2bc   : > { %v4764_v59 = vpop.f32.mrf.mxu1 }
 0x2bd   : > { %6159 = vst [vmem:[#allocation21_spill] sm:$0xff] %v4764_v59 }
 0x2be   : > { %v4766_v43 = vpop.f32.mrf.mxu1 }
 0x2bf   : > { %6160 = vst [vmem:[#allocation22_spill] sm:$0xff] %v4766_v43 }
 0x2c0   : > { %v4768_v60 = vpop.f32.mrf.mxu1 }
 0x2c1   : > { %6161 = vst [vmem:[#allocation23_spill] sm:$0xff] %v4768_v60 }
 0x2c2   : > { %v4770_v30 = vpop.f32.mrf.mxu1 }
 0x2c3   : > { %6162 = vst [vmem:[#allocation24_spill] sm:$0xff] %v4770_v30 }
 0x2c4   : > { %v4772_v35 = vpop.f32.mrf.mxu1 }
 0x2c5   : > { %6163 = vst [vmem:[#allocation25_spill] sm:$0xff] %v4772_v35 }
 0x2c6   : > { %v4774_v36 = vpop.f32.mrf.mxu1 }
 0x2c7   : > { %6164 = vst [vmem:[#allocation26_spill] sm:$0xff] %v4774_v36 }
 0x2c8   : > { %v4776_v48 = vpop.f32.mrf.mxu1 }
 0x2c9   : > { %6165 = vst [vmem:[#allocation27_spill] sm:$0xff] %v4776_v48 }
 0x2ca   : > { %v4778_v37 = vpop.f32.mrf.mxu1 }
 0x2cb   : > { %6166 = vst [vmem:[#allocation28_spill] sm:$0xff] %v4778_v37 }
 0x2cc   : > { %v3502_v19 = vpop.f32.mrf.mxu1 }
 0x2cd   : > { %v4794_v21 = vadd.f32 %v3502_v19, %v4791_v38 }
 0x2ce   : > { %v4780_v32 = vpop.f32.mrf.mxu1 }
 0x2cf   : > { %v1768_v2 = vmul.f32 %v4794_v21, %v4794_v21 }
 0x2d0   : > { %v3503_v23 = vpop.f32.mrf.mxu1 }
 0x2d1   : > { %v4799_v61 = vadd.f32 %v3503_v23, %v4791_v38  ;;  %v1800_v8 = vmul.f32 %v1768_v2, %v4794_v21 }
 0x2d2   : > { %v4782_v25 = vpop.f32.mrf.mxu1 }
 0x2d3   : > { %v1769_v31 = vmul.f32 %v4799_v61, %v4799_v61  ;;  %v1832_v5 = vmul.f32 0.044715, %v1800_v8 }
 0x2d4   : > { %v3506_v9 = vpop.f32.mrf.mxu1 }
 0x2d5   : > { %v1801_v13 = vmul.f32 %v1769_v31, %v4799_v61  ;;  %v1864_v11 = vadd.f32 %v1832_v5, %v4794_v21  ;;  %v4826_v3 = vadd.f32 %v3506_v9, %v4791_v38 }
 0x2d6   : > { %v1367_v57 = vpop.f32.mrf.mxu1 }
 0x2d7   : > { %v4809_v1 = vadd.f32 %v4791_v38, %v1367_v57  ;;  %v1833_v22 = vmul.f32 0.044715, %v1801_v13  ;;  %v1896_v18 = vmul.f32 0.7978846, %v1864_v11  ;;  %v1772_v53 = vmul.f32 %v4826_v3, %v4826_v3 }
 0x2d8   : > { %v3507_v46 = vpop.f32.mrf.mxu1 }
 0x2d9   : > { %v4815_v16 = vadd.f32 %v3507_v46, %v4791_v38  ;;  %v1770_v42 = vmul.f32 %v4809_v1, %v4809_v1  ;;  %v1865_v26 = vadd.f32 %v1833_v22, %v4799_v61  ;;  %3700 = vtanh.f32 %v1896_v18 }
 0x2da   : > { %v1370_v58 = vpop.f32.mrf.mxu1 }
 0x2db   : > { %v4820_v33 = vadd.f32 %v4791_v38, %v1370_v58  ;;  %v1773_v49 = vmul.f32 %v4815_v16, %v4815_v16  ;;  %v1802_v24 = vmul.f32 %v1770_v42, %v4809_v1  ;;  %v1897_v46 = vmul.f32 0.7978846, %v1865_v26 }
 0x2dc   : > { %v3510_v47 = vpop.f32.mrf.mxu1  ;;  %v1804_v58 = vmul.f32 %v1772_v53, %v4826_v3 }
 0x2dd   : > { %v4832_v34 = vadd.f32 %v3510_v47, %v4791_v38  ;;  %v1771_v44 = vmul.f32 %v4820_v33, %v4820_v33  ;;  %v1805_v62 = vmul.f32 %v1773_v49, %v4815_v16  ;;  %v1834_v54 = vmul.f32 0.044715, %v1802_v24 }
 0x2de   : > { %v4784_v14 = vpop.f32.mrf.mxu1  ;;  %3702 = vtanh.f32 %v1897_v46 }
 0x2df   : > { %v1776_v19 = vmul.f32 %v4832_v34, %v4832_v34  ;;  %v1803_v9 = vmul.f32 %v1771_v44, %v4820_v33  ;;  %v1837_v57 = vmul.f32 0.044715, %v1805_v62  ;;  %v1866_v47 = vadd.f32 %v1834_v54, %v4809_v1 }
 0x2e0   : > { %v3511_v27 = vpop.f32.mrf.mxu1 }
 0x2e1   : > { %v4843_v23 = vadd.f32 %v3511_v27, %v4791_v38  ;;  %v1808_v31 = vmul.f32 %v1776_v19, %v4832_v34  ;;  %v1835_v27 = vmul.f32 0.044715, %v1803_v9  ;;  %v1869_v11 = vadd.f32 %v1837_v57, %v4815_v16 }
 0x2e2   : > { %v4786_v28 = vpop.f32.mrf.mxu1  ;;  %v1898_v44 = vmul.f32 0.7978846, %v1866_v47  ;;  %v4895_v9 = vadd.f32 %v4791_v38, %v4782_v25 }
 0x2e3   : > { %v1777_v5 = vmul.f32 %v4843_v23, %v4843_v23  ;;  %v1867_v18 = vadd.f32 %v1835_v27, %v4820_v33  ;;  %v1901_v19 = vmul.f32 0.7978846, %v1869_v11 }
 0x2e4   : > { %v3514_v51 = vpop.f32.mrf.mxu1  ;;  %3704 = vtanh.f32 %v1898_v44  ;;  %v4916_v44 = vadd.f32 %v4791_v38, %v4786_v28 }
 0x2e5   : > { %v4855_v13 = vadd.f32 %v3514_v51, %v4791_v38  ;;  %v1840_v51 = vmul.f32 0.044715, %v1808_v31  ;;  %v1809_v62 = vmul.f32 %v1777_v5, %v4843_v23  ;;  %3706 = vtanh.f32 %v1901_v19 }
 0x2e6   : > { %v1399_v12 = vpop.f32.mrf.mxu1  ;;  %v3701_v5 = vpop.eup %3700 }
 0x2e7   : > { %v4865_v49 = vadd.f32 %v4791_v38, %v1399_v12  ;;  %v1780_v12 = vmul.f32 %v4855_v13, %v4855_v13  ;;  %v1841_v31 = vmul.f32 0.044715, %v1809_v62 }
 0x2e8   : > { %v3515_v17 = vpop.f32.mrf.mxu1 }
 0x2e9   : > { %v4883_v53 = vadd.f32 %v3515_v17, %v4791_v38  ;;  %v1778_v17 = vmul.f32 %v4865_v49, %v4865_v49  ;;  %v1812_v27 = vmul.f32 %v1780_v12, %v4855_v13 }
 0x2ea   : > { %v1402_v20 = vpop.f32.mrf.mxu1 }
 0x2eb   : > { %v4849_v2 = vadd.f32 %v4791_v38, %v1402_v20  ;;  %v1836_v20 = vmul.f32 0.044715, %v1804_v58  ;;  %v1781_v11 = vmul.f32 %v4883_v53, %v4883_v53  ;;  %v1810_v48 = vmul.f32 %v1778_v17, %v4865_v49  ;;  %v3703_v28 = vpop.eup %3702 }
 0x2ec   : > { %v3518_v50 = vpop.f32.mrf.mxu1  ;;  %v1844_v60 = vmul.f32 0.044715, %v1812_v27 }
 0x2ed   : > { %v4858_v42 = vadd.f32 %v3518_v50, %v4791_v38  ;;  %v1779_v24 = vmul.f32 %v4849_v2, %v4849_v2  ;;  %v4873_v50 = vadd.f32 %v4791_v38, %v4784_v14  ;;  %v4889_v14 = vadd.f32 %v4791_v38, %v4780_v32 }
 0x2ee   : > { %v4801_v0 = vpop.f32.mrf.mxu1  ;;  %v4898_v57 = vadd.f32 %v1836_v20, %v4826_v3  ;;  %v1872_v32 = vadd.f32 %v1840_v51, %v4832_v34  ;;  %v1960_v51 = vadd.f32 1.0, %v3701_v5  ;;  %v1813_v5 = vmul.f32 %v1781_v11, %v4883_v53 }
 0x2ef   : > { %v1784_v54 = vmul.f32 %v4858_v42, %v4858_v42  ;;  %v1811_v46 = vmul.f32 %v1779_v24, %v4849_v2  ;;  %v4906_v47 = vmul.f32 %v4873_v50, %v4873_v50  ;;  %v1899_v24 = vmul.f32 0.7978846, %v1867_v18 }
 0x2f0   : > { %v3519_v52 = vpop.f32.mrf.mxu1  ;;  %v1992_v18 = vmul.f32 0.5, %v1960_v51  ;;  %v1904_v36 = vmul.f32 0.7978846, %v1872_v32 }
 0x2f1   : > { %v4862_v22 = vadd.f32 %v3519_v52, %v4791_v38  ;;  %v1816_v20 = vmul.f32 %v1784_v54, %v4858_v42  ;;  %v1843_v35 = vmul.f32 0.044715, %v1811_v46  ;;  %3708 = vtanh.f32 %v1899_v24 }
 0x2f2   : > { %v4806_v41 = vpop.f32.mrf.mxu1  ;;  %v1873_v54 = vadd.f32 %v1841_v31, %v4843_v23  ;;  %v1961_v24 = vadd.f32 1.0, %v3703_v28  ;;  %3710 = vtanh.f32 %v1904_v36  ;;  %v4936_v31 = vmul.f32 %v4916_v44, %v4916_v44 }
 0x2f3   : > { %v1875_v32 = vadd.f32 %v1843_v35, %v4849_v2  ;;  %v1845_v36 = vmul.f32 0.044715, %v1813_v5 }
 0x2f4   : > { %v4811_v7 = vpop.f32.mrf.mxu1  ;;  %v1905_v35 = vmul.f32 0.7978846, %v1873_v54 }
 0x2f5   : > { %v1907_v5 = vmul.f32 0.7978846, %v1875_v32 }
 0x2f6   : > { %v1431_v15 = vpop.f32.mrf.mxu1  ;;  %3712 = vtanh.f32 %v1905_v35 }
 0x2f7   : > { %v4877_v52 = vadd.f32 %v4791_v38, %v1431_v15  ;;  %v1785_v15 = vmul.f32 %v4862_v22, %v4862_v22  ;;  %3714 = vtanh.f32 %v1907_v5 }
 0x2f8   : > { %v4829_v63 = vpop.f32.mrf.mxu1 }
 0x2f9   : > { %v1786_v25 = vmul.f32 %v4877_v52, %v4877_v52  ;;  %v1817_v62 = vmul.f32 %v1785_v15, %v4862_v22  ;;  %v1848_v15 = vmul.f32 0.044715, %v1816_v20  ;;  %v1993_v20 = vmul.f32 0.5, %v1961_v24 }
 0x2fa   : > { %v1434_v29 = vpop.f32.mrf.mxu1 }
 0x2fb   : > { %v4921_v37 = vadd.f32 %v4791_v38, %v1434_v29  ;;  %v1818_v19 = vmul.f32 %v1786_v25, %v4877_v52  ;;  %v4932_v29 = vmul.f32 %v1992_v18, %v4794_v21  ;;  %v1849_v46 = vmul.f32 0.044715, %v1817_v62 }
 0x2fc   : > { %v3526_v8 = vpop.f32.mrf.mxu1  ;;  %v1842_v25 = vmul.f32 0.044715, %v1810_v48  ;;  %v1880_v62 = vadd.f32 %v1848_v15, %v4858_v42  ;;  %v1876_v18 = vadd.f32 %v1844_v60, %v4855_v13  ;;  %v4952_v59 = vmul.f32 %v1993_v20, %v4799_v61 }
 0x2fd   : > { %v4929_v17 = vadd.f32 %v3526_v8, %v4791_v38  ;;  %v1787_v27 = vmul.f32 %v4921_v37, %v4921_v37  ;;  %v2060_v8 = vsel %vm550_vm0, %v4932_v29, 0.0  ;;  %v1850_v21 = vmul.f32 0.044715, %v1818_v19 }
 0x2fe   : > { %v4869_v26 = vpop.f32.mrf.mxu1  ;;  %2061 = vadd.xlane.f32.xlu1 %v2060_v8  ;;  %v1881_v28 = vadd.f32 %v1849_v46, %v4862_v22  ;;  %v4956_v19 = vadd.f32 %v4811_v7, %v4791_v38  ;;  %v1874_v46 = vadd.f32 %v1842_v25, %v4865_v49  ;;  %v2063_v61 = vsel %vm550_vm0, %v4952_v59, 0.0 }
 0x2ff   : > { %v1792_v48 = vmul.f32 %v4929_v17, %v4929_v17  ;;  %v1819_v15 = vmul.f32 %v1787_v27, %v4921_v37  ;;  %v1882_v8 = vadd.f32 %v1850_v21, %v4877_v52  ;;  %v1877_v20 = vadd.f32 %v1845_v36, %v4883_v53  ;;  %2064 = vadd.xlane.f32.xlu0 %v2063_v61 }
 0x300   : > { %v3527_v58 = vpop.f32.mrf.mxu1  ;;  %v1912_v32 = vmul.f32 0.7978846, %v1880_v62  ;;  %v1913_v39 = vmul.f32 0.7978846, %v1881_v28  ;;  %v1908_v45 = vmul.f32 0.7978846, %v1876_v18  ;;  %v1788_v21 = vmul.f32 %v4956_v19, %v4956_v19 }
 0x301   : > { %v4944_v51 = vadd.f32 %v3527_v58, %v4791_v38  ;;  %v3705_v58 = vpop.eup %3704  ;;  %v1824_v27 = vmul.f32 %v1792_v48, %v4929_v17  ;;  %v1914_v10 = vmul.f32 0.7978846, %v1882_v8  ;;  %v4985_v18 = vadd.f32 %v4829_v63, %v4791_v38 }
 0x302   : > { %v4923_v12 = vpop.f32.mrf.mxu1  ;;  %v1962_v7 = vadd.f32 1.0, %v3705_v58  ;;  %v4972_v25 = vpop.eup %3706  ;;  %v1851_v58 = vmul.f32 0.044715, %v1819_v15  ;;  %3716 = vtanh.f32 %v1908_v45  ;;  %v1906_v6 = vmul.f32 0.7978846, %v1874_v46 }
 0x303   : > { %v1793_v24 = vmul.f32 %v4944_v51, %v4944_v51  ;;  %v3709_v61 = vpop.eup %3708  ;;  %3718 = vtanh.f32 %v1912_v32  ;;  %v1856_v5 = vmul.f32 0.044715, %v1824_v27 }
 0x304   : > { %v3530_v11 = vpop.f32.mrf.mxu1  ;;  %v1994_v40 = vmul.f32 0.5, %v1962_v7  ;;  %v1963_v28 = vadd.f32 1.0, %v3709_v61  ;;  %3720 = vtanh.f32 %v1913_v39  ;;  %v3711_v45 = vpop.eup %3710  ;;  %v1909_v7 = vmul.f32 0.7978846, %v1877_v20 }
 0x305   : > { %v4962_v54 = vadd.f32 %v3530_v11, %v4791_v38  ;;  %v1825_v36 = vmul.f32 %v1793_v24, %v4944_v51  ;;  %3722 = vtanh.f32 %v1914_v10  ;;  %v1968_v32 = vadd.f32 1.0, %v3711_v45 }
 0x306   : > { %v1463_v60 = vpop.f32.mrf.mxu1  ;;  %v4978_v48 = vmul.f32 %v1994_v40, %v4809_v1  ;;  %v1883_v1 = vadd.f32 %v1851_v58, %v4921_v37  ;;  %v1888_v58 = vadd.f32 %v1856_v5, %v4929_v17  ;;  %3724 = vtanh.f32 %v1909_v7 }
 0x307   : > { %v1796_v11 = vmul.f32 %v4962_v54, %v4962_v54  ;;  %v4981_v35 = vadd.f32 %v4791_v38, %v1463_v60  ;;  %v1995_v60 = vmul.f32 0.5, %v1963_v28  ;;  %v1857_v8 = vmul.f32 0.044715, %v1825_v36 }
 0x308   : > { %v3531_v62 = vpop.f32.mrf.mxu1  ;;  %v2066_v15 = vsel %vm550_vm0, %v4978_v48, 0.0  ;;  %v2000_v36 = vmul.f32 0.5, %v1968_v32  ;;  %v1915_v28 = vmul.f32 0.7978846, %v1883_v1  ;;  %v1820_v7 = vmul.f32 %v1788_v21, %v4956_v19  ;;  %v3713_v32 = vpop.eup %3712 }
 0x309   : > { %v1828_v24 = vmul.f32 %v1796_v11, %v4962_v54  ;;  %v4991_v40 = vadd.f32 %v3531_v62, %v4791_v38  ;;  %2067 = vadd.xlane.f32.xlu1 %v2066_v15  ;;  %v1794_v39 = vmul.f32 %v4981_v35, %v4981_v35  ;;  %v1789_v11 = vmul.f32 %v4985_v18, %v4985_v18 }
 0x30a   : > { %v1466_v63 = vpop.f32.mrf.mxu1  ;;  %v5001_v62 = vmul.f32 %v1995_v60, %v4820_v33  ;;  %v1889_v45 = vadd.f32 %v1857_v8, %v4944_v51  ;;  %v5012_v33 = vmul.f32 %v2000_v36, %v4832_v34  ;;  %3726 = vtanh.f32 %v1906_v6 }
 0x30b   : > { %v1797_v27 = vmul.f32 %v4991_v40, %v4991_v40  ;;  %v1860_v20 = vmul.f32 0.044715, %v1828_v24  ;;  %v5006_v61 = vadd.f32 %v4791_v38, %v1466_v63  ;;  %v1826_v5 = vmul.f32 %v1794_v39, %v4981_v35 }
 0x30c   : > { %v2069_v15 = vsel %vm550_vm0, %v5001_v62, 0.0  ;;  %v1821_v1 = vmul.f32 %v1789_v11, %v4985_v18  ;;  %v1900_v63 = vmul.f32 0.7978846, %v4898_v57  ;;  %v1920_v8 = vmul.f32 0.7978846, %v1888_v58 }
 0x30d   : > { %v1829_v10 = vmul.f32 %v1797_v27, %v4991_v40  ;;  %2070 = vadd.xlane.f32.xlu0 %v2069_v15  ;;  %v1795_v24 = vmul.f32 %v5006_v61, %v5006_v61  ;;  %v2084_v46 = vsel %vm550_vm0, %v5012_v33, 0.0  ;;  %v1892_v34 = vadd.f32 %v1860_v20, %v4962_v54 }
 0x30e   : > { %3728 = vtanh.f32 %v1915_v28  ;;  %2085 = vadd.xlane.f32.xlu1 %v2084_v46  ;;  %v1921_v27 = vmul.f32 0.7978846, %v1889_v45  ;;  %v1969_v36 = vadd.f32 1.0, %v3713_v32  ;;  %v1766_v6 = vmul.f32 %v4889_v14, %v4889_v14 }
 0x30f   : > { %v1861_v60 = vmul.f32 0.044715, %v1829_v10  ;;  %v1827_v39 = vmul.f32 %v1795_v24, %v5006_v61  ;;  %v3715_v10 = vpop.eup %3714  ;;  %v1767_v57 = vmul.f32 %v4895_v9, %v4895_v9  ;;  %v1858_v11 = vmul.f32 0.044715, %v1826_v5 }
 0x310   : > { %3730 = vtanh.f32 %v1900_v63  ;;  %v3717_v58 = vpop.eup %3716  ;;  %v1806_v20 = vmul.f32 %v4906_v47, %v4873_v50  ;;  %v1807_v28 = vmul.f32 %v4936_v31, %v4916_v44  ;;  %v2001_v15 = vmul.f32 0.5, %v1969_v36 }
 0x311   : > { %v1893_v21 = vadd.f32 %v1861_v60, %v4991_v40  ;;  %v1859_v45 = vmul.f32 0.044715, %v1827_v39  ;;  %v3719_v24 = vpop.eup %3718  ;;  %v1852_v60 = vmul.f32 0.044715, %v1820_v7  ;;  %3732 = vtanh.f32 %v1920_v8 }
 0x312   : > { %v1924_v32 = vmul.f32 0.7978846, %v1892_v34  ;;  %v1972_v46 = vadd.f32 1.0, %v3717_v58  ;;  %v3721_v56 = vpop.eup %3720  ;;  %v1853_v30 = vmul.f32 0.044715, %v1821_v1  ;;  %3734 = vtanh.f32 %v1921_v27 }
 0x313   : > { %v5034_v5 = vmul.f32 %v2001_v15, %v4843_v23  ;;  %v1925_v63 = vmul.f32 0.7978846, %v1893_v21  ;;  %v1890_v47 = vadd.f32 %v1858_v11, %v4981_v35  ;;  %v1971_v43 = vadd.f32 1.0, %v3715_v10  ;;  %v3723_v4 = vpop.eup %3722 }
 0x314   : > { %v2004_v55 = vmul.f32 0.5, %v1972_v46  ;;  %v1798_v31 = vmul.f32 %v1766_v6, %v4889_v14  ;;  %v1799_v39 = vmul.f32 %v1767_v57, %v4895_v9  ;;  %v1891_v8 = vadd.f32 %v1859_v45, %v5006_v61  ;;  %v3725_v1 = vpop.eup %3724 }
 0x315   : > { %v2087_v7 = vsel %vm550_vm0, %v5034_v5, 0.0  ;;  %v1838_v34 = vmul.f32 0.044715, %v1806_v20  ;;  %v1839_v27 = vmul.f32 0.044715, %v1807_v28  ;;  %3736 = vtanh.f32 %v1924_v32 }
 0x316   : > { %2088 = vadd.xlane.f32.xlu0 %v2087_v7  ;;  %v5043_v23 = vmul.f32 %v2004_v55, %v4855_v13  ;;  %v1884_v36 = vadd.f32 %v1852_v60, %v4956_v19  ;;  %v1885_v21 = vadd.f32 %v1853_v30, %v4985_v18  ;;  %3738 = vtanh.f32 %v1925_v63 }
 0x317   : > { %v1973_v10 = vadd.f32 1.0, %v3725_v1  ;;  %v1922_v57 = vmul.f32 0.7978846, %v1890_v47  ;;  %v2003_v11 = vmul.f32 0.5, %v1971_v43  ;;  %v1965_v58 = vadd.f32 1.0, %v4972_v25  ;;  %v3727_v15 = vpop.eup %3726 }
 0x318   : > { %v2096_v6 = vsel %vm550_vm0, %v5043_v23, 0.0  ;;  %v1923_v28 = vmul.f32 0.7978846, %v1891_v8  ;;  %v1830_v45 = vmul.f32 0.044715, %v1798_v31  ;;  %v1870_v13 = vadd.f32 %v1838_v34, %v4873_v50 }
 0x319   : > { %2097 = vadd.xlane.f32.xlu1 %v2096_v6  ;;  %v2005_v20 = vmul.f32 0.5, %v1973_v10  ;;  %v1831_v55 = vmul.f32 0.044715, %v1799_v39  ;;  %v1871_v60 = vadd.f32 %v1839_v27, %v4916_v44  ;;  %v1916_v30 = vmul.f32 0.7978846, %v1884_v36 }
 0x31a   : > { %v1917_v32 = vmul.f32 0.7978846, %v1885_v21  ;;  %v1970_v63 = vadd.f32 1.0, %v3727_v15  ;;  %3740 = vtanh.f32 %v1922_v57  ;;  %v5056_v43 = vmul.f32 %v2003_v11, %v4849_v2 }
 0x31b   : > { %v5053_v46 = vmul.f32 %v2005_v20, %v4883_v53  ;;  %v3729_v47 = vpop.eup %3728  ;;  %v1997_v25 = vmul.f32 0.5, %v1965_v58  ;;  %v1976_v7 = vadd.f32 1.0, %v3719_v24  ;;  %3742 = vtanh.f32 %v1923_v28 }
 0x31c   : > { %v2002_v39 = vmul.f32 0.5, %v1970_v63  ;;  %v1977_v1 = vadd.f32 1.0, %v3721_v56  ;;  %v1862_v34 = vadd.f32 %v1830_v45, %v4889_v14  ;;  %v1863_v53 = vadd.f32 %v1831_v55, %v4895_v9 }
 0x31d   : > { %v3731_v8 = vpop.eup %3730  ;;  %v2099_v31 = vsel %vm550_vm0, %v5053_v46, 0.0  ;;  %v1978_v36 = vadd.f32 1.0, %v3723_v4  ;;  %v1902_v10 = vmul.f32 0.7978846, %v1870_v13  ;;  %3744 = vtanh.f32 %v1916_v30 }
 0x31e   : > { %2100 = vadd.xlane.f32.xlu0 %v2099_v31  ;;  %v1964_v27 = vadd.f32 1.0, %v3731_v8  ;;  %v3733_v21 = vpop.eup %3732  ;;  %v5063_v2 = vmul.f32 %v2002_v39, %v4865_v49  ;;  %v1979_v24 = vadd.f32 1.0, %v3729_v47  ;;  %v1903_v57 = vmul.f32 0.7978846, %v1871_v60 }
 0x31f   : > { %v3735_v6 = vpop.eup %3734  ;;  %3746 = vtanh.f32 %v1917_v32  ;;  %v2008_v58 = vmul.f32 0.5, %v1976_v7  ;;  %v2093_v20 = vsel %vm550_vm0, %v5056_v43, 0.0  ;;  %v5070_v4 = vmul.f32 %v1997_v25, %v4815_v16 }
 0x320   : > { %v1996_v11 = vmul.f32 0.5, %v1964_v27  ;;  %v2090_v56 = vsel %vm550_vm0, %v5063_v2, 0.0  ;;  %v2009_v28 = vmul.f32 0.5, %v1977_v1  ;;  %v2010_v15 = vmul.f32 0.5, %v1978_v36 }
 0x321   : > { %2091 = vadd.xlane.f32.xlu1 %v2090_v56  ;;  %v1984_v45 = vadd.f32 1.0, %v3733_v21  ;;  %3748 = vtanh.f32 %v1902_v10  ;;  %v2011_v13 = vmul.f32 0.5, %v1979_v24  ;;  %v1985_v60 = vadd.f32 1.0, %v3735_v6 }
 0x322   : > { %2094 = vadd.xlane.f32.xlu0 %v2093_v20  ;;  %v5073_v49 = vmul.f32 %v1996_v11, %v4826_v3  ;;  %v3737_v55 = vpop.eup %3736  ;;  %v1894_v32 = vmul.f32 0.7978846, %v1862_v34  ;;  %v1895_v63 = vmul.f32 0.7978846, %v1863_v53  ;;  %3750 = vtanh.f32 %v1903_v57 }
 0x323   : > { %v3739_v30 = vpop.eup %3738  ;;  %v2075_v47 = vsel %vm550_vm0, %v5070_v4, 0.0  ;;  %v5080_v25 = vmul.f32 %v2008_v58, %v4858_v42  ;;  %v5083_v3 = vmul.f32 %v2009_v28, %v4862_v22  ;;  %v5086_v7 = vmul.f32 %v2010_v15, %v4877_v52 }
 0x324   : > { %v2072_v16 = vsel %vm550_vm0, %v5073_v49, 0.0  ;;  %v2016_v8 = vmul.f32 0.5, %v1984_v45  ;;  %v5089_v31 = vmul.f32 %v2011_v13, %v4921_v37  ;;  %v2017_v39 = vmul.f32 0.5, %v1985_v60 }
 0x325   : > { %2073 = vadd.xlane.f32.xlu1 %v2072_v16  ;;  %v1988_v1 = vadd.f32 1.0, %v3737_v55  ;;  %v1989_v34 = vadd.f32 1.0, %v3739_v30  ;;  %3752 = vtanh.f32 %v1894_v32  ;;  %v2108_v42 = vsel %vm550_vm0, %v5080_v25, 0.0 }
 0x326   : > { %2076 = vadd.xlane.f32.xlu0 %v2075_v47  ;;  %3754 = vtanh.f32 %v1895_v63  ;;  %v2111_v22 = vsel %vm550_vm0, %v5083_v3, 0.0  ;;  %v2114_v52 = vsel %vm550_vm0, %v5086_v7, 0.0  ;;  %v5098_v37 = vmul.f32 %v2016_v8, %v4929_v17 }
 0x327   : > { %v3741_v53 = vpop.eup %3740  ;;  %v2117_v36 = vsel %vm550_vm0, %v5089_v31, 0.0  ;;  %v5103_v21 = vmul.f32 %v2017_v39, %v4944_v51  ;;  %v2020_v10 = vmul.f32 0.5, %v1988_v1  ;;  %v2021_v24 = vmul.f32 0.5, %v1989_v34 }
 0x328   : > { %v3743_v27 = vpop.eup %3742  ;;  %v1986_v11 = vadd.f32 1.0, %v3741_v53  ;;  %v2132_v56 = vsel %vm550_vm0, %v5098_v37, 0.0 }
 0x329   : > { %2109 = vadd.xlane.f32.xlu1 %v2108_v42  ;;  %v1987_v58 = vadd.f32 1.0, %v3743_v27  ;;  %v2135_v17 = vsel %vm550_vm0, %v5103_v21, 0.0  ;;  %v5110_v20 = vmul.f32 %v2020_v10, %v4962_v54  ;;  %v5113_v51 = vmul.f32 %v2021_v24, %v4991_v40 }
 0x32a   : > { %2112 = vadd.xlane.f32.xlu0 %v2111_v22  ;;  %v3745_v6 = vpop.eup %3744  ;;  %v2018_v13 = vmul.f32 0.5, %v1986_v11 }
 0x32b   : > { %v1980_v15 = vadd.f32 1.0, %v3745_v6  ;;  %v2019_v60 = vmul.f32 0.5, %v1987_v58  ;;  %v2144_v30 = vsel %vm550_vm0, %v5110_v20, 0.0  ;;  %v2147_v32 = vsel %vm550_vm0, %v5113_v51, 0.0 }
 0x32c   : > { %v3747_v57 = vpop.eup %3746  ;;  %v5120_v8 = vmul.f32 %v2018_v13, %v4981_v35 }
 0x32d   : > { %2115 = vadd.xlane.f32.xlu1 %v2114_v52  ;;  %v1981_v45 = vadd.f32 1.0, %v3747_v57  ;;  %v2012_v63 = vmul.f32 0.5, %v1980_v15  ;;  %v5123_v39 = vmul.f32 %v2019_v60, %v5006_v61  ;;  %v5169_v15 = vadd.f32 %v4791_v38, %v4801_v0 }
 0x32e   : > { %2118 = vadd.xlane.f32.xlu0 %v2117_v36  ;;  %v3749_v28 = vpop.eup %3748  ;;  %v2138_v27 = vsel %vm550_vm0, %v5120_v8, 0.0 }
 0x32f   : > { %v3751_v55 = vpop.eup %3750  ;;  %v2013_v54 = vmul.f32 0.5, %v1981_v45  ;;  %v1966_v16 = vadd.f32 1.0, %v3749_v28  ;;  %v5126_v34 = vmul.f32 %v2012_v63, %v4956_v19  ;;  %v2141_v35 = vsel %vm550_vm0, %v5123_v39, 0.0 }
 0x330   : > { %v1967_v47 = vadd.f32 1.0, %v3751_v55  ;;  %v5175_v55 = vadd.f32 %v4791_v38, %v4806_v41  ;;  %v1782_v0 = vmul.f32 %v5169_v15, %v5169_v15 }
 0x331   : > { %2133 = vadd.xlane.f32.xlu1 %v2132_v56  ;;  %v5129_v53 = vmul.f32 %v2013_v54, %v4985_v18  ;;  %v1998_v42 = vmul.f32 0.5, %v1966_v16  ;;  %v2120_v36 = vsel %vm550_vm0, %v5126_v34, 0.0 }
 0x332   : > { %2136 = vadd.xlane.f32.xlu0 %v2135_v17  ;;  %v3753_v40 = vpop.eup %3752  ;;  %v1999_v22 = vmul.f32 0.5, %v1967_v47  ;;  %v5161_v17 = vadd.f32 %v4791_v38, %v4869_v26  ;;  %v1814_v16 = vmul.f32 %v1782_v0, %v5169_v15 }
 0x333   : > { %v3755_v1 = vpop.eup %3754  ;;  %v1958_v52 = vadd.f32 1.0, %v3753_v40  ;;  %v2123_v19 = vsel %vm550_vm0, %v5129_v53, 0.0  ;;  %v5140_v18 = vmul.f32 %v1998_v42, %v4873_v50 }
 0x334   : > { %v1959_v61 = vadd.f32 1.0, %v3755_v1  ;;  %v5143_v10 = vmul.f32 %v1999_v22, %v4916_v44  ;;  %v1790_v45 = vmul.f32 %v5161_v17, %v5161_v17 }
 0x335   : > { %2145 = vadd.xlane.f32.xlu1 %v2144_v30  ;;  %v1990_v24 = vmul.f32 0.5, %v1958_v52  ;;  %v2078_v57 = vsel %vm550_vm0, %v5140_v18, 0.0 }
 0x336   : > { %2148 = vadd.xlane.f32.xlu0 %v2147_v32  ;;  %v1991_v6 = vmul.f32 0.5, %v1959_v61  ;;  %v2081_v11 = vsel %vm550_vm0, %v5143_v10, 0.0  ;;  %v1822_v32 = vmul.f32 %v1790_v45, %v5161_v17 }
 0x337   : > { %v5150_v58 = vmul.f32 %v1990_v24, %v4889_v14  ;;  %v5165_v14 = vadd.f32 %v4791_v38, %v4923_v12  ;;  %v1783_v38 = vmul.f32 %v5175_v55, %v5175_v55 }
 0x338   : > { %v5153_v56 = vmul.f32 %v1991_v6, %v4895_v9  ;;  %v1854_v47 = vmul.f32 0.044715, %v1822_v32 }
 0x339   : > { %2139 = vadd.xlane.f32.xlu1 %v2138_v27  ;;  %v2054_v50 = vsel %vm550_vm0, %v5150_v58, 0.0  ;;  %v1791_v26 = vmul.f32 %v5165_v14, %v5165_v14  ;;  %v1815_v1 = vmul.f32 %v1783_v38, %v5175_v55 }
 0x33a   : > { %2142 = vadd.xlane.f32.xlu0 %v2141_v35  ;;  %v2057_v44 = vsel %vm550_vm0, %v5153_v56, 0.0  ;;  %v1846_v35 = vmul.f32 0.044715, %v1814_v16  ;;  %v1886_v52 = vadd.f32 %v1854_v47, %v5161_v17 }
 0x33b   : > { %v1823_v41 = vmul.f32 %v1791_v26, %v5165_v14  ;;  %v1847_v61 = vmul.f32 0.044715, %v1815_v1 }
 0x33d   : > { %2121 = vadd.xlane.f32.xlu1 %v2120_v36  ;;  %v1855_v42 = vmul.f32 0.044715, %v1823_v41 }
 0x33e   : > { %2124 = vadd.xlane.f32.xlu0 %v2123_v19 }
 0x33f   : > { %v1887_v36 = vadd.f32 %v1855_v42, %v5165_v14 }
 0x341   : > { %2079 = vadd.xlane.f32.xlu1 %v2078_v57 }
 0x342   : > { %2082 = vadd.xlane.f32.xlu0 %v2081_v11  ;;  %v1878_v11 = vadd.f32 %v1846_v35, %v5169_v15 }
 0x345   : > { %2055 = vadd.xlane.f32.xlu1 %v2054_v50  ;;  %v1918_v50 = vmul.f32 0.7978846, %v1886_v52 }
 0x346   : > { %2058 = vadd.xlane.f32.xlu0 %v2057_v44 }
 0x347   : > { %3756 = vtanh.f32 %v1918_v50 }
 0x387   : > { %v2062_v9 = vpop.xlane.xlu1 %2061 }
 0x388   : > { %v2152_v28 = vmul.f32 0.03125, %v2062_v9  ;;  %v2065_v12 = vpop.xlane.xlu0 %2064  ;;  %v1879_v9 = vadd.f32 %v1847_v61, %v5175_v55 }
 0x389   : > { %v2153_v60 = vmul.f32 0.03125, %v2065_v12 }
 0x38a   : > { %v5180_v13 = vsub.f32 %v4932_v29, %v2152_v28  ;;  %v1919_v28 = vmul.f32 0.7978846, %v1887_v36  ;;  %v1911_v0 = vmul.f32 0.7978846, %v1879_v9 }
 0x38b   : > { %v5191_v63 = vsub.f32 %v4952_v59, %v2153_v60  ;;  %v1910_v60 = vmul.f32 0.7978846, %v1878_v11 }
 0x38c   : > { %v2216_v30 = vmul.f32 %v5180_v13, %v5180_v13  ;;  %3758 = vtanh.f32 %v1919_v28 }
 0x38d   : > { %v2217_v54 = vmul.f32 %v5191_v63, %v5191_v63  ;;  %3760 = vtanh.f32 %v1910_v60 }
 0x38e   : > { %v2252_v29 = vsel %vm550_vm0, %v2216_v30, 0.0  ;;  %3762 = vtanh.f32 %v1911_v0 }
 0x38f   : > { %2253 = vadd.xlane.f32.xlu1 %v2252_v29  ;;  %v2255_v27 = vsel %vm550_vm0, %v2217_v54, 0.0 }
 0x390   : > { %2256 = vadd.xlane.f32.xlu0 %v2255_v27  ;;  %v3757_v27 = vpop.eup %3756 }
 0x392   : > { %v2068_v40 = vpop.xlane.xlu1 %2067 }
 0x393   : > { %v2154_v22 = vmul.f32 0.03125, %v2068_v40 }
 0x395   : > { %v5200_v59 = vsub.f32 %v4978_v48, %v2154_v22 }
 0x396   : > { %v2071_v19 = vpop.xlane.xlu0 %2070 }
 0x397   : > { %v2218_v24 = vmul.f32 %v5200_v59, %v5200_v59  ;;  %v2155_v6 = vmul.f32 0.03125, %v2071_v19  ;;  %v2086_v48 = vpop.xlane.xlu1 %2085 }
 0x398   : > { %v2160_v45 = vmul.f32 0.03125, %v2086_v48 }
 0x399   : > { %v2258_v57 = vsel %vm550_vm0, %v2218_v24, 0.0  ;;  %v5209_v44 = vsub.f32 %v5001_v62, %v2155_v6  ;;  %v3759_v35 = vpop.eup %3758 }
 0x39a   : > { %2259 = vadd.xlane.f32.xlu1 %v2258_v57  ;;  %v5215_v12 = vsub.f32 %v5012_v33, %v2160_v45  ;;  %v3761_v6 = vpop.eup %3760  ;;  %v1982_v57 = vadd.f32 1.0, %v3757_v27  ;;  %v1983_v11 = vadd.f32 1.0, %v3759_v35 }
 0x39b   : > { %v2219_v26 = vmul.f32 %v5209_v44, %v5209_v44  ;;  %v3763_v50 = vpop.eup %3762 }
 0x39c   : > { %v2224_v62 = vmul.f32 %v5215_v12, %v5215_v12 }
 0x39d   : > { %v2261_v30 = vsel %vm550_vm0, %v2219_v26, 0.0 }
 0x39e   : > { %2262 = vadd.xlane.f32.xlu0 %v2261_v30  ;;  %v2276_v38 = vsel %vm550_vm0, %v2224_v62, 0.0  ;;  %v2014_v62 = vmul.f32 0.5, %v1982_v57 }
 0x39f   : > { %v2089_v32 = vpop.xlane.xlu0 %2088  ;;  %2277 = vadd.xlane.f32.xlu1 %v2276_v38  ;;  %v1975_v38 = vadd.f32 1.0, %v3763_v50 }
 0x3a0   : > { %v2161_v41 = vmul.f32 0.03125, %v2089_v32  ;;  %v2015_v32 = vmul.f32 0.5, %v1983_v11 }
 0x3a1   : > { %v2007_v27 = vmul.f32 0.5, %v1975_v38 }
 0x3a2   : > { %v5222_v33 = vsub.f32 %v5034_v5, %v2161_v41  ;;  %v2098_v29 = vpop.xlane.xlu1 %2097 }
 0x3a3   : > { %v2164_v54 = vmul.f32 0.03125, %v2098_v29  ;;  %v5276_v57 = vmul.f32 %v2007_v27, %v5175_v55 }
 0x3a4   : > { %v2225_v16 = vmul.f32 %v5222_v33, %v5222_v33 }
 0x3a5   : > { %v5227_v47 = vsub.f32 %v5043_v23, %v2164_v54 }
 0x3a6   : > { %v2279_v40 = vsel %vm550_vm0, %v2225_v16, 0.0 }
 0x3a7   : > { %v2101_v1 = vpop.xlane.xlu0 %2100  ;;  %2280 = vadd.xlane.f32.xlu0 %v2279_v40  ;;  %v2228_v42 = vmul.f32 %v5227_v47, %v5227_v47 }
 0x3a8   : > { %v2165_v22 = vmul.f32 0.03125, %v2101_v1 }
 0x3a9   : > { %v2288_v5 = vsel %vm550_vm0, %v2228_v42, 0.0 }
 0x3aa   : > { %v5234_v52 = vsub.f32 %v5053_v46, %v2165_v22  ;;  %2289 = vadd.xlane.f32.xlu1 %v2288_v5  ;;  %v2092_v61 = vpop.xlane.xlu1 %2091 }
 0x3ab   : > { %v2095_v36 = vpop.xlane.xlu0 %2094  ;;  %v2162_v23 = vmul.f32 0.03125, %v2092_v61 }
 0x3ac   : > { %v2163_v19 = vmul.f32 0.03125, %v2095_v36  ;;  %v2229_v24 = vmul.f32 %v5234_v52, %v5234_v52  ;;  %v5267_v36 = vmul.f32 %v2015_v32, %v5165_v14 }
 0x3ad   : > { %v5239_v48 = vsub.f32 %v5063_v2, %v2162_v23  ;;  %v1974_v2 = vadd.f32 1.0, %v3761_v6 }
 0x3ae   : > { %v5242_v9 = vsub.f32 %v5056_v43, %v2163_v19  ;;  %v2291_v46 = vsel %vm550_vm0, %v2229_v24, 0.0  ;;  %v2074_v28 = vpop.xlane.xlu1 %2073 }
 0x3af   : > { %2292 = vadd.xlane.f32.xlu0 %v2291_v46  ;;  %v2077_v45 = vpop.xlane.xlu0 %2076  ;;  %v2156_v26 = vmul.f32 0.03125, %v2074_v28  ;;  %v2226_v30 = vmul.f32 %v5239_v48, %v5239_v48  ;;  %v2129_v46 = vsel %vm550_vm0, %v5267_v36, 0.0 }
 0x3b0   : > { %v2157_v60 = vmul.f32 0.03125, %v2077_v45  ;;  %v2227_v0 = vmul.f32 %v5242_v9, %v5242_v9 }
 0x3b1   : > { %v5250_v43 = vsub.f32 %v5073_v49, %v2156_v26  ;;  %v2282_v29 = vsel %vm550_vm0, %v2226_v30, 0.0  ;;  %v5262_v49 = vmul.f32 %v2014_v62, %v5161_v17 }
 0x3b2   : > { %v5253_v41 = vsub.f32 %v5070_v4, %v2157_v60  ;;  %v2285_v54 = vsel %vm550_vm0, %v2227_v0, 0.0  ;;  %2283 = vadd.xlane.f32.xlu1 %v2282_v29  ;;  %v2110_v16 = vpop.xlane.xlu1 %2109  ;;  %v2006_v4 = vmul.f32 0.5, %v1974_v2 }
 0x3b3   : > { %2286 = vadd.xlane.f32.xlu0 %v2285_v54  ;;  %v2113_v40 = vpop.xlane.xlu0 %2112  ;;  %v2220_v1 = vmul.f32 %v5250_v43, %v5250_v43  ;;  %v2168_v22 = vmul.f32 0.03125, %v2110_v16  ;;  %v2126_v14 = vsel %vm550_vm0, %v5262_v49, 0.0 }
 0x3b4   : > { %v2221_v42 = vmul.f32 %v5253_v41, %v5253_v41  ;;  %v2169_v5 = vmul.f32 0.03125, %v2113_v40  ;;  %v5273_v17 = vmul.f32 %v2006_v4, %v5169_v15 }
 0x3b5   : > { %v2264_v35 = vsel %vm550_vm0, %v2220_v1, 0.0  ;;  %v5270_v24 = vsub.f32 %v5080_v25, %v2168_v22 }
 0x3b6   : > { %v2267_v61 = vsel %vm550_vm0, %v2221_v42, 0.0  ;;  %2265 = vadd.xlane.f32.xlu1 %v2264_v35  ;;  %v2116_v23 = vpop.xlane.xlu1 %2115  ;;  %v5279_v11 = vsub.f32 %v5083_v3, %v2169_v5  ;;  %v2102_v55 = vsel %vm550_vm0, %v5273_v17, 0.0  ;;  %v2105_v3 = vsel %vm550_vm0, %v5276_v57, 0.0 }
 0x3b7   : > { %2268 = vadd.xlane.f32.xlu0 %v2267_v61  ;;  %v2119_v19 = vpop.xlane.xlu0 %2118  ;;  %v2170_v6 = vmul.f32 0.03125, %v2116_v23  ;;  %v2232_v45 = vmul.f32 %v5270_v24, %v5270_v24 }
 0x3b8   : > { %v2171_v50 = vmul.f32 0.03125, %v2119_v19  ;;  %v2233_v0 = vmul.f32 %v5279_v11, %v5279_v11 }
 0x3b9   : > { %v5286_v15 = vsub.f32 %v5086_v7, %v2170_v6  ;;  %v2300_v38 = vsel %vm550_vm0, %v2232_v45, 0.0 }
 0x3ba   : > { %2127 = vadd.xlane.f32.xlu1 %v2126_v14  ;;  %v2134_v25 = vpop.xlane.xlu1 %2133  ;;  %v5295_v26 = vsub.f32 %v5089_v31, %v2171_v50  ;;  %v2303_v16 = vsel %vm550_vm0, %v2233_v0, 0.0 }
 0x3bb   : > { %2130 = vadd.xlane.f32.xlu0 %v2129_v46  ;;  %v2137_v28 = vpop.xlane.xlu0 %2136  ;;  %v2176_v60 = vmul.f32 0.03125, %v2134_v25  ;;  %v2234_v29 = vmul.f32 %v5286_v15, %v5286_v15 }
 0x3bc   : > { %v2177_v30 = vmul.f32 0.03125, %v2137_v28  ;;  %v2235_v40 = vmul.f32 %v5295_v26, %v5295_v26 }
 0x3bd   : > { %v5303_v54 = vsub.f32 %v5098_v37, %v2176_v60 }
 0x3be   : > { %2103 = vadd.xlane.f32.xlu1 %v2102_v55  ;;  %v2146_v7 = vpop.xlane.xlu1 %2145  ;;  %v5306_v31 = vsub.f32 %v5103_v21, %v2177_v30  ;;  %v2306_v21 = vsel %vm550_vm0, %v2234_v29, 0.0  ;;  %v2309_v5 = vsel %vm550_vm0, %v2235_v40, 0.0 }
 0x3bf   : > { %2106 = vadd.xlane.f32.xlu0 %v2105_v3  ;;  %v2149_v62 = vpop.xlane.xlu0 %2148  ;;  %v2180_v32 = vmul.f32 0.03125, %v2146_v7  ;;  %v2240_v35 = vmul.f32 %v5303_v54, %v5303_v54 }
 0x3c0   : > { %v2181_v2 = vmul.f32 0.03125, %v2149_v62  ;;  %v2241_v23 = vmul.f32 %v5306_v31, %v5306_v31 }
 0x3c1   : > { %v5312_v22 = vsub.f32 %v5110_v20, %v2180_v32 }
 0x3c2   : > { %2301 = vadd.xlane.f32.xlu1 %v2300_v38  ;;  %v2140_v1 = vpop.xlane.xlu1 %2139  ;;  %v5315_v4 = vsub.f32 %v5113_v51, %v2181_v2  ;;  %v2327_v25 = vsel %vm550_vm0, %v2241_v23, 0.0 }
 0x3c3   : > { %2304 = vadd.xlane.f32.xlu0 %v2303_v16  ;;  %v2143_v42 = vpop.xlane.xlu0 %2142  ;;  %v2178_v37 = vmul.f32 0.03125, %v2140_v1  ;;  %v2244_v6 = vmul.f32 %v5312_v22, %v5312_v22 }
 0x3c4   : > { %v2179_v27 = vmul.f32 0.03125, %v2143_v42  ;;  %v2245_v50 = vmul.f32 %v5315_v4, %v5315_v4 }
 0x3c5   : > { %v5322_v61 = vsub.f32 %v5120_v8, %v2178_v37  ;;  %v2324_v8 = vsel %vm550_vm0, %v2240_v35, 0.0  ;;  %v2336_v30 = vsel %vm550_vm0, %v2244_v6, 0.0 }
 0x3c6   : > { %2307 = vadd.xlane.f32.xlu1 %v2306_v21  ;;  %v5327_v20 = vsub.f32 %v5123_v39, %v2179_v27  ;;  %v2122_v51 = vpop.xlane.xlu1 %2121  ;;  %v2339_v0 = vsel %vm550_vm0, %v2245_v50, 0.0 }
 0x3c7   : > { %2310 = vadd.xlane.f32.xlu0 %v2309_v5  ;;  %v2125_v19 = vpop.xlane.xlu0 %2124  ;;  %v2172_v14 = vmul.f32 0.03125, %v2122_v51  ;;  %v2242_v28 = vmul.f32 %v5322_v61, %v5322_v61 }
 0x3c8   : > { %v2173_v46 = vmul.f32 0.03125, %v2125_v19  ;;  %v2243_v45 = vmul.f32 %v5327_v20, %v5327_v20 }
 0x3c9   : > { %v5338_v39 = vsub.f32 %v5126_v34, %v2172_v14  ;;  %v2330_v32 = vsel %vm550_vm0, %v2242_v28, 0.0 }
 0x3ca   : > { %2325 = vadd.xlane.f32.xlu1 %v2324_v8  ;;  %v5341_v55 = vsub.f32 %v5129_v53, %v2173_v46  ;;  %v2080_v3 = vpop.xlane.xlu1 %2079  ;;  %v2333_v34 = vsel %vm550_vm0, %v2243_v45, 0.0 }
 0x3cb   : > { %2328 = vadd.xlane.f32.xlu0 %v2327_v25  ;;  %v2083_v60 = vpop.xlane.xlu0 %2082  ;;  %v2158_v7 = vmul.f32 0.03125, %v2080_v3  ;;  %v2236_v53 = vmul.f32 %v5338_v39, %v5338_v39 }
 0x3cc   : > { %v2159_v62 = vmul.f32 0.03125, %v2083_v60  ;;  %v2237_v38 = vmul.f32 %v5341_v55, %v5341_v55 }
 0x3cd   : > { %v5354_v16 = vsub.f32 %v5140_v18, %v2158_v7  ;;  %v2312_v37 = vsel %vm550_vm0, %v2236_v53, 0.0 }
 0x3ce   : > { %2337 = vadd.xlane.f32.xlu1 %v2336_v30  ;;  %v2056_v2 = vpop.xlane.xlu1 %2055  ;;  %v5357_v40 = vsub.f32 %v5143_v10, %v2159_v62  ;;  %v2315_v27 = vsel %vm550_vm0, %v2237_v38, 0.0 }
 0x3cf   : > { %2340 = vadd.xlane.f32.xlu0 %v2339_v0  ;;  %v2059_v29 = vpop.xlane.xlu0 %2058  ;;  %v2150_v1 = vmul.f32 0.03125, %v2056_v2  ;;  %v2222_v18 = vmul.f32 %v5354_v16, %v5354_v16 }
 0x3d0   : > { %v2151_v42 = vmul.f32 0.03125, %v2059_v29  ;;  %v2223_v10 = vmul.f32 %v5357_v40, %v5357_v40 }
 0x3d1   : > { %v5362_v21 = vsub.f32 %v5150_v58, %v2150_v1  ;;  %v2270_v35 = vsel %vm550_vm0, %v2222_v18, 0.0 }
 0x3d2   : > { %2331 = vadd.xlane.f32.xlu1 %v2330_v32  ;;  %v5365_v5 = vsub.f32 %v5153_v56, %v2151_v42  ;;  %v2273_v23 = vsel %vm550_vm0, %v2223_v10, 0.0 }
 0x3d3   : > { %2334 = vadd.xlane.f32.xlu0 %v2333_v34  ;;  %v2214_v51 = vmul.f32 %v5362_v21, %v5362_v21 }
 0x3d4   : > { %v2215_v58 = vmul.f32 %v5365_v5, %v5365_v5 }
 0x3d5   : > { %v2246_v56 = vsel %vm550_vm0, %v2214_v51, 0.0 }
 0x3d6   : > { %2313 = vadd.xlane.f32.xlu1 %v2312_v37  ;;  %v2249_v19 = vsel %vm550_vm0, %v2215_v58, 0.0 }
 0x3d7   : > { %2316 = vadd.xlane.f32.xlu0 %v2315_v27 }
 0x3da   : > { %2271 = vadd.xlane.f32.xlu1 %v2270_v35 }
 0x3db   : > { %2274 = vadd.xlane.f32.xlu0 %v2273_v23 }
 0x3de   : > { %2247 = vadd.xlane.f32.xlu1 %v2246_v56 }
 0x3df   : > { %2250 = vadd.xlane.f32.xlu0 %v2249_v19 }
 0x418   : > { %v2254_v6 = vpop.xlane.xlu1 %2253 }
 0x419   : > { %v2257_v14 = vpop.xlane.xlu0 %2256  ;;  %v2344_v45 = vmul.f32 0.03125, %v2254_v6 }
 0x41a   : > { %v2345_v30 = vmul.f32 0.03125, %v2257_v14 }
 0x41b   : > { %v2376_v32 = vadd.f32 1e-05, %v2344_v45 }
 0x41c   : > { %v2377_v38 = vadd.f32 1e-05, %v2345_v30 }
 0x41d   : > { %3764 = vrsqrt.f32 %v2376_v32 }
 0x423   : > { %v2260_v50 = vpop.xlane.xlu1 %2259 }
 0x424   : > { %v2346_v62 = vmul.f32 0.03125, %v2260_v50 }
 0x426   : > { %v2378_v37 = vadd.f32 1e-05, %v2346_v62 }
 0x427   : > { %v2263_v46 = vpop.xlane.xlu0 %2262 }
 0x428   : > { %v2278_v8 = vpop.xlane.xlu1 %2277  ;;  %v2347_v60 = vmul.f32 0.03125, %v2263_v46 }
 0x429   : > { %v2352_v2 = vmul.f32 0.03125, %v2278_v8 }
 0x42a   : > { %v2379_v53 = vadd.f32 1e-05, %v2347_v60 }
 0x42b   : > { %v2384_v10 = vadd.f32 1e-05, %v2352_v2 }
 0x42c   : > { %3766 = vrsqrt.f32 %v2379_v53 }
 0x42d   : > { %3768 = vrsqrt.f32 %v2377_v38 }
 0x42e   : > { %3770 = vrsqrt.f32 %v2378_v37 }
 0x430   : > { %v2281_v25 = vpop.xlane.xlu0 %2280 }
 0x431   : > { %v2353_v34 = vmul.f32 0.03125, %v2281_v25 }
 0x433   : > { %v2290_v28 = vpop.xlane.xlu1 %2289  ;;  %v2385_v27 = vadd.f32 1e-05, %v2353_v34 }
 0x434   : > { %v2356_v6 = vmul.f32 0.03125, %v2290_v28 }
 0x435   : > { %3772 = vrsqrt.f32 %v2385_v27 }
 0x436   : > { %3774 = vrsqrt.f32 %v2384_v10  ;;  %v2388_v62 = vadd.f32 1e-05, %v2356_v6 }
 0x438   : > { %v2293_v3 = vpop.xlane.xlu0 %2292 }
 0x439   : > { %v2357_v29 = vmul.f32 0.03125, %v2293_v3 }
 0x43b   : > { %v2284_v0 = vpop.xlane.xlu1 %2283  ;;  %v2389_v35 = vadd.f32 1e-05, %v2357_v29 }
 0x43c   : > { %v2287_v7 = vpop.xlane.xlu0 %2286  ;;  %v2354_v23 = vmul.f32 0.03125, %v2284_v0 }
 0x43d   : > { %v2355_v18 = vmul.f32 0.03125, %v2287_v7  ;;  %3776 = vrsqrt.f32 %v2389_v35 }
 0x43e   : > { %v2386_v25 = vadd.f32 1e-05, %v2354_v23 }
 0x43f   : > { %v2266_v1 = vpop.xlane.xlu1 %2265  ;;  %v2387_v14 = vadd.f32 1e-05, %v2355_v18 }
 0x440   : > { %v2269_v42 = vpop.xlane.xlu0 %2268  ;;  %v2348_v3 = vmul.f32 0.03125, %v2266_v1 }
 0x441   : > { %v2349_v50 = vmul.f32 0.03125, %v2269_v42  ;;  %3778 = vrsqrt.f32 %v2387_v14 }
 0x442   : > { %3780 = vrsqrt.f32 %v2386_v25  ;;  %v2380_v2 = vadd.f32 1e-05, %v2348_v3 }
 0x443   : > { %v2128_v51 = vpop.xlane.xlu1 %2127  ;;  %3782 = vrsqrt.f32 %v2388_v62 }
 0x444   : > { %v2131_v58 = vpop.xlane.xlu0 %2130  ;;  %v2174_v56 = vmul.f32 0.03125, %v2128_v51 }
 0x445   : > { %v2175_v19 = vmul.f32 0.03125, %v2131_v58 }
 0x446   : > { %v5380_v46 = vsub.f32 %v5262_v49, %v2174_v56  ;;  %v2381_v49 = vadd.f32 1e-05, %v2349_v50 }
 0x447   : > { %v5383_v8 = vsub.f32 %v5267_v36, %v2175_v19  ;;  %v2104_v45 = vpop.xlane.xlu1 %2103 }
 0x448   : > { %v2107_v60 = vpop.xlane.xlu0 %2106  ;;  %v2166_v30 = vmul.f32 0.03125, %v2104_v45  ;;  %v2238_v7 = vmul.f32 %v5380_v46, %v5380_v46  ;;  %3784 = vrsqrt.f32 %v2381_v49 }
 0x449   : > { %v2167_v0 = vmul.f32 0.03125, %v2107_v60  ;;  %v2239_v28 = vmul.f32 %v5383_v8, %v5383_v8  ;;  %3786 = vrsqrt.f32 %v2380_v2  ;;  %v5408_v60 = vld [vmem:[%s6123_s7] ss:$0 sm:$0xff] }
 0x44a   : > { %v5390_v32 = vsub.f32 %v5273_v17, %v2166_v30  ;;  %v2318_v34 = vsel %vm550_vm0, %v2238_v7, 0.0 }
 0x44b   : > { %v5393_v36 = vsub.f32 %v5276_v57, %v2167_v0  ;;  %v2321_v53 = vsel %vm550_vm0, %v2239_v28, 0.0  ;;  %2319 = vadd.xlane.f32.xlu1 %v2318_v34  ;;  %v2302_v38 = vpop.xlane.xlu1 %2301  ;;  %v3765_v57 = vpop.eup %3764 }
 0x44c   : > { %2322 = vadd.xlane.f32.xlu0 %v2321_v53  ;;  %v2305_v29 = vpop.xlane.xlu0 %2304  ;;  %v2360_v1 = vmul.f32 0.03125, %v2302_v38  ;;  %v2230_v37 = vmul.f32 %v5390_v32, %v5390_v32  ;;  %v3767_v35 = vpop.eup %3766  ;;  %v2440_v50 = vmul.f32 %v3765_v57, %v5180_v13 }
 0x44d   : > { %v2361_v42 = vmul.f32 0.03125, %v2305_v29  ;;  %v2231_v17 = vmul.f32 %v5393_v36, %v5393_v36  ;;  %v3769_v58 = vpop.eup %3768  ;;  %v2443_v45 = vmul.f32 %v3767_v35, %v5209_v44 }
 0x44e   : > { %v2294_v18 = vsel %vm550_vm0, %v2230_v37, 0.0  ;;  %v2392_v56 = vadd.f32 1e-05, %v2360_v1  ;;  %v3771_v14 = vpop.eup %3770  ;;  %v2441_v62 = vmul.f32 %v3769_v58, %v5191_v63  ;;  %v2479_v44 = vmul.f32 %v5408_v60, %v2440_v50  ;;  %v5418_v63 = vld [vmem:[%s6124_s8] ss:$0 sm:$0xff] }
 0x44f   : > { %v2393_v27 = vadd.f32 1e-05, %v2361_v42  ;;  %v2297_v10 = vsel %vm550_vm0, %v2231_v17, 0.0  ;;  %2295 = vadd.xlane.f32.xlu1 %v2294_v18  ;;  %v2308_v23 = vpop.xlane.xlu1 %2307  ;;  %v3773_v25 = vpop.eup %3772  ;;  %v2442_v53 = vmul.f32 %v3771_v14, %v5200_v59  ;;  %v2482_v42 = vmul.f32 %v5408_v60, %v2443_v45 }
 0x450   : > { %2298 = vadd.xlane.f32.xlu0 %v2297_v10  ;;  %v2311_v51 = vpop.xlane.xlu0 %2310  ;;  %v2362_v19 = vmul.f32 0.03125, %v2308_v23  ;;  %v3775_v30 = vpop.eup %3774  ;;  %v2449_v2 = vmul.f32 %v3773_v25, %v5222_v33  ;;  %v2480_v33 = vmul.f32 %v5408_v60, %v2441_v62 }
 0x451   : > { %v2363_v6 = vmul.f32 0.03125, %v2311_v51  ;;  %3788 = vrsqrt.f32 %v2393_v27  ;;  %v3777_v49 = vpop.eup %3776  ;;  %v2448_v59 = vmul.f32 %v3775_v30, %v5215_v12  ;;  %v2481_v10 = vmul.f32 %v5408_v60, %v2442_v53 }
 0x452   : > { %v2394_v0 = vadd.f32 1e-05, %v2362_v19  ;;  %3790 = vrsqrt.f32 %v2392_v56  ;;  %v3779_v38 = vpop.eup %3778  ;;  %v2488_v35 = vmul.f32 %v5408_v60, %v2449_v2  ;;  %v2521_v56 = vadd.f32 %v5418_v63, %v2482_v42 }
 0x453   : > { %v2395_v3 = vadd.f32 1e-05, %v2363_v6  ;;  %v2326_v7 = vpop.xlane.xlu1 %2325  ;;  %v3781_v57 = vpop.eup %3780  ;;  %v2451_v23 = vmul.f32 %v3779_v38, %v5242_v9  ;;  %v2518_v19 = vadd.f32 %v5418_v63, %v2479_v44  ;;  %v2487_v25 = vmul.f32 %v5408_v60, %v2448_v59 }
 0x454   : > { %v2329_v28 = vpop.xlane.xlu0 %2328  ;;  %v2368_v34 = vmul.f32 0.03125, %v2326_v7  ;;  %v3783_v51 = vpop.eup %3782  ;;  %v2453_v45 = vmul.f32 %v3777_v49, %v5234_v52  ;;  %v2520_v9 = vadd.f32 %v5418_v63, %v2481_v10  ;;  %v2519_v7 = vadd.f32 %v5418_v63, %v2480_v33 }
 0x455   : > { %v2369_v13 = vmul.f32 0.03125, %v2329_v28  ;;  %3792 = vrsqrt.f32 %v2395_v3  ;;  %v3785_v12 = vpop.eup %3784  ;;  %v2450_v3 = vmul.f32 %v3781_v57, %v5239_v48  ;;  %v2527_v62 = vadd.f32 %v5418_v63, %v2488_v35 }
 0x456   : > { %v2400_v29 = vadd.f32 1e-05, %v2368_v34  ;;  %3794 = vrsqrt.f32 %v2394_v0  ;;  %v3787_v28 = vpop.eup %3786  ;;  %v2490_v34 = vmul.f32 %v5408_v60, %v2451_v23  ;;  %v2550_v44 = vpack.c.bf16 %v2521_v56, %v2520_v9 }
 0x457   : > { %v2401_v1 = vadd.f32 1e-05, %v2369_v13  ;;  %v2338_v37 = vpop.xlane.xlu1 %2337  ;;  %v2452_v13 = vmul.f32 %v3783_v51, %v5227_v47  ;;  %v2445_v48 = vmul.f32 %v3785_v12, %v5253_v41  ;;  %v2492_v42 = vmul.f32 %v5408_v60, %v2453_v45 }
 0x458   : > { %v2341_v17 = vpop.xlane.xlu0 %2340  ;;  %3796 = vrsqrt.f32 %v2400_v29  ;;  %v2372_v27 = vmul.f32 0.03125, %v2338_v37  ;;  %v2526_v29 = vadd.f32 %v5418_v63, %v2487_v25  ;;  %v2529_v33 = vadd.f32 %v5418_v63, %v2490_v34 }
 0x459   : > { %v2373_v18 = vmul.f32 0.03125, %v2341_v17  ;;  %3798 = vrsqrt.f32 %v2401_v1  ;;  %v2489_v1 = vmul.f32 %v5408_v60, %v2450_v3  ;;  %v2444_v17 = vmul.f32 %v3787_v28, %v5250_v43 }
 0x45a   : > { %v2404_v6 = vadd.f32 1e-05, %v2372_v27  ;;  %v2553_v41 = vpack.c.bf16 %v2527_v62, %v2526_v29  ;;  %v2491_v57 = vmul.f32 %v5408_v60, %v2452_v13  ;;  %v2484_v10 = vmul.f32 %v5408_v60, %v2445_v48 }
 0x45b   : > { %v2405_v58 = vadd.f32 1e-05, %v2373_v18  ;;  %v2332_v14 = vpop.xlane.xlu1 %2331  ;;  %v2528_v51 = vadd.f32 %v5418_v63, %v2489_v1  ;;  %v2531_v56 = vadd.f32 %v5418_v63, %v2492_v42  ;;  %v2483_v12 = vmul.f32 %v5408_v60, %v2444_v17 }
 0x45c   : > { %v2335_v50 = vpop.xlane.xlu0 %2334  ;;  %v2370_v30 = vmul.f32 0.03125, %v2332_v14 }
 0x45d   : > { %v2371_v0 = vmul.f32 0.03125, %v2335_v50  ;;  %3800 = vrsqrt.f32 %v2405_v58  ;;  %v2549_v58 = vpack.c.bf16 %v2519_v7, %v2518_v19  ;;  %v2554_v50 = vpack.c.bf16 %v2529_v33, %v2528_v51 }
 0x45e   : > { %v2402_v53 = vadd.f32 1e-05, %v2370_v30  ;;  %v3789_v52 = vpop.eup %3788  ;;  %3802 = vrsqrt.f32 %v2404_v6  ;;  %v2523_v19 = vadd.f32 %v5418_v63, %v2484_v10 }
 0x45f   : > { %v2403_v2 = vadd.f32 1e-05, %v2371_v0  ;;  %v2314_v49 = vpop.xlane.xlu1 %2313  ;;  %v3791_v59 = vpop.eup %3790  ;;  %v2457_v35 = vmul.f32 %v3789_v52, %v5279_v11  ;;  %v2530_v11 = vadd.f32 %v5418_v63, %v2491_v57 }
 0x460   : > { %v2317_v38 = vpop.xlane.xlu0 %2316  ;;  %3804 = vrsqrt.f32 %v2402_v53  ;;  %v2364_v37 = vmul.f32 0.03125, %v2314_v49  ;;  %2568 = vrot.lane.b32.xlu1 %v2550_v44, %s3998_s25  ;;  %v2456_v6 = vmul.f32 %v3791_v59, %v5270_v24  ;;  %v2522_v24 = vadd.f32 %v5418_v63, %v2483_v12 }
 0x461   : > { %v2365_v47 = vmul.f32 0.03125, %v2317_v38  ;;  %3806 = vrsqrt.f32 %v2403_v2  ;;  %v2496_v3 = vmul.f32 %v5408_v60, %v2457_v35  ;;  %v2555_v0 = vpack.c.bf16 %v2531_v56, %v2530_v11  ;;  %v2637_v11 = vld [vmem:[%s6126_s10 + $0x8] sm:$0xff] }
 0x462   : > { %v2396_v27 = vadd.f32 1e-05, %v2364_v37  ;;  %v3793_v23 = vpop.eup %3792  ;;  %v2495_v7 = vmul.f32 %v5408_v60, %v2456_v6  ;;  %v2551_v13 = vpack.c.bf16 %v2523_v19, %v2522_v24 }
 0x463   : > { %v2397_v18 = vadd.f32 1e-05, %v2365_v47  ;;  %v3795_v43 = vpop.eup %3794  ;;  %v2459_v30 = vmul.f32 %v3793_v23, %v5295_v26  ;;  %v2535_v26 = vadd.f32 %v5418_v63, %v2496_v3  ;;  %v2272_v19 = vpop.xlane.xlu1 %2271 }
 0x464   : > { %3808 = vrsqrt.f32 %v2396_v27  ;;  %2574 = vrot.lane.b32.xlu1 %v2553_v41, %s4000_s14  ;;  %v2458_v62 = vmul.f32 %v3795_v43, %v5286_v15  ;;  %v2534_v48 = vadd.f32 %v5418_v63, %v2495_v7  ;;  %v4001_v27 = vmov 0  }
 0x465   : > { %v3797_v14 = vpop.eup %3796  ;;  %3810 = vrsqrt.f32 %v2397_v18  ;;  %2689 = vmatprep.mubr.bf16.mxu0 %v4001_v27  ;;  %2732 = vmatprep.mubr.bf16.mxu1 %v4001_v27 }
 0x466   : > { %2565 = vrot.lane.b32.xlu0 %v2549_v58, %s4000_s14  ;;  %v3799_v25 = vpop.eup %3798  ;;  %v2464_v45 = vmul.f32 %v3797_v14, %v5303_v54  ;;  %v2497_v15 = vmul.f32 %v5408_v60, %v2458_v62  ;;  %v2557_v1 = vpack.c.bf16 %v2535_v26, %v2534_v48  ;;  %3628 = vset.pattern.permute.xlu1 %v4001_v27 }
 0x467   : > { %v2465_v9 = vmul.f32 %v3799_v25, %v5306_v31  ;;  %v2498_v31 = vmul.f32 %v5408_v60, %v2459_v30  ;;  %3627 = vset.pattern.permute.xlu0 %v4001_v27  ;;  %v2275_v25 = vpop.xlane.xlu0 %2274  ;;  %v2248_v30 = vpop.xlane.xlu1 %2247 }
 0x468   : > { %2577 = vrot.lane.b32.xlu1 %v2554_v50, %s3998_s25  ;;  %v2503_v28 = vmul.f32 %v5408_v60, %v2464_v45  ;;  %v2536_v59 = vadd.f32 %v5418_v63, %v2497_v15  ;;  %v2351_v45 = vmul.f32 0.03125, %v2275_v25  ;;  %v2342_v24 = vmul.f32 0.03125, %v2248_v30 }
 0x469   : > { %v2504_v34 = vmul.f32 %v5408_v60, %v2465_v9  ;;  %v2537_v42 = vadd.f32 %v5418_v63, %v2498_v31  ;;  %v2350_v9 = vmul.f32 0.03125, %v2272_v19 }
 0x46a   : > { %2580 = vrot.lane.b32.xlu0 %v2555_v0, %s3999_s27  ;;  %v3801_v54 = vpop.eup %3800  ;;  %v2542_v53 = vadd.f32 %v5418_v63, %v2503_v28  ;;  %v2383_v7 = vadd.f32 1e-05, %v2351_v45 }
 0x46b   : > { %v2543_v2 = vadd.f32 %v5418_v63, %v2504_v34  ;;  %v3803_v44 = vpop.eup %3802  ;;  %v2469_v38 = vmul.f32 %v3801_v54, %v5315_v4  ;;  %v2558_v18 = vpack.c.bf16 %v2537_v42, %v2536_v59  ;;  %v2251_v3 = vpop.xlane.xlu0 %2250  ;;  %v2382_v62 = vadd.f32 1e-05, %v2350_v9 }
 0x46c   : > { %2571 = vrot.lane.b32.xlu1 %v2551_v13, %s3999_s27  ;;  %v2468_v17 = vmul.f32 %v3803_v44, %v5312_v22  ;;  %v2343_v0 = vmul.f32 0.03125, %v2251_v3  ;;  %v2374_v34 = vadd.f32 1e-05, %v2342_v24  ;;  %3812 = vrsqrt.f32 %v2383_v7  ;;  %v3633_v3 = vld [vmem:[%s6125_s9] sm:$0xff]  }
 0x46d   : > { %v3805_v52 = vpop.eup %3804  ;;  %v2561_v49 = vpack.c.bf16 %v2543_v2, %v2542_v53  ;;  %v2508_v57 = vmul.f32 %v5408_v60, %v2469_v38 }
 0x46e   : > { %v3807_v29 = vpop.eup %3806  ;;  %v2466_v37 = vmul.f32 %v3805_v52, %v5322_v61  ;;  %v2507_v35 = vmul.f32 %v5408_v60, %v2468_v17  ;;  %v2375_v28 = vadd.f32 1e-05, %v2343_v0 }
 0x46f   : > { %2592 = vrot.lane.b32.xlu0 %v2561_v49, %s4000_s14  ;;  %v2467_v47 = vmul.f32 %v3807_v29, %v5327_v20  ;;  %v2547_v56 = vadd.f32 %v5418_v63, %v2508_v57 }
 0x470   : > { %2583 = vrot.lane.b32.xlu1 %v2557_v1, %s4000_s14  ;;  %v2505_v41 = vmul.f32 %v5408_v60, %v2466_v37  ;;  %3814 = vrsqrt.f32 %v2375_v28 }
 0x471   : > { %v3809_v33 = vpop.eup %3808  ;;  %v2506_v4 = vmul.f32 %v5408_v60, %v2467_v47  ;;  %3816 = vrsqrt.f32 %v2382_v62 }
 0x472   : > { %v3811_v61 = vpop.eup %3810  ;;  %v2460_v20 = vmul.f32 %v3809_v33, %v5338_v39  ;;  %v2544_v22 = vadd.f32 %v5418_v63, %v2505_v41  ;;  %v2546_v39 = vadd.f32 %v5418_v63, %v2507_v35  ;;  %3818 = vrsqrt.f32 %v2374_v34 }
 0x473   : > { %v2545_v10 = vadd.f32 %v5418_v63, %v2506_v4  ;;  %v2461_v23 = vmul.f32 %v3811_v61, %v5341_v55  ;;  %v2636_v55 = vld [vmem:[%s6126_s10] sm:$0xff] }
 0x474   : > { %2586 = vrot.lane.b32.xlu1 %v2558_v18, %s3998_s25  ;;  %v2499_v51 = vmul.f32 %v5408_v60, %v2460_v20  ;;  %v2563_v14 = vpack.c.bf16 %v2547_v56, %v2546_v39 }
 0x475   : > { %v2562_v58 = vpack.c.bf16 %v2545_v10, %v2544_v22  ;;  %v2500_v43 = vmul.f32 %v5408_v60, %v2461_v23 }
 0x476   : > { %v2538_v12 = vadd.f32 %v5418_v63, %v2499_v51 }
 0x477   : > { %2595 = vrot.lane.b32.xlu0 %v2562_v58, %s3998_s25  ;;  %v2539_v6 = vadd.f32 %v5418_v63, %v2500_v43 }
 0x479   : > { %v2559_v50 = vpack.c.bf16 %v2539_v6, %v2538_v12  ;;  %v3813_v54 = vpop.eup %3812 }
 0x47a   : > { %v2447_v15 = vmul.f32 %v3813_v54, %v5357_v40 }
 0x47b   : > { %2598 = vrot.lane.b32.xlu0 %v2563_v14, %s3999_s27  ;;  %2589 = vrot.lane.b32.xlu1 %v2559_v50, %s3999_s27 }
 0x47c   : > { %v2486_v59 = vmul.f32 %v5408_v60, %v2447_v15 }
 0x47d   : > { %v3815_v13 = vpop.eup %3814 }
 0x47e   : > { %v3817_v53 = vpop.eup %3816  ;;  %v2439_v38 = vmul.f32 %v3815_v13, %v5365_v5 }
 0x47f   : > { %2640 = vperm.xlu0 %3627, %v2636_v55   ;;  %2645 = vperm.xlu1 %3628, %v2637_v11   ;;  %v3819_v48 = vpop.eup %3818  ;;  %v2446_v42 = vmul.f32 %v3817_v53, %v5354_v16  ;;  %v2525_v16 = vadd.f32 %v5418_v63, %v2486_v59 }
 0x480   : > { %v2438_v17 = vmul.f32 %v3819_v48, %v5362_v21  ;;  %v2478_v40 = vmul.f32 %v5408_v60, %v2439_v38 }
 0x481   : > { %v2485_v5 = vmul.f32 %v5408_v60, %v2446_v42 }
 0x482   : > { %v2477_v27 = vmul.f32 %v5408_v60, %v2438_v17  ;;  %v2517_v61 = vadd.f32 %v5418_v63, %v2478_v40 }
 0x483   : > { %v2524_v21 = vadd.f32 %v5418_v63, %v2485_v5 }
 0x484   : > { %v2516_v22 = vadd.f32 %v5418_v63, %v2477_v27 }
 0x485   : > { %v2552_v10 = vpack.c.bf16 %v2525_v16, %v2524_v21 }
 0x486   : > { %v2548_v35 = vpack.c.bf16 %v2517_v61, %v2516_v22 }
 0x4d4   : > { %v2320_v26 = vpop.xlane.xlu1 %2319 }
 0x4d5   : > { %v2323_v31 = vpop.xlane.xlu0 %2322  ;;  %v2366_v2 = vmul.f32 0.03125, %v2320_v26 }
 0x4d6   : > { %v2367_v44 = vmul.f32 0.03125, %v2323_v31 }
 0x4d7   : > { %v2398_v52 = vadd.f32 1e-05, %v2366_v2 }
 0x4d8   : > { %v2399_v49 = vadd.f32 1e-05, %v2367_v44  ;;  %v2296_v29 = vpop.xlane.xlu1 %2295 }
 0x4d9   : > { %v2299_v1 = vpop.xlane.xlu0 %2298  ;;  %3820 = vrsqrt.f32 %v2398_v52  ;;  %v2358_v37 = vmul.f32 0.03125, %v2296_v29 }
 0x4da   : > { %v2359_v47 = vmul.f32 0.03125, %v2299_v1  ;;  %3822 = vrsqrt.f32 %v2399_v49  ;;  %v5544_v49 = vpop.f32.mrf.mxu0 }
 0x4db   : > { %v2390_v41 = vadd.f32 1e-05, %v2358_v37 }
 0x4dc   : > { %v2391_v33 = vadd.f32 1e-05, %v2359_v47  ;;  %v2569_v4 = vpop.permute.xlu1 %2568 }
 0x4dd   : > { %v2566_v57 = vpop.permute.xlu0 %2565  ;;  %3824 = vrsqrt.f32 %v2390_v41 }
 0x4de   : > { %3826 = vrsqrt.f32 %v2391_v33  ;;  %v2602_v58 = vsel %vm550_vm0, %v2548_v35, %v2566_v57  ;;  %v5563_v33 = vld [vmem:[%s6120_s4] ss:$0 sm:$0xff]  ;;  %v6167_v35 = vld [vmem:[#allocation14_spill] sm:$0xff] }
 0x4df   : > { %v2605_v55 = vsel %vm2603_vm2, %v2602_v58, %v2569_v4 }
 0x4e0   : > { %v2575_v18 = vpop.permute.xlu1 %2574 }
 0x4e1   : > { %v2581_v20 = vpop.permute.xlu0 %2580  ;;  %v2612_v23 = vsel %vm550_vm0, %v2552_v10, %v2575_v18 }
 0x4e4   : > { %v2578_v51 = vpop.permute.xlu1 %2577 }
 0x4e5   : > { %v2614_v56 = vsel %vm2603_vm2, %v2612_v23, %v2578_v51  ;;  %v2593_v43 = vpop.permute.xlu0 %2592  ;;  %v5590_v23 = vadd.f32 %v5563_v33, %v6167_v35 }
 0x4e6   : > { %v3821_v39 = vpop.eup %3820  ;;  %v2616_v12 = vsel %vm2606_vm1, %v2614_v56, %v2581_v20  ;;  %v6168_v56 = vld [vmem:[#allocation22_spill] sm:$0xff] }
 0x4e7   : > { %v3823_v6 = vpop.eup %3822  ;;  %2671 = vmatprep.subr.bf16.mxu0 %v2616_v12  ;;  %v2462_v14 = vmul.f32 %v3821_v39, %v5380_v46 }
 0x4e8   : > { %v2463_v50 = vmul.f32 %v3823_v6, %v5383_v8  ;;  %v2572_v11 = vpop.permute.xlu1 %2571  ;;  %v1494_v6 = vmul.f32 %v5590_v23, %v5590_v23 }
 0x4e9   : > { %v2501_v25 = vmul.f32 %v5408_v60, %v2462_v14  ;;  %v2608_v19 = vsel %vm2606_vm1, %v2605_v55, %v2572_v11  ;;  %v2596_v46 = vpop.permute.xlu0 %2595  ;;  %v6169_v14 = vld [vmem:[#allocation16_spill] sm:$0xff] }
 0x4ea   : > { %v3825_v45 = vpop.eup %3824  ;;  %v2502_v30 = vmul.f32 %v5408_v60, %v2463_v50  ;;  %2672 = vmatpush1.bf16.msra.mxu0 %v2608_v19  ;;  %v5601_v50 = vadd.f32 %v5563_v33, %v6169_v14  ;;  %v6170_v19 = vld [vmem:[#allocation24_spill] sm:$0xff] }
 0x4eb   : > { %v3827_v0 = vpop.eup %3826  ;;  %v2454_v8 = vmul.f32 %v3825_v45, %v5390_v32  ;;  %v2540_v24 = vadd.f32 %v5418_v63, %v2501_v25 }
 0x4ec   : > { %v2541_v9 = vadd.f32 %v5418_v63, %v2502_v30  ;;  %v2455_v7 = vmul.f32 %v3827_v0, %v5393_v36  ;;  %v2584_v28 = vpop.permute.xlu1 %2583  ;;  %v1526_v0 = vmul.f32 %v1494_v6, %v5590_v23 }
 0x4ed   : > { %v2493_v62 = vmul.f32 %v5408_v60, %v2454_v8  ;;  %3378 = vmatmul.mubr.msk.bf16.vlgmr.msra.gmra.mxu0 %vm2653_vm3, %v3633_v3  ;;  %v2599_v2 = vpop.permute.xlu0 %2598 }
 0x4ee   : > { %v2560_v34 = vpack.c.bf16 %v2541_v9, %v2540_v24  ;;  %v2494_v54 = vmul.f32 %v5408_v60, %v2455_v7 }
 0x4ef   : > { %v2532_v26 = vadd.f32 %v5418_v63, %v2493_v62 }
 0x4f0   : > { %v2628_v13 = vsel %vm550_vm0, %v2560_v34, %v2593_v43  ;;  %v2533_v32 = vadd.f32 %v5418_v63, %v2494_v54  ;;  %v2587_v31 = vpop.permute.xlu1 %2586  ;;  %v1167_v63 = vpop.f32.mrf.mxu0  ;;  %v5595_v43 = vadd.f32 %v5563_v33, %v6168_v56  ;;  %v1558_v34 = vmul.f32 0.044715, %v1526_v0 }
 0x4f1   : > { %v2630_v53 = vsel %vm2603_vm2, %v2628_v13, %v2596_v46  ;;  %v5569_v57 = vadd.f32 %v5563_v33, %v1167_v63  ;;  %v1495_v46 = vmul.f32 %v5601_v50, %v5601_v50 }
 0x4f2   : > { %v2556_v44 = vpack.c.bf16 %v2533_v32, %v2532_v26  ;;  %v2632_v36 = vsel %vm2606_vm1, %v2630_v53, %v2599_v2  ;;  %v5546_v38 = vpop.f32.mrf.mxu0  ;;  %v1502_v25 = vmul.f32 %v5595_v43, %v5595_v43 }
 0x4f3   : > { %2714 = vmatprep.subr.bf16.mxu1 %v2632_v36  ;;  %v1478_v61 = vmul.f32 %v5569_v57, %v5569_v57  ;;  %v1527_v54 = vmul.f32 %v1495_v46, %v5601_v50 }
 0x4f4   : > { %v2620_v48 = vsel %vm550_vm0, %v2556_v44, %v2584_v28  ;;  %v2590_v52 = vpop.permute.xlu1 %2589  ;;  %v1170_v29 = vpop.f32.mrf.mxu0  ;;  %v1534_v24 = vmul.f32 %v1502_v25, %v5595_v43 }
 0x4f5   : > { %v2622_v15 = vsel %vm2603_vm2, %v2620_v48, %v2587_v31  ;;  %v5572_v5 = vadd.f32 %v5563_v33, %v1170_v29  ;;  %v1510_v22 = vmul.f32 %v1478_v61, %v5569_v57  ;;  %v1590_v31 = vadd.f32 %v1558_v34, %v5590_v23 }
 0x4f6   : > { %v2624_v60 = vsel %vm2606_vm1, %v2622_v15, %v2590_v52  ;;  %v5548_v1 = vpop.f32.mrf.mxu0  ;;  %v1566_v26 = vmul.f32 0.044715, %v1534_v24  ;;  %v1559_v53 = vmul.f32 0.044715, %v1527_v54 }
 0x4f7   : > { %2715 = vmatpush1.bf16.msra.mxu1 %v2624_v60  ;;  %v1479_v21 = vmul.f32 %v5572_v5, %v5572_v5  ;;  %v1542_v39 = vmul.f32 0.044715, %v1510_v22  ;;  %v1622_v36 = vmul.f32 0.7978846, %v1590_v31 }
 0x4f8   : > { %v5550_v42 = vpop.f32.mrf.mxu0  ;;  %v1598_v2 = vadd.f32 %v1566_v26, %v5595_v43  ;;  %v1591_v48 = vadd.f32 %v1559_v53, %v5601_v50 }
 0x4f9   : > { %v1511_v10 = vmul.f32 %v1479_v21, %v5572_v5  ;;  %v1574_v45 = vadd.f32 %v1542_v39, %v5569_v57 }
 0x4fa   : > { %3379 = vmatmul.mubr.msk.bf16.vlgmr.msra.gmra.mxu1 %vm2653_vm3, %v3633_v3  ;;  %v5552_v37 = vpop.f32.mrf.mxu0  ;;  %v5608_v3 = vadd.f32 %v5563_v33, %v6170_v19  ;;  %v1630_v52 = vmul.f32 0.7978846, %v1598_v2  ;;  %v1623_v63 = vmul.f32 0.7978846, %v1591_v48  ;;  %v2641_v39 = vpop.permute.xlu0 %2640 }
 0x4fb   : > { %v1543_v12 = vmul.f32 0.044715, %v1511_v10  ;;  %v1606_v28 = vmul.f32 0.7978846, %v1574_v45  ;;  %v3635_v10 = vld [vmem:[%s6127_s11] sm:$0xff]   ;;  %v2646_v45 = vpop.permute.xlu1 %2645 }
 0x4fc   : > { %v5554_v47 = vpop.f32.mrf.mxu0  ;;  %v1503_v7 = vmul.f32 %v5608_v3, %v5608_v3 }
 0x4fd   : > { %v1575_v30 = vadd.f32 %v1543_v12, %v5572_v5 }
 0x4fe   : > { %v5556_v17 = vpop.f32.mrf.mxu0  ;;  %v1535_v32 = vmul.f32 %v1503_v7, %v5608_v3 }
 0x4ff   : > { %v1607_v62 = vmul.f32 0.7978846, %v1575_v30 }
 0x500   : > { %v1199_v59 = vpop.f32.mrf.mxu0  ;;  %v1567_v44 = vmul.f32 0.044715, %v1535_v32 }
 0x501   : > { %v5566_v40 = vadd.f32 %v5563_v33, %v1199_v59  ;;  %v3634_v59 = vld [vmem:[%s6127_s11 + $0x8] sm:$0xff]  }
 0x502   : > { %v5558_v41 = vpop.f32.mrf.mxu0  ;;  %v1599_v60 = vadd.f32 %v1567_v44, %v5608_v3  ;;  %3532 = vmatprep.subr.bf16.mxu0 %v3634_v59 }
 0x503   : > { %v1486_v16 = vmul.f32 %v5566_v40, %v5566_v40  ;;  %3533 = vmatpush3.bf16.msra.mxu0 %v3634_v59 }
 0x504   : > { %v1202_v4 = vpop.f32.mrf.mxu0  ;;  %3534 = vmatprep.subr.bf16.mxu0 %v3635_v10 }
 0x505   : > { %v5575_v27 = vadd.f32 %v5563_v33, %v1202_v4  ;;  %v1518_v20 = vmul.f32 %v1486_v16, %v5566_v40  ;;  %v1631_v16 = vmul.f32 0.7978846, %v1599_v60 }
 0x506   : > { %v5624_v15 = vpop.f32.mrf.mxu0 }
 0x507   : > { %v1487_v18 = vmul.f32 %v5575_v27, %v5575_v27  ;;  %v1550_v58 = vmul.f32 0.044715, %v1518_v20  ;;  %3535 = vmatpush3.bf16.msra.mxu0 %v3635_v10 }
 0x508   : > { %v5627_v29 = vpop.f32.mrf.mxu0 }
 0x509   : > { %v1519_v51 = vmul.f32 %v1487_v18, %v5575_v27  ;;  %v1582_v11 = vadd.f32 %v1550_v58, %v5566_v40 }
 0x50a   : > { %v5632_v18 = vpop.f32.mrf.mxu0 }
 0x50b   : > { %v1551_v55 = vmul.f32 0.044715, %v1519_v51  ;;  %v1614_v9 = vmul.f32 0.7978846, %v1582_v11 }
 0x50c   : > { %v5637_v56 = vpop.f32.mrf.mxu0 }
 0x50d   : > { %v1583_v8 = vadd.f32 %v1551_v55, %v5575_v27  ;;  %3828 = vtanh.f32 %v1614_v9 }
 0x50e   : > { %3830 = vtanh.f32 %v1606_v28 }
 0x50f   : > { %v1615_v13 = vmul.f32 0.7978846, %v1583_v8  ;;  %3832 = vtanh.f32 %v1607_v62 }
 0x511   : > { %3834 = vtanh.f32 %v1615_v13 }
 0x512   : > { %3836 = vtanh.f32 %v1622_v36 }
 0x513   : > { %3838 = vtanh.f32 %v1630_v52 }
 0x514   : > { %3840 = vtanh.f32 %v1623_v63 }
 0x515   : > { %3842 = vtanh.f32 %v1631_v16 }
 0x51a   : > { %v3829_v4 = vpop.eup %3828 }
 0x51b   : > { %v3831_v61 = vpop.eup %3830  ;;  %v1678_v22 = vadd.f32 1.0, %v3829_v4 }
 0x51c   : > { %v3833_v21 = vpop.eup %3832  ;;  %v1670_v35 = vadd.f32 1.0, %v3831_v61 }
 0x51d   : > { %v1671_v51 = vadd.f32 1.0, %v3833_v21  ;;  %v1710_v12 = vmul.f32 0.5, %v1678_v22 }
 0x51e   : > { %v3835_v20 = vpop.eup %3834  ;;  %v1702_v14 = vmul.f32 0.5, %v1670_v35 }
 0x51f   : > { %v1679_v58 = vadd.f32 1.0, %v3835_v20  ;;  %v1703_v55 = vmul.f32 0.5, %v1671_v51  ;;  %v3837_v30 = vpop.eup %3836  ;;  %v1742_v0 = vmul.f32 %v1710_v12, %v5566_v40 }
 0x520   : > { %v3839_v9 = vpop.eup %3838  ;;  %v1734_v24 = vmul.f32 %v1702_v14, %v5569_v57  ;;  %v1686_v34 = vadd.f32 1.0, %v3837_v30 }
 0x521   : > { %v1711_v25 = vmul.f32 0.5, %v1679_v58  ;;  %v1735_v7 = vmul.f32 %v1703_v55, %v5572_v5  ;;  %v3841_v26 = vpop.eup %3840  ;;  %v1694_v53 = vadd.f32 1.0, %v3839_v9  ;;  %v5696_v55 = vadd.f32 %v5546_v38, %v5563_v33 }
 0x522   : > { %v3843_v2 = vpop.eup %3842  ;;  %v1718_v44 = vmul.f32 0.5, %v1686_v34  ;;  %v1687_v36 = vadd.f32 1.0, %v3841_v26  ;;  %v5716_v38 = vadd.f32 %v5552_v37, %v5563_v33  ;;  %v5734_v9 = vadd.f32 %v5556_v17, %v5563_v33  ;;  %v6172_v26 = vld [vmem:[#allocation15_spill] sm:$0xff] }
 0x523   : > { %v1743_v54 = vmul.f32 %v1711_v25, %v5575_v27  ;;  %v1726_v48 = vmul.f32 0.5, %v1694_v53  ;;  %v1695_v52 = vadd.f32 1.0, %v3843_v2  ;;  %v5702_v25 = vadd.f32 %v5563_v33, %v5550_v42 }
 0x524   : > { %v1750_v63 = vmul.f32 %v1718_v44, %v5590_v23  ;;  %v1719_v59 = vmul.f32 0.5, %v1687_v36  ;;  %v1485_v37 = vmul.f32 %v5716_v38, %v5716_v38 }
 0x525   : > { %v1758_v61 = vmul.f32 %v1726_v48, %v5595_v43  ;;  %v1727_v21 = vmul.f32 0.5, %v1695_v52  ;;  %v1482_v42 = vmul.f32 %v5702_v25, %v5702_v25  ;;  %v5762_v48 = vadd.f32 %v5563_v33, %v5637_v56 }
 0x526   : > { %v1751_v35 = vmul.f32 %v1719_v59, %v5601_v50 }
 0x527   : > { %v1759_v12 = vmul.f32 %v1727_v21, %v5608_v3  ;;  %v5692_v3 = vadd.f32 %v5544_v49, %v5563_v33  ;;  %v5712_v49 = vadd.f32 %v5548_v1, %v5563_v33 }
 0x529   : > { %v1484_v1 = vmul.f32 %v5712_v49, %v5712_v49 }
 0x52b   : > { %v1516_v17 = vmul.f32 %v1484_v1, %v5712_v49 }
 0x5ad   : > { %v2691_v6 = vpop.f32.mrf.mxu0 }
 0x5ae   : > { %v2692_v11 = vadd.f32 %v2691_v6, %v2641_v39 }
 0x5af   : > { %v2693_v19 = vpop.f32.mrf.mxu0 }
 0x5b0   : > { %v2694_v46 = vadd.f32 %v2693_v19, %v2641_v39  ;;  %2745 = vrot.lane.b32.xlu1 %v2692_v11, %s3999_s27  ;;  %v2823_v32 = vmul.f32 %v2692_v11, %v1734_v24  ;;  %v1481_v19 = vmul.f32 %v5696_v55, %v5696_v55 }
 0x5b1   : > { %v2695_v8 = vpop.f32.mrf.mxu0 }
 0x5b2   : > { %v5643_v28 = vmul.f32 %v2694_v46, %v1742_v0  ;;  %v2696_v62 = vadd.f32 %v2695_v8, %v2646_v45  ;;  %v1513_v0 = vmul.f32 %v1481_v19, %v5696_v55  ;;  %v6174_v19 = vld [vmem:[#allocation18_spill] sm:$0xff] }
 0x5b3   : > { %v2697_v13 = vpop.f32.mrf.mxu0 }
 0x5b4   : > { %v2698_v31 = vadd.f32 %v2697_v13, %v2646_v45  ;;  %2751 = vrot.lane.b32.xlu1 %v2692_v11, %s3998_s25  ;;  %2747 = vrot.lane.b32.xlu0 %v2696_v62, %s3999_s27  ;;  %v2824_v40 = vmul.f32 %v2696_v62, %v1735_v7  ;;  %v1514_v7 = vmul.f32 %v1482_v42, %v5702_v25  ;;  %v1545_v34 = vmul.f32 0.044715, %v1513_v0 }
 0x5b6   : > { %v5648_v57 = vmul.f32 %v2698_v31, %v1743_v54  ;;  %v2855_v5 = vpack.c.bf16 %v2824_v40, %v2823_v32  ;;  %v5746_v32 = vadd.f32 %v6172_v26, %v5563_v33  ;;  %v1488_v40 = vmul.f32 %v5734_v9, %v5734_v9 }
 0x5b7   : > { %v1546_v53 = vmul.f32 0.044715, %v1514_v7  ;;  %v1577_v44 = vadd.f32 %v1545_v34, %v5696_v55 }
 0x5b8   : > { %2757 = vrot.lane.b32.xlu1 %v2692_v11, %s4000_s14  ;;  %2753 = vrot.lane.b32.xlu0 %v2696_v62, %s3998_s25  ;;  %v1480_v11 = vmul.f32 %v5692_v3, %v5692_v3 }
 0x5b9   : > { %3536 = vmatprep.mubr.msk.bf16.mxu0 %vm550_vm0, %v2855_v5  ;;  %v5757_v5 = vadd.f32 %v5563_v33, %v5627_v29  ;;  %v1520_v29 = vmul.f32 %v1488_v40, %v5734_v9  ;;  %v1578_v56 = vadd.f32 %v1546_v53, %v5702_v25 }
 0x5ba   : > { %v2734_v60 = vpop.f32.mrf.mxu1  ;;  %v1512_v30 = vmul.f32 %v1480_v11, %v5692_v3 }
 0x5bb   : > { %v2735_v4 = vadd.f32 %v2734_v60, %v2641_v39  ;;  %v1497_v60 = vmul.f32 %v5746_v32, %v5746_v32 }
 0x5bc   : > { %2765 = vrot.lane.b32.xlu1 %v2694_v46, %s3999_s27  ;;  %2759 = vrot.lane.b32.xlu0 %v2696_v62, %s4000_s14  ;;  %v2736_v16 = vpop.f32.mrf.mxu1  ;;  %v1544_v24 = vmul.f32 0.044715, %v1512_v30  ;;  %v5739_v62 = vadd.f32 %v5558_v41, %v5563_v33  ;;  %v5792_v30 = vadd.f32 %v5563_v33, %v6174_v19 }
 0x5bd   : > { %v5659_v20 = vmul.f32 %v2735_v4, %v1750_v63  ;;  %v2737_v22 = vadd.f32 %v2736_v16, %v2641_v39  ;;  %v6173_v63 = vld [vmem:[#allocation17_spill] sm:$0xff] }
 0x5be   : > { %v2738_v10 = vpop.f32.mrf.mxu1  ;;  %v1576_v41 = vadd.f32 %v1544_v24, %v5692_v3  ;;  %v1489_v2 = vmul.f32 %v5739_v62, %v5739_v62  ;;  %v5769_v59 = vadd.f32 %v6173_v63, %v5563_v33 }
 0x5bf   : > { %v5662_v51 = vmul.f32 %v2737_v22, %v1758_v61  ;;  %v2739_v58 = vadd.f32 %v2738_v10, %v2646_v45  ;;  %v5774_v61 = vadd.f32 %v5624_v15, %v5563_v33 }
 0x5c0   : > { %2771 = vrot.lane.b32.xlu1 %v2694_v46, %s3998_s25  ;;  %2767 = vrot.lane.b32.xlu0 %v2698_v31, %s3999_s27  ;;  %v2740_v23 = vpop.f32.mrf.mxu1  ;;  %v1521_v21 = vmul.f32 %v1489_v2, %v5739_v62  ;;  %v1608_v10 = vmul.f32 0.7978846, %v1576_v41  ;;  %v1500_v11 = vmul.f32 %v5769_v59, %v5769_v59  ;;  %v6176_v41 = vld [vmem:[#allocation20_spill] sm:$0xff] }
 0x5c1   : > { %v5667_v6 = vmul.f32 %v2739_v58, %v1751_v35  ;;  %v2741_v43 = vadd.f32 %v2740_v23, %v2646_v45  ;;  %v5708_v45 = vadd.f32 %v5563_v33, %v5554_v47  ;;  %v6171_v47 = vld [vmem:[#allocation13_spill] sm:$0xff]  ;;  %v1491_v23 = vmul.f32 %v5762_v48, %v5762_v48 }
 0x5c2   : > { %v5726_v8 = vadd.f32 %v6171_v47, %v5563_v33  ;;  %v1553_v47 = vmul.f32 0.044715, %v1521_v21  ;;  %3844 = vtanh.f32 %v1608_v10  ;;  %v1532_v26 = vmul.f32 %v1500_v11, %v5769_v59 }
 0x5c3   : > { %v5669_v14 = vmul.f32 %v2741_v43, %v1759_v12  ;;  %v1609_v12 = vmul.f32 0.7978846, %v1577_v44  ;;  %v1523_v7 = vmul.f32 %v1491_v23, %v5762_v48  ;;  %v5812_v53 = vadd.f32 %v5563_v33, %v6176_v41 }
 0x5c4   : > { %2777 = vrot.lane.b32.xlu1 %v2694_v46, %s4000_s14  ;;  %2773 = vrot.lane.b32.xlu0 %v2698_v31, %s3998_s25  ;;  %v1483_v46 = vmul.f32 %v5708_v45, %v5708_v45  ;;  %v1496_v13 = vmul.f32 %v5726_v8, %v5726_v8  ;;  %v1564_v21 = vmul.f32 0.044715, %v1532_v26 }
 0x5c5   : > { %3846 = vtanh.f32 %v1609_v12 }
 0x5c6   : > { %v1515_v54 = vmul.f32 %v1483_v46, %v5708_v45  ;;  %v1528_v52 = vmul.f32 %v1496_v13, %v5726_v8  ;;  %v1492_v46 = vmul.f32 %v5774_v61, %v5774_v61 }
 0x5c8   : > { %2785 = vrot.lane.b32.xlu1 %v2735_v4, %s3999_s27  ;;  %2779 = vrot.lane.b32.xlu0 %v2698_v31, %s4000_s14  ;;  %v1517_v31 = vmul.f32 %v1485_v37, %v5716_v38  ;;  %v1547_v36 = vmul.f32 0.044715, %v1515_v54  ;;  %v1560_v15 = vmul.f32 0.044715, %v1528_v52  ;;  %v1610_v37 = vmul.f32 0.7978846, %v1578_v56 }
 0x5c9   : > { %v1524_v44 = vmul.f32 %v1492_v46, %v5774_v61  ;;  %v1596_v46 = vadd.f32 %v1564_v21, %v5769_v59 }
 0x5ca   : > { %v1549_v16 = vmul.f32 0.044715, %v1517_v31  ;;  %v1579_v35 = vadd.f32 %v1547_v36, %v5708_v45  ;;  %v1592_v54 = vadd.f32 %v1560_v15, %v5726_v8  ;;  %v6175_v31 = vld [vmem:[#allocation19_spill] sm:$0xff]  ;;  %v1585_v36 = vadd.f32 %v1553_v47, %v5739_v62 }
 0x5cb   : > { %v5808_v40 = vadd.f32 %v6175_v31, %v5563_v33  ;;  %3848 = vtanh.f32 %v1610_v37  ;;  %v1556_v23 = vmul.f32 0.044715, %v1524_v44 }
 0x5cc   : > { %2791 = vrot.lane.b32.xlu1 %v2735_v4, %s3998_s25  ;;  %2787 = vrot.lane.b32.xlu0 %v2739_v58, %s3999_s27  ;;  %v1581_v0 = vadd.f32 %v1549_v16, %v5716_v38  ;;  %v1611_v34 = vmul.f32 0.7978846, %v1579_v35  ;;  %v1624_v56 = vmul.f32 0.7978846, %v1592_v54  ;;  %v1499_v35 = vmul.f32 %v5812_v53, %v5812_v53 }
 0x5cd   : > { %v1501_v10 = vmul.f32 %v5808_v40, %v5808_v40  ;;  %v1617_v19 = vmul.f32 0.7978846, %v1585_v36 }
 0x5ce   : > { %3850 = vtanh.f32 %v1611_v34  ;;  %v1613_v16 = vmul.f32 0.7978846, %v1581_v0  ;;  %v1531_v37 = vmul.f32 %v1499_v35, %v5812_v53  ;;  %v1588_v34 = vadd.f32 %v1556_v23, %v5774_v61 }
 0x5d0   : > { %2797 = vrot.lane.b32.xlu1 %v2735_v4, %s4000_s14  ;;  %2793 = vrot.lane.b32.xlu0 %v2739_v58, %s3998_s25  ;;  %v1548_v4 = vmul.f32 0.044715, %v1516_v17  ;;  %v1498_v17 = vmul.f32 %v5792_v30, %v5792_v30 }
 0x5d2   : > { %v1580_v42 = vadd.f32 %v1548_v4, %v5712_v49  ;;  %v1555_v4 = vmul.f32 0.044715, %v1523_v7 }
 0x5d4   : > { %2805 = vrot.lane.b32.xlu1 %v2737_v22, %s3999_s27  ;;  %2799 = vrot.lane.b32.xlu0 %v2739_v58, %s4000_s14  ;;  %v5783_v58 = vadd.f32 %v5632_v18, %v5563_v33  ;;  %v1552_v18 = vmul.f32 0.044715, %v1520_v29  ;;  %v1587_v11 = vadd.f32 %v1555_v4, %v5762_v48  ;;  %v1628_v4 = vmul.f32 0.7978846, %v1596_v46 }
 0x5d6   : > { %v1493_v24 = vmul.f32 %v5783_v58, %v5783_v58  ;;  %v1584_v2 = vadd.f32 %v1552_v18, %v5734_v9 }
 0x5d8   : > { %2811 = vrot.lane.b32.xlu1 %v2737_v22, %s3998_s25  ;;  %2807 = vrot.lane.b32.xlu0 %v2741_v43, %s3999_s27  ;;  %v1525_v63 = vmul.f32 %v1493_v24, %v5783_v58  ;;  %v1616_v15 = vmul.f32 0.7978846, %v1584_v2  ;;  %v6178_v24 = vld [vmem:[#allocation23_spill] sm:$0xff]  ;;  %v6179_v2 = vld [vmem:[#allocation26_spill] sm:$0xff] }
 0x5d9   : > { %v5835_v7 = vadd.f32 %v6178_v24, %v5563_v33  ;;  %v5843_v44 = vadd.f32 %v5563_v33, %v6179_v2 }
 0x5dc   : > { %2817 = vrot.lane.b32.xlu1 %v2737_v22, %s4000_s14  ;;  %2813 = vrot.lane.b32.xlu0 %v2741_v43, %s3998_s25  ;;  %v1490_v22 = vmul.f32 %v5757_v5, %v5757_v5 }
 0x5de   : > { %v1522_v1 = vmul.f32 %v1490_v22, %v5757_v5  ;;  %v1530_v22 = vmul.f32 %v1498_v17, %v5792_v30  ;;  %v1619_v17 = vmul.f32 0.7978846, %v1587_v11  ;;  %v1506_v11 = vmul.f32 %v5843_v44, %v5843_v44 }
 0x5e0   : > { %2819 = vrot.lane.b32.xlu0 %v2741_v43, %s4000_s14  ;;  %v1529_v43 = vmul.f32 %v1497_v60, %v5746_v32  ;;  %v1554_v52 = vmul.f32 0.044715, %v1522_v1  ;;  %v1612_v60 = vmul.f32 0.7978846, %v1580_v42  ;;  %v6177_v42 = vld [vmem:[#allocation21_spill] sm:$0xff]  ;;  %v1533_v1 = vmul.f32 %v1501_v10, %v5808_v40 }
 0x5e1   : > { %v5828_v0 = vadd.f32 %v6177_v42, %v5563_v33  ;;  %v1562_v47 = vmul.f32 0.044715, %v1530_v22 }
 0x5e2   : > { %v1561_v13 = vmul.f32 0.044715, %v1529_v43  ;;  %v1586_v12 = vadd.f32 %v1554_v52, %v5757_v5  ;;  %3852 = vtanh.f32 %v1612_v60  ;;  %v1557_v43 = vmul.f32 0.044715, %v1525_v63  ;;  %v6180_v60 = vld [vmem:[#allocation28_spill] sm:$0xff] }
 0x5e3   : > { %3854 = vtanh.f32 %v1613_v16  ;;  %v1504_v41 = vmul.f32 %v5828_v0, %v5828_v0  ;;  %v1594_v36 = vadd.f32 %v1562_v47, %v5792_v30  ;;  %v1563_v52 = vmul.f32 0.044715, %v1531_v37 }
 0x5e4   : > { %v1593_v29 = vadd.f32 %v1561_v13, %v5746_v32  ;;  %3856 = vtanh.f32 %v1624_v56  ;;  %v1618_v54 = vmul.f32 0.7978846, %v1586_v12  ;;  %v3845_v13 = vpop.eup %3844  ;;  %v1589_v26 = vadd.f32 %v1557_v43, %v5783_v58 }
 0x5e5   : > { %3858 = vtanh.f32 %v1616_v15  ;;  %v3847_v31 = vpop.eup %3846  ;;  %v5848_v63 = vadd.f32 %v5563_v33, %v6180_v60  ;;  %v1565_v16 = vmul.f32 0.044715, %v1533_v1  ;;  %v1620_v56 = vmul.f32 0.7978846, %v1588_v34  ;;  %v6181_v15 = vld [vmem:[#allocation25_spill] sm:$0xff] }
 0x5e6   : > { %v1625_v18 = vmul.f32 0.7978846, %v1593_v29  ;;  %3860 = vtanh.f32 %v1617_v19  ;;  %v1505_v29 = vmul.f32 %v5835_v7, %v5835_v7  ;;  %v3849_v21 = vpop.eup %3848  ;;  %v1672_v22 = vadd.f32 1.0, %v3845_v13  ;;  %v6182_v19 = vld [vmem:[#allocation27_spill] sm:$0xff] }
 0x5e7   : > { %v1673_v10 = vadd.f32 1.0, %v3847_v31  ;;  %v1621_v35 = vmul.f32 0.7978846, %v1589_v26  ;;  %v3851_v23 = vpop.eup %3850  ;;  %v1536_v12 = vmul.f32 %v1504_v41, %v5828_v0  ;;  %v5855_v43 = vadd.f32 %v6181_v15, %v5563_v33 }
 0x5e8   : > { %3862 = vtanh.f32 %v1625_v18  ;;  %v5861_v42 = vadd.f32 %v6182_v19, %v5563_v33  ;;  %v1595_v18 = vadd.f32 %v1563_v52, %v5812_v53  ;;  %v1507_v46 = vmul.f32 %v5848_v63, %v5848_v63 }
 0x5e9   : > { %3864 = vtanh.f32 %v1618_v54  ;;  %v1626_v47 = vmul.f32 0.7978846, %v1594_v36  ;;  %v1597_v1 = vadd.f32 %v1565_v16, %v5808_v40  ;;  %v1537_v37 = vmul.f32 %v1505_v29, %v5835_v7 }
 0x5ea   : > { %3866 = vtanh.f32 %v1619_v17  ;;  %v1674_v24 = vadd.f32 1.0, %v3849_v21  ;;  %v1704_v54 = vmul.f32 0.5, %v1672_v22  ;;  %v1705_v13 = vmul.f32 0.5, %v1673_v10 }
 0x5eb   : > { %3868 = vtanh.f32 %v1628_v4  ;;  %v1675_v26 = vadd.f32 1.0, %v3851_v23  ;;  %v1568_v17 = vmul.f32 0.044715, %v1536_v12  ;;  %v1508_v31 = vmul.f32 %v5855_v43, %v5855_v43 }
 0x5ec   : > { %3870 = vtanh.f32 %v1620_v56  ;;  %v1538_v41 = vmul.f32 %v1506_v11, %v5843_v44  ;;  %v1509_v2 = vmul.f32 %v5861_v42, %v5861_v42  ;;  %v1539_v60 = vmul.f32 %v1507_v46, %v5848_v63 }
 0x5ed   : > { %3872 = vtanh.f32 %v1621_v35  ;;  %v1627_v4 = vmul.f32 0.7978846, %v1595_v18  ;;  %v1569_v16 = vmul.f32 0.044715, %v1537_v37  ;;  %v1706_v29 = vmul.f32 0.5, %v1674_v24 }
 0x5ee   : > { %3874 = vtanh.f32 %v1626_v47  ;;  %v1629_v21 = vmul.f32 0.7978846, %v1597_v1  ;;  %v1736_v10 = vmul.f32 %v1704_v54, %v5692_v3  ;;  %v1737_v35 = vmul.f32 %v1705_v13, %v5696_v55 }
 0x5ef   : > { %v3853_v34 = vpop.eup %3852  ;;  %v1707_v23 = vmul.f32 0.5, %v1675_v26  ;;  %v1600_v11 = vadd.f32 %v1568_v17, %v5828_v0  ;;  %v1540_v19 = vmul.f32 %v1508_v31, %v5855_v43  ;;  %v1570_v50 = vmul.f32 0.044715, %v1538_v41 }
 0x5f0   : > { %v3855_v33 = vpop.eup %3854  ;;  %v1676_v56 = vadd.f32 1.0, %v3853_v34  ;;  %v1541_v46 = vmul.f32 %v1509_v2, %v5861_v42  ;;  %v1571_v24 = vmul.f32 0.044715, %v1539_v60  ;;  %3876 = vtanh.f32 %v1627_v4 }
 0x5f1   : > { %v5873_v52 = vpop.eup %3856  ;;  %v1677_v12 = vadd.f32 1.0, %v3855_v33  ;;  %v1601_v3 = vadd.f32 %v1569_v16, %v5835_v7  ;;  %v1738_v55 = vmul.f32 %v1706_v29, %v5702_v25  ;;  %v1739_v17 = vmul.f32 %v1707_v23, %v5708_v45 }
 0x5f2   : > { %v3859_v22 = vpop.eup %3858  ;;  %v1708_v54 = vmul.f32 0.5, %v1676_v56  ;;  %v1572_v39 = vmul.f32 0.044715, %v1540_v19  ;;  %v1602_v27 = vadd.f32 %v1570_v50, %v5843_v44  ;;  %v1573_v60 = vmul.f32 0.044715, %v1541_v46 }
 0x5f3   : > { %v3861_v15 = vpop.eup %3860  ;;  %v1680_v13 = vadd.f32 1.0, %v3859_v22  ;;  %v1709_v31 = vmul.f32 0.5, %v1677_v12  ;;  %3878 = vtanh.f32 %v1629_v21  ;;  %v1603_v4 = vadd.f32 %v1571_v24, %v5848_v63 }
 0x5f4   : > { %v1681_v41 = vadd.f32 1.0, %v3861_v15  ;;  %v1632_v29 = vmul.f32 0.7978846, %v1600_v11  ;;  %v1740_v45 = vmul.f32 %v1708_v54, %v5712_v49  ;;  %v1633_v23 = vmul.f32 0.7978846, %v1601_v3 }
 0x5f5   : > { %v3863_v37 = vpop.eup %3862  ;;  %v1712_v22 = vmul.f32 0.5, %v1680_v13  ;;  %v1741_v15 = vmul.f32 %v1709_v31, %v5716_v38  ;;  %v1635_v49 = vmul.f32 0.7978846, %v1603_v4  ;;  %v6183_v4 = vpack.c.bf16 %v5648_v57, %v5643_v28 }
 0x5f6   : > { %v3865_v26 = vpop.eup %3864  ;;  %v1713_v19 = vmul.f32 0.5, %v1681_v41  ;;  %3880 = vtanh.f32 %v1632_v29 }
 0x5f7   : > { %v3867_v2 = vpop.eup %3866  ;;  %v1744_v54 = vmul.f32 %v1712_v22, %v5734_v9  ;;  %3882 = vtanh.f32 %v1633_v23 }
 0x5f8   : > { %v5887_v56 = vpop.eup %3868  ;;  %v1683_v21 = vadd.f32 1.0, %v3867_v2 }
 0x5f9   : > { %v3871_v12 = vpop.eup %3870 }
 0x5fa   : > { %v3873_v46 = vpop.eup %3872  ;;  %v1684_v13 = vadd.f32 1.0, %v3871_v12 }
 0x5fb   : > { %v3875_v3 = vpop.eup %3874 }
 0x5fc   : > { %v1716_v29 = vmul.f32 0.5, %v1684_v13 }
 0x5fe   : > { %v1748_v57 = vmul.f32 %v1716_v29, %v5774_v61 }
 0x622   : > { %v2746_v36 = vpop.permute.xlu1 %2745 }
 0x623   : > { %v2825_v1 = vmul.f32 %v2746_v36, %v1736_v10 }
 0x626   : > { %v2748_v18 = vpop.permute.xlu0 %2747  ;;  %v2752_v47 = vpop.permute.xlu1 %2751 }
 0x627   : > { %v2826_v34 = vmul.f32 %v2748_v18, %v1737_v35  ;;  %v2827_v16 = vmul.f32 %v2752_v47, %v1738_v55  ;;  %v1682_v35 = vadd.f32 1.0, %v3865_v26  ;;  %v1604_v18 = vadd.f32 %v1572_v39, %v5855_v43 }
 0x628   : > { %v1605_v47 = vadd.f32 %v1573_v60, %v5861_v42  ;;  %v1745_v39 = vmul.f32 %v1713_v19, %v5739_v62 }
 0x629   : > { %v2856_v33 = vpack.c.bf16 %v2826_v34, %v2825_v1  ;;  %v1634_v1 = vmul.f32 0.7978846, %v1602_v27  ;;  %v1714_v38 = vmul.f32 0.5, %v1682_v35  ;;  %v1688_v27 = vadd.f32 1.0, %v5873_v52 }
 0x62a   : > { %v2754_v36 = vpop.permute.xlu0 %2753  ;;  %v2758_v10 = vpop.permute.xlu1 %2757  ;;  %v1636_v62 = vmul.f32 0.7978846, %v1604_v18 }
 0x62b   : > { %v2828_v25 = vmul.f32 %v2754_v36, %v1739_v17  ;;  %3537 = vmatmul.mubr.msk.bf16.vlgmr.msra.gmra.mxu0 %vm550_vm0, %v2856_v33  ;;  %v2829_v34 = vmul.f32 %v2758_v10, %v1740_v45  ;;  %v1715_v33 = vmul.f32 0.5, %v1683_v21  ;;  %v1685_v17 = vadd.f32 1.0, %v3873_v46  ;;  %v3877_v10 = vpop.eup %3876 }
 0x62c   : > { %v1689_v36 = vadd.f32 1.0, %v3863_v37  ;;  %3884 = vtanh.f32 %v1634_v1  ;;  %v1746_v9 = vmul.f32 %v1714_v38, %v5757_v5  ;;  %v3879_v37 = vpop.eup %3878  ;;  %v1691_v19 = vadd.f32 1.0, %v3877_v10 }
 0x62d   : > { %v2857_v50 = vpack.c.bf16 %v2828_v25, %v2827_v16  ;;  %3886 = vtanh.f32 %v1635_v49  ;;  %v1637_v16 = vmul.f32 0.7978846, %v1605_v47  ;;  %v1747_v52 = vmul.f32 %v1715_v33, %v5762_v48 }
 0x62e   : > { %v2760_v24 = vpop.permute.xlu0 %2759  ;;  %v2766_v11 = vpop.permute.xlu1 %2765  ;;  %v1717_v45 = vmul.f32 0.5, %v1685_v17  ;;  %v1721_v5 = vmul.f32 0.5, %v1689_v36  ;;  %3888 = vtanh.f32 %v1636_v62  ;;  %v1692_v1 = vadd.f32 1.0, %v5887_v56 }
 0x62f   : > { %v2830_v55 = vmul.f32 %v2760_v24, %v1741_v15  ;;  %3540 = vmatprep.mubr.msk.bf16.mxu0 %vm550_vm0, %v2857_v50  ;;  %v2833_v2 = vmul.f32 %v2766_v11, %v1744_v54  ;;  %v1720_v50 = vmul.f32 0.5, %v1688_v27  ;;  %v1690_v15 = vadd.f32 1.0, %v3875_v3  ;;  %v3881_v24 = vpop.eup %3880 }
 0x630   : > { %v1749_v21 = vmul.f32 %v1717_v45, %v5783_v58  ;;  %3890 = vtanh.f32 %v1637_v16  ;;  %v1753_v61 = vmul.f32 %v1721_v5, %v5746_v32  ;;  %v1723_v3 = vmul.f32 0.5, %v1691_v19 }
 0x631   : > { %v2858_v26 = vpack.c.bf16 %v2830_v55, %v2829_v34  ;;  %v1752_v11 = vmul.f32 %v1720_v50, %v5726_v8  ;;  %v1693_v34 = vadd.f32 1.0, %v3879_v37  ;;  %v3883_v55 = vpop.eup %3882  ;;  %v1722_v58 = vmul.f32 0.5, %v1690_v15 }
 0x632   : > { %v2768_v31 = vpop.permute.xlu0 %2767  ;;  %v2772_v41 = vpop.permute.xlu1 %2771  ;;  %v1724_v33 = vmul.f32 0.5, %v1692_v1  ;;  %v1755_v56 = vmul.f32 %v1723_v3, %v5812_v53 }
 0x633   : > { %v2834_v60 = vmul.f32 %v2768_v31, %v1745_v39  ;;  %3541 = vmatmul.mubr.msk.bf16.gmra.mxu0 %vm550_vm0, %v2858_v26  ;;  %v2835_v23 = vmul.f32 %v2772_v41, %v1746_v9  ;;  %v1725_v17 = vmul.f32 0.5, %v1693_v34  ;;  %v1696_v31 = vadd.f32 1.0, %v3881_v24 }
 0x634   : > { %3544 = vmatprep.mubr.msk.bf16.mxu0 %vm550_vm0, %v6183_v4  ;;  %v1754_v27 = vmul.f32 %v1722_v58, %v5792_v30  ;;  %v1756_v9 = vmul.f32 %v1724_v33, %v5769_v59  ;;  %v6184_v4 = vpack.c.bf16 %v5667_v6, %v5659_v20 }
 0x635   : > { %v2860_v25 = vpack.c.bf16 %v2834_v60, %v2833_v2  ;;  %v1697_v2 = vadd.f32 1.0, %v3883_v55  ;;  %v1728_v62 = vmul.f32 0.5, %v1696_v31  ;;  %v1757_v53 = vmul.f32 %v1725_v17, %v5808_v40 }
 0x636   : > { %v2774_v22 = vpop.permute.xlu0 %2773  ;;  %v2778_v35 = vpop.permute.xlu1 %2777 }
 0x637   : > { %v2836_v12 = vmul.f32 %v2774_v22, %v1747_v52  ;;  %v2837_v18 = vmul.f32 %v2778_v35, %v1748_v57  ;;  %v1729_v52 = vmul.f32 0.5, %v1697_v2  ;;  %v1760_v59 = vmul.f32 %v1728_v62, %v5828_v0 }
 0x639   : > { %v2861_v28 = vpack.c.bf16 %v2836_v12, %v2835_v23  ;;  %v3885_v39 = vpop.eup %3884  ;;  %v1761_v6 = vmul.f32 %v1729_v52, %v5835_v7 }
 0x63a   : > { %v2780_v46 = vpop.permute.xlu0 %2779  ;;  %v2786_v48 = vpop.permute.xlu1 %2785  ;;  %v1698_v16 = vadd.f32 1.0, %v3885_v39 }
 0x63b   : > { %v2838_v47 = vmul.f32 %v2780_v46, %v1749_v21  ;;  %3545 = vmatmul.mubr.msk.bf16.gmra.mxu0 %vm550_vm0, %v2860_v25  ;;  %v2841_v13 = vmul.f32 %v2786_v48, %v1752_v11  ;;  %v3887_v8 = vpop.eup %3886 }
 0x63c   : > { %3548 = vmatprep.mubr.msk.bf16.mxu0 %vm550_vm0, %v2861_v28  ;;  %v3889_v25 = vpop.eup %3888  ;;  %v1699_v29 = vadd.f32 1.0, %v3887_v8  ;;  %v1730_v12 = vmul.f32 0.5, %v1698_v16 }
 0x63d   : > { %v2862_v49 = vpack.c.bf16 %v2838_v47, %v2837_v18  ;;  %v3891_v45 = vpop.eup %3890  ;;  %v1700_v50 = vadd.f32 1.0, %v3889_v25 }
 0x63e   : > { %v2788_v54 = vpop.permute.xlu0 %2787  ;;  %v2792_v38 = vpop.permute.xlu1 %2791  ;;  %v1731_v5 = vmul.f32 0.5, %v1699_v29  ;;  %v1701_v15 = vadd.f32 1.0, %v3891_v45  ;;  %v1762_v21 = vmul.f32 %v1730_v12, %v5843_v44  ;;  %v6185_v44 = vpack.c.bf16 %v5669_v14, %v5662_v51 }
 0x63f   : > { %v2842_v26 = vmul.f32 %v2788_v54, %v1753_v61  ;;  %v2843_v32 = vmul.f32 %v2792_v38, %v1754_v27  ;;  %v1732_v48 = vmul.f32 0.5, %v1700_v50 }
 0x640   : > { %v1763_v0 = vmul.f32 %v1731_v5, %v5848_v63  ;;  %v1733_v18 = vmul.f32 0.5, %v1701_v15 }
 0x641   : > { %v2864_v41 = vpack.c.bf16 %v2842_v26, %v2841_v13  ;;  %v1764_v34 = vmul.f32 %v1732_v48, %v5855_v43  ;;  %v5939_v43 = vld [vmem:[%s6128_s12] ss:$0 sm:$0xff] }
 0x642   : > { %v2794_v60 = vpop.permute.xlu0 %2793  ;;  %v2798_v36 = vpop.permute.xlu1 %2797  ;;  %v1765_v55 = vmul.f32 %v1733_v18, %v5861_v42 }
 0x643   : > { %v2844_v10 = vmul.f32 %v2794_v60, %v1755_v56  ;;  %3549 = vmatmul.mubr.msk.bf16.gmra.mxu0 %vm550_vm0, %v2862_v49  ;;  %v2845_v37 = vmul.f32 %v2798_v36, %v1756_v9 }
 0x644   : > { %3552 = vmatprep.mubr.msk.bf16.mxu0 %vm550_vm0, %v6184_v4 }
 0x645   : > { %v2865_v30 = vpack.c.bf16 %v2844_v10, %v2843_v32 }
 0x646   : > { %v2800_v22 = vpop.permute.xlu0 %2799  ;;  %v2806_v35 = vpop.permute.xlu1 %2805 }
 0x647   : > { %v2846_v23 = vmul.f32 %v2800_v22, %v1757_v53  ;;  %v2849_v57 = vmul.f32 %v2806_v35, %v1760_v59 }
 0x649   : > { %v2866_v20 = vpack.c.bf16 %v2846_v23, %v2845_v37 }
 0x64a   : > { %v2808_v19 = vpop.permute.xlu0 %2807  ;;  %v2812_v28 = vpop.permute.xlu1 %2811 }
 0x64b   : > { %v2850_v40 = vmul.f32 %v2808_v19, %v1761_v6  ;;  %3553 = vmatmul.mubr.msk.bf16.gmra.mxu0 %vm550_vm0, %v2864_v41  ;;  %v2851_v24 = vmul.f32 %v2812_v28, %v1762_v21 }
 0x64c   : > { %3556 = vmatprep.mubr.msk.bf16.mxu0 %vm550_vm0, %v2865_v30 }
 0x64d   : > { %v2868_v46 = vpack.c.bf16 %v2850_v40, %v2849_v57 }
 0x64e   : > { %v2814_v47 = vpop.permute.xlu0 %2813  ;;  %v2818_v11 = vpop.permute.xlu1 %2817 }
 0x64f   : > { %v2852_v7 = vmul.f32 %v2814_v47, %v1763_v0  ;;  %v2853_v61 = vmul.f32 %v2818_v11, %v1764_v34 }
 0x651   : > { %v2869_v1 = vpack.c.bf16 %v2852_v7, %v2851_v24 }
 0x652   : > { %v2820_v49 = vpop.permute.xlu0 %2819 }
 0x653   : > { %v2854_v58 = vmul.f32 %v2820_v49, %v1765_v55  ;;  %3557 = vmatmul.mubr.msk.bf16.gmra.mxu0 %vm550_vm0, %v2866_v20 }
 0x654   : > { %3560 = vmatprep.mubr.msk.bf16.mxu0 %vm550_vm0, %v6185_v44 }
 0x655   : > { %v2870_v63 = vpack.c.bf16 %v2854_v58, %v2853_v61 }
 0x65b   : > { %3561 = vmatmul.mubr.msk.bf16.gmra.mxu0 %vm550_vm0, %v2868_v46 }
 0x65c   : > { %3564 = vmatprep.mubr.msk.bf16.mxu0 %vm550_vm0, %v2869_v1 }
 0x663   : > { %3565 = vmatmul.mubr.msk.bf16.gmra.mxu0 %vm550_vm0, %v2870_v63 }
 0x6eb   : > { %v3538_v42 = vpop.f32.mrf.mxu0 }
 0x6ec   : > { %v2985_v3 = vadd.f32 %v3538_v42, %v5939_v43 }
 0x6ed   : > { %v2976_v54 = vpop.f32.mrf.mxu0 }
 0x6ee   : > { %v5943_v51 = vadd.f32 %v5939_v43, %v2976_v54  ;;  %3105 = vrot.lane.b32.xlu1 %v2985_v3, %s4000_s14 }
 0x6ef   : > { %v3539_v14 = vpop.f32.mrf.mxu0 }
 0x6f0   : > { %v2988_v38 = vadd.f32 %v3539_v14, %v5939_v43 }
 0x6f1   : > { %v2979_v13 = vpop.f32.mrf.mxu0 }
 0x6f2   : > { %v5948_v26 = vadd.f32 %v5939_v43, %v2979_v13  ;;  %3107 = vrot.lane.b32.xlu0 %v2988_v38, %s4000_s14 }
 0x6f3   : > { %v3542_v39 = vpop.f32.mrf.mxu0 }
 0x6f4   : > { %v3001_v33 = vadd.f32 %v3542_v39, %v5939_v43 }
 0x6f5   : > { %v2992_v17 = vpop.f32.mrf.mxu0 }
 0x6f6   : > { %3121 = vrot.lane.b32.xlu1 %v3001_v33, %s3999_s27  ;;  %v2993_v8 = vadd.f32 %v5939_v43, %v2992_v17 }
 0x6f7   : > { %v3543_v31 = vpop.f32.mrf.mxu0 }
 0x6f8   : > { %v3004_v41 = vadd.f32 %v3543_v31, %v5939_v43  ;;  %v3892_v31 = vld [vmem:[%s4180_s22] sm:$0xff] }
 0x6f9   : > { %v2995_v27 = vpop.f32.mrf.mxu0 }
 0x6fa   : > { %3123 = vrot.lane.b32.xlu0 %v3004_v41, %s3999_s27  ;;  %3113 = vrot.lane.b32.xlu1 %v2993_v8, %s3998_s25  ;;  %v2996_v2 = vadd.f32 %v5939_v43, %v2995_v27 }
 0x6fb   : > { %v3546_v56 = vpop.f32.mrf.mxu0 }
 0x6fc   : > { %v3017_v60 = vadd.f32 %v3546_v56, %v5939_v43  ;;  %v3893_v56 = vld [vmem:[%s4180_s22 + $0x20] sm:$0xff] }
 0x6fd   : > { %v3008_v36 = vpop.f32.mrf.mxu0 }
 0x6fe   : > { %v5960_v32 = vadd.f32 %v5939_v43, %v3008_v36  ;;  %3115 = vrot.lane.b32.xlu0 %v2996_v2, %s3998_s25  ;;  %3129 = vrot.lane.b32.xlu1 %v3017_v60, %s4000_s14 }
 0x6ff   : > { %v3547_v10 = vpop.f32.mrf.mxu0 }
 0x700   : > { %v3020_v9 = vadd.f32 %v3547_v10, %v5939_v43 }
 0x701   : > { %v3011_v4 = vpop.f32.mrf.mxu0 }
 0x702   : > { %v5966_v62 = vadd.f32 %v5939_v43, %v3011_v4  ;;  %3131 = vrot.lane.b32.xlu0 %v3020_v9, %s4000_s14 }
 0x703   : > { %v3550_v16 = vpop.f32.mrf.mxu0 }
 0x704   : > { %v3033_v25 = vadd.f32 %v3550_v16, %v5939_v43 }
 0x705   : > { %v3024_v30 = vpop.f32.mrf.mxu0 }
 0x706   : > { %3145 = vrot.lane.b32.xlu1 %v3033_v25, %s3999_s27  ;;  %v3025_v52 = vadd.f32 %v5939_v43, %v3024_v30  ;;  %v3894_v30 = vld [vmem:[%s4180_s22 + $0x8] sm:$0xff] }
 0x707   : > { %v3551_v53 = vpop.f32.mrf.mxu0 }
 0x708   : > { %v3036_v29 = vadd.f32 %v3551_v53, %v5939_v43 }
 0x709   : > { %v3027_v45 = vpop.f32.mrf.mxu0 }
 0x70a   : > { %3147 = vrot.lane.b32.xlu0 %v3036_v29, %s3999_s27  ;;  %3137 = vrot.lane.b32.xlu1 %v3025_v52, %s3998_s25  ;;  %v3028_v35 = vadd.f32 %v5939_v43, %v3027_v45 }
 0x70b   : > { %v3554_v22 = vpop.f32.mrf.mxu0 }
 0x70c   : > { %v3049_v37 = vadd.f32 %v3554_v22, %v5939_v43 }
 0x70d   : > { %v3040_v23 = vpop.f32.mrf.mxu0 }
 0x70e   : > { %v5978_v59 = vadd.f32 %v5939_v43, %v3040_v23  ;;  %3139 = vrot.lane.b32.xlu0 %v3028_v35, %s3998_s25  ;;  %3153 = vrot.lane.b32.xlu1 %v3049_v37, %s4000_s14 }
 0x70f   : > { %v3555_v12 = vpop.f32.mrf.mxu0 }
 0x710   : > { %v3052_v50 = vadd.f32 %v3555_v12, %v5939_v43 }
 0x711   : > { %v3043_v20 = vpop.f32.mrf.mxu0 }
 0x712   : > { %v5984_v6 = vadd.f32 %v5939_v43, %v3043_v20  ;;  %3155 = vrot.lane.b32.xlu0 %v3052_v50, %s4000_s14 }
 0x713   : > { %v3558_v5 = vpop.f32.mrf.mxu0 }
 0x714   : > { %v3065_v15 = vadd.f32 %v3558_v5, %v5939_v43 }
 0x715   : > { %v3056_v19 = vpop.f32.mrf.mxu0 }
 0x716   : > { %3169 = vrot.lane.b32.xlu1 %v3065_v15, %s3999_s27  ;;  %v3057_v57 = vadd.f32 %v5939_v43, %v3056_v19  ;;  %v3896_v19 = vld [vmem:[%s4180_s22 + $0x10] sm:$0xff] }
 0x717   : > { %v3559_v28 = vpop.f32.mrf.mxu0 }
 0x718   : > { %v3068_v40 = vadd.f32 %v3559_v28, %v5939_v43 }
 0x719   : > { %v3059_v21 = vpop.f32.mrf.mxu0 }
 0x71a   : > { %3171 = vrot.lane.b32.xlu0 %v3068_v40, %s3999_s27  ;;  %3161 = vrot.lane.b32.xlu1 %v3057_v57, %s3998_s25  ;;  %v3060_v0 = vadd.f32 %v5939_v43, %v3059_v21 }
 0x71b   : > { %v3562_v46 = vpop.f32.mrf.mxu0 }
 0x71c   : > { %v3081_v48 = vadd.f32 %v3562_v46, %v5939_v43  ;;  %v3897_v46 = vld [vmem:[%s4180_s22 + $0x30] sm:$0xff] }
 0x71d   : > { %v3072_v18 = vpop.f32.mrf.mxu0 }
 0x71e   : > { %v5996_v47 = vadd.f32 %v5939_v43, %v3072_v18  ;;  %3163 = vrot.lane.b32.xlu0 %v3060_v0, %s3998_s25  ;;  %3177 = vrot.lane.b32.xlu1 %v3081_v48, %s4000_s14 }
 0x71f   : > { %v3563_v24 = vpop.f32.mrf.mxu0 }
 0x720   : > { %v3084_v7 = vadd.f32 %v3563_v24, %v5939_v43 }
 0x721   : > { %v3075_v11 = vpop.f32.mrf.mxu0 }
 0x722   : > { %v6002_v1 = vadd.f32 %v5939_v43, %v3075_v11  ;;  %3179 = vrot.lane.b32.xlu0 %v3084_v7, %s4000_s14 }
 0x723   : > { %v3566_v34 = vpop.f32.mrf.mxu0 }
 0x724   : > { %v3097_v44 = vadd.f32 %v3566_v34, %v5939_v43 }
 0x725   : > { %v3088_v55 = vpop.f32.mrf.mxu0 }
 0x726   : > { %v3089_v49 = vadd.f32 %v5939_v43, %v3088_v55 }
 0x727   : > { %v3567_v61 = vpop.f32.mrf.mxu0 }
 0x728   : > { %3185 = vrot.lane.b32.xlu1 %v3089_v49, %s3998_s25  ;;  %v3100_v42 = vadd.f32 %v3567_v61, %v5939_v43  ;;  %v3898_v49 = vld [vmem:[%s4180_s22 + $0x18] sm:$0xff] }
 0x729   : > { %v3091_v58 = vpop.f32.mrf.mxu0 }
 0x72a   : > { %v3092_v63 = vadd.f32 %v5939_v43, %v3091_v58 }
 0x72c   : > { %3187 = vrot.lane.b32.xlu0 %v3092_v63, %s3998_s25  ;;  %3193 = vrot.lane.b32.xlu1 %v3097_v44, %s3999_s27  ;;  %s6022_s25 = scalar_lea.vmem [#allocation5], %s3333_s15 }
 0x72d   : > { %s3253_s15 = sshll.u32 %s6022_s25, 4  ;;  %s6062_s15 = int_to_ptr.vmem [resolvable:$true] %s3253_s15 }
 0x72e   : > { %s3928_s21 = scalar_lea.vmem %s6062_s15, 1024  ;;  %p3935_p5 = scmp.lt.s32.totalorder %s6062_s15, %s3933_s18 }
 0x72f   : > { %p3929_p11 = scmp.ne.s32.totalorder %s6062_s15, %s3928_s21  ;;  %p3936_p7 = scmp.lt.s32.totalorder %s3934_s16, %s3928_s21 }
 0x730   : > { %3195 = vrot.lane.b32.xlu0 %v3100_v42, %s3999_s27  ;;  %s3405_s27 = sshll.u32 %s4096_s29, 9  ;;  %v3899_v42 = vld [vmem:[%s4180_s22 + $0x38] sm:$0xff]  ;;  %s3240_s29 = scalar_lea.sflag [#allocation4], %s4174_s13 }
 0x731   : > { %s6070_s23 = scalar_lea.hbm %s6186_s30, %s3405_s27  ;;  %p3930_p13 = pnand %p3929_p11, %p6187_p12 }
 0x732   : > { %p3937_p8 = por %p3936_p7, %p3935_p5 }
 0x733   : > { %p3931_p4 = pneg %p3930_p13 }
 0x735   : > { %p3938_p10 = pnand %p3937_p8, %p3931_p4 }
 0x760   : > { %v3106_v3 = vpop.permute.xlu1 %3105 }
 0x761   : > { %v3199_v38 = vsel %vm550_vm0, %v5943_v51, %v3106_v3 }
 0x764   : > { %v3108_v54 = vpop.permute.xlu0 %3107 }
 0x765   : > { %v3200_v43 = vsel %vm550_vm0, %v5948_v26, %v3108_v54 }
 0x768   : > { %v3122_v14 = vpop.permute.xlu1 %3121 }
 0x76c   : > { %v3124_v13 = vpop.permute.xlu0 %3123  ;;  %v3114_v39 = vpop.permute.xlu1 %3113 }
 0x76d   : > { %v3201_v33 = vsel %vm2603_vm2, %v3199_v38, %v3114_v39 }
 0x76e   : > { %v3203_v17 = vsel %vm2606_vm1, %v3201_v33, %v3122_v14 }
 0x76f   : > { %v3223_v8 = vadd.f32 %v3892_v31, %v3203_v17 }
 0x770   : > { %v3116_v41 = vpop.permute.xlu0 %3115  ;;  %v3130_v60 = vpop.permute.xlu1 %3129 }
 0x771   : > { %3231 = vst [vmem:[%s6022_s25] sm:$0xff] %v3223_v8  ;;  %v3202_v51 = vsel %vm2603_vm2, %v3200_v43, %v3116_v41  ;;  %v3205_v10 = vsel %vm550_vm0, %v5960_v32, %v3130_v60  ;;  %v3895_v32 = vld [vmem:[%s4180_s22 + $0x28] sm:$0xff] }
 0x772   : > { %v3204_v27 = vsel %vm2606_vm1, %v3202_v51, %v3124_v13 }
 0x773   : > { %v3227_v2 = vadd.f32 %v3893_v56, %v3204_v27 }
 0x774   : > { %v3132_v36 = vpop.permute.xlu0 %3131 }
 0x775   : > { %3235 = vst [vmem:[%s6022_s25 + $0x20] sm:$0xff] %v3227_v2  ;;  %v3206_v52 = vsel %vm550_vm0, %v5966_v62, %v3132_v36 }
 0x778   : > { %v3146_v26 = vpop.permute.xlu1 %3145 }
 0x77c   : > { %v3148_v9 = vpop.permute.xlu0 %3147  ;;  %v3138_v4 = vpop.permute.xlu1 %3137 }
 0x77d   : > { %v3207_v16 = vsel %vm2603_vm2, %v3205_v10, %v3138_v4 }
 0x77e   : > { %v3209_v25 = vsel %vm2606_vm1, %v3207_v16, %v3146_v26 }
 0x77f   : > { %v3224_v53 = vadd.f32 %v3894_v30, %v3209_v25 }
 0x780   : > { %v3140_v29 = vpop.permute.xlu0 %3139  ;;  %v3154_v37 = vpop.permute.xlu1 %3153 }
 0x781   : > { %3232 = vst [vmem:[%s6022_s25 + $0x8] sm:$0xff] %v3224_v53  ;;  %v3208_v45 = vsel %vm2603_vm2, %v3206_v52, %v3140_v29  ;;  %v3211_v50 = vsel %vm550_vm0, %v5978_v59, %v3154_v37 }
 0x782   : > { %v3210_v22 = vsel %vm2606_vm1, %v3208_v45, %v3148_v9 }
 0x783   : > { %v3228_v35 = vadd.f32 %v3895_v32, %v3210_v22 }
 0x784   : > { %v3156_v23 = vpop.permute.xlu0 %3155 }
 0x785   : > { %3236 = vst [vmem:[%s6022_s25 + $0x28] sm:$0xff] %v3228_v35  ;;  %v3212_v57 = vsel %vm550_vm0, %v5984_v6, %v3156_v23 }
 0x788   : > { %v3170_v12 = vpop.permute.xlu1 %3169 }
 0x78c   : > { %v3172_v62 = vpop.permute.xlu0 %3171  ;;  %v3162_v20 = vpop.permute.xlu1 %3161 }
 0x78d   : > { %v3213_v5 = vsel %vm2603_vm2, %v3211_v50, %v3162_v20 }
 0x78e   : > { %v3215_v15 = vsel %vm2606_vm1, %v3213_v5, %v3170_v12 }
 0x78f   : > { %v3225_v28 = vadd.f32 %v3896_v19, %v3215_v15 }
 0x790   : > { %v3164_v40 = vpop.permute.xlu0 %3163  ;;  %v3178_v48 = vpop.permute.xlu1 %3177 }
 0x791   : > { %3233 = vst [vmem:[%s6022_s25 + $0x10] sm:$0xff] %v3225_v28  ;;  %v3214_v21 = vsel %vm2603_vm2, %v3212_v57, %v3164_v40  ;;  %v3217_v7 = vsel %vm550_vm0, %v5996_v47, %v3178_v48 }
 0x792   : > { %v3216_v59 = vsel %vm2606_vm1, %v3214_v21, %v3172_v62 }
 0x793   : > { %v3229_v0 = vadd.f32 %v3897_v46, %v3216_v59 }
 0x794   : > { %v3180_v18 = vpop.permute.xlu0 %3179 }
 0x795   : > { %3237 = vst [vmem:[%s6022_s25 + $0x30] sm:$0xff] %v3229_v0  ;;  %v3218_v58 = vsel %vm550_vm0, %v6002_v1, %v3180_v18 }
 0x79a   : > { %v3186_v24 = vpop.permute.xlu1 %3185 }
 0x79b   : > { %v3219_v6 = vsel %vm2603_vm2, %v3217_v7, %v3186_v24 }
 0x79e   : > { %v3188_v11 = vpop.permute.xlu0 %3187  ;;  %v3194_v34 = vpop.permute.xlu1 %3193 }
 0x79f   : > { %v3221_v55 = vsel %vm2606_vm1, %v3219_v6, %v3194_v34  ;;  %v3220_v47 = vsel %vm2603_vm2, %v3218_v58, %v3188_v11 }
 0x7a0   : > { %v3226_v61 = vadd.f32 %v3898_v49, %v3221_v55 }
 0x7a2   : > { %3234 = vst [vmem:[%s6022_s25 + $0x18] sm:$0xff] %v3226_v61  ;;  %v3196_v44 = vpop.permute.xlu0 %3195 }
 0x7a3   : > { %v3222_v63 = vsel %vm2606_vm1, %v3220_v47, %v3196_v44 }
 0x7a4   : > { %v3230_v3 = vadd.f32 %v3899_v42, %v3222_v63 }
 0x7a6   : > { %3238 = vst [vmem:[%s6022_s25 + $0x38] sm:$0xff] %v3230_v3 }
 0x7a7   : > { %3941 = shalt.err (!%p3938_p10)
}
 0x7a8   : > { %s3942_s22 = scalar_lea.hbm %s6070_s23, 1024  ;;  %s3946_s17 = scalar_lea.hbm %s6186_s30, 2048 }
 0x7a9   : > { %p3943_p1 = scmp.ne.s32.totalorder %s6070_s23, %s3942_s22  ;;  %p3947_p0 = scmp.lt.s32.totalorder %s6070_s23, %s6186_s30 }
 0x7aa   : > { %p3948_p2 = scmp.lt.s32.totalorder %s3946_s17, %s3942_s22 }
 0x7ab   : > { %p3944_p3 = pnand %p3943_p1, %p6187_p12 }
 0x7ac   : > { %p3949_p6 = por %p3948_p2, %p3947_p0 }
 0x7ad   : > { %p3945_p9 = pneg %p3944_p3 }
 0x7af   : > { %p3950_p11 = pnand %p3949_p6, %p3945_p9 }
 0x7b1   : > { %3953 = shalt.err (!%p3950_p11)
}
 0x7b2   : > { %s4003_s21 = smov 512   ;;  %s4004_s18 = smov 1024  }
 0x7b3   : > { %3574 = dma.vmem_to_hbm [thread:$0]  (%p6187_p12), %s6062_s15, 1024, %s6070_s23, %s3240_s29, %s4003_s21, %s4004_s18, %s4000_s14  }
 0x7b4 PF: > { %s6188_s16 = sld [smem:[#allocation8_spill]]  ;;  %p6191_p4 = scmp.ge.s32.totalorder %s3992_s28, 2 }
 0x7b5   : > { %s6189_s25 = sld [smem:[#allocation12_spill]] }
 0x7ba   : > { %s3268_s27 = sand.u32 1, %s6188_s16  }
 0x7bb   : > { %p6190_p13 = scmp.ne.s32.totalorder %s6189_s25, 0  ;;  %s3269_s22 = scalar_lea.sflag [#allocation4], %s3268_s27 }
 0x7bd   : > { %p3581_p5 = pnand %p6191_p4, %p6190_p13 }
 0x7bf   : > { %p3582_p7 = pneg %p3581_p5 }
 0x7c1   : > { %3975 = dma.done.wait (%p3582_p7), %s3269_s22, 1024  }
 0x7c2   : > { %3977 = vsyncadd (%p3582_p7), %s3269_s22, 4294966272  ;;  %s6192_s28 = sld [smem:[#allocation10_spill]]  ;;  %s6195_s25 = smov %s3984_s26 }
 0x7c3   : > { %s6193_s17 = sld [smem:[#allocation9_spill]] }
 0x7c4   : > { %s6194_s27 = sld [smem:[#allocation11_spill]] }
 0x7c8   : > { %p26_p8 = scmp.ge.s32.totalorder %s6192_s28, 4  }
 0x7c9   : > { %s6196_s26 = smov %s6193_s17 }
 0x7ca   :  { %28 = sbr.rel (!%p26_p8) target bundleno = 7 (0x7), region = 117 }
 0x7cf   :  { %3274 = vsyncpa [#allocation3], 1 }
 0x7d0   :  { %3276 = vsyncpa [#allocation3 + $0x1], 1 }
 0x7d1   :  { %3277 = vsyncpa [#allocation4], 1 }
 0x7d2   :  { %3279 = vsyncpa [#allocation4 + $0x1], 1 }

</bundles_post_ra>
